<compile_context>
chip_gen: v5e
topology: v5e:2x2
jax: 0.10.0
libtpu: 0.0.40
codegen_flags: <defaults>
</compile_context>

<pallas_src>
import jax
import jax.numpy as jnp
from jax.experimental import pallas as pl
from jax.experimental.pallas import tpu as pltpu

LANE = 128


def _round_up(x, m):
    return (x + m - 1) // m * m


def mlp_kernel(x_ref,
               w1_ref, b1_ref,
               w2_ref, b2_ref,
               w3_ref, b3_ref,
               w4_ref, b4_ref,
               w5_ref, b5_ref,
               o_ref):
    """One batch tile of the fused 5-layer MLP.

    x and weights are bf16 (MXU native input), accumulation is f32 via
    preferred_element_type, bias-add / ReLU run in f32 on the VPU.
    """
    h = x_ref[...]  # (TILE_B, IN_PAD) bf16

    def layer(h, w_ref, b_ref, relu):
        acc = jnp.dot(h.astype(jnp.bfloat16), w_ref[...],
                      preferred_element_type=jnp.float32)
        acc = acc + b_ref[...]
        if relu:
            acc = jnp.maximum(acc, 0.0)
        return acc

    h = layer(h, w1_ref, b1_ref, True)
    h = layer(h, w2_ref, b2_ref, True)
    h = layer(h, w3_ref, b3_ref, True)
    h = layer(h, w4_ref, b4_ref, True)
    out = layer(h, w5_ref, b5_ref, False)
    o_ref[...] = out.astype(o_ref.dtype)


def pad_params(params):
    """Zero-pad (in, out) weights / biases to 128-multiples; weights -> bf16."""
    padded = []
    for w_t, b in params:
        din, dout = w_t.shape
        din_p, dout_p = _round_up(din, LANE), _round_up(dout, LANE)
        w_p = jnp.zeros((din_p, dout_p), jnp.float32).at[:din, :dout].set(w_t)
        b_p = jnp.zeros((1, dout_p), jnp.float32).at[0, :dout].set(b)
        padded.append((w_p.astype(jnp.bfloat16), b_p))
    return padded


def mlp_forward(x, padded_params, out_dim, tile_b=None):
    """x: (B, 784) f32; padded_params: list of (W bf16 (in_p, out_p), b f32 (1, out_p))."""
    B, din = x.shape
    in_pad = padded_params[0][0].shape[0]
    out_pad = padded_params[-1][0].shape[1]

    if tile_b is None:
        # Big batch tiles keep the MXU fed; small batches get a single tile.
        tile_b = min(256, _round_up(B, 8))
    tile_b = max(8, _round_up(tile_b, 8))

    b_pad = _round_up(B, tile_b)
    # Pad + cast to bf16 once in the wrapper: halves x HBM traffic into the
    # kernel and is numerically identical (the matmul input was bf16 anyway).
    x_p = (jnp.zeros((b_pad, in_pad), jnp.float32).at[:B, :din].set(x)
           ).astype(jnp.bfloat16)

    grid = (b_pad // tile_b,)

    flat_args = [x_p]
    in_specs = [pl.BlockSpec((tile_b, in_pad), lambda i: (i, 0))]
    for w_p, b_p in padded_params:
        flat_args += [w_p, b_p]
        # Constant index_map: weights & biases stay resident in VMEM across
        # all batch tiles (no re-DMA per grid step).
        in_specs += [
            pl.BlockSpec(w_p.shape, lambda i: (0, 0)),
            pl.BlockSpec(b_p.shape, lambda i: (0, 0)),
        ]

    flops = 2 * b_pad * sum(w.shape[0] * w.shape[1] for w, _ in padded_params)
    bytes_accessed = (
        sum(w.size * 2 + b.size * 4 for w, b in padded_params)
        + b_pad * in_pad * 2 + b_pad * out_pad * 4)

    out_padded = pl.pallas_call(
        mlp_kernel,
        grid=grid,
        in_specs=in_specs,
        out_specs=pl.BlockSpec((tile_b, out_pad), lambda i: (i, 0)),
        out_shape=jax.ShapeDtypeStruct((b_pad, out_pad), jnp.float32),
        compiler_params=pltpu.CompilerParams(
            dimension_semantics=("parallel",)),
        cost_estimate=pl.CostEstimate(
            flops=flops, transcendentals=0, bytes_accessed=bytes_accessed),
    )(*flat_args)

    # Lane-dense padded logits slab -> slice back to the true output width.
    return out_padded[:B, :out_dim]


def init_linear(key, in_features, out_features):
    """PyTorch-style default init: U(-1/sqrt(in), 1/sqrt(in)) for W and b.

    Returns W already transposed to (in, out) for x @ W use in the kernel.
    """
    kw, kb = jax.random.split(key)
    bound = 1.0 / (in_features ** 0.5)
    w = jax.random.uniform(kw, (out_features, in_features), jnp.float32,
                           minval=-bound, maxval=bound)
    b = jax.random.uniform(kb, (out_features,), jnp.float32,
                           minval=-bound, maxval=bound)
    return w.T, b  # (in, out), (out,)


def reference_forward(x, params):
    """Pure-JAX reference mimicking the kernel's precision (bf16 matmul
    inputs, f32 accumulation, f32 bias/ReLU)."""
    h = x
    n = len(params)
    for i, (w_t, b) in enumerate(params):
        acc = jnp.dot(h.astype(jnp.bfloat16), w_t.astype(jnp.bfloat16),
                      preferred_element_type=jnp.float32)
        h = acc + b
        if i < n - 1:
            h = jnp.maximum(h, 0.0)
    return h


if __name__ == "__main__":
    key = jax.random.PRNGKey(0)
    k_x, k1, k2, k3, k4, k5 = jax.random.split(key, 6)

    batch = 24
    x = jax.random.normal(k_x, (batch, 784), jnp.float32)

    dims = [(784, 520), (520, 320), (320, 240), (240, 120), (120, 10)]
    keys = [k1, k2, k3, k4, k5]
    params = [init_linear(k, din, dout) for k, (din, dout) in zip(keys, dims)]

    padded = pad_params(params)

    # Small batch smoke test: force tile_b=8 so the batch grid (3 tiles) is
    # exercised; production batches use the default tile of up to 256 rows.
    out = mlp_forward(x, padded, out_dim=10, tile_b=8)
    out = jax.block_until_ready(out)

    ref = reference_forward(x, params)
    assert out.shape == (batch, 10)
    assert jnp.allclose(out, ref, atol=1e-2, rtol=1e-2), "mismatch vs reference"

    print("KERNEL_OK")
</pallas_src>

<mosaic_0001>
module attributes {stable_mosaic.version = 11 : i64} {
  func.func @mlp_kernel(%arg0: i32, %arg1: memref<8x896xbf16, #tpu.memory_space<vmem>>, %arg2: memref<896x640xbf16, #tpu.memory_space<vmem>>, %arg3: memref<1x640xf32, #tpu.memory_space<vmem>>, %arg4: memref<640x384xbf16, #tpu.memory_space<vmem>>, %arg5: memref<1x384xf32, #tpu.memory_space<vmem>>, %arg6: memref<384x256xbf16, #tpu.memory_space<vmem>>, %arg7: memref<1x256xf32, #tpu.memory_space<vmem>>, %arg8: memref<256x128xbf16, #tpu.memory_space<vmem>>, %arg9: memref<1x128xf32, #tpu.memory_space<vmem>>, %arg10: memref<128x128xbf16, #tpu.memory_space<vmem>>, %arg11: memref<1x128xf32, #tpu.memory_space<vmem>>, %arg12: memref<8x128xf32, #tpu.memory_space<vmem>>) attributes {dimension_semantics = [#tpu.dimension_semantics<parallel>], iteration_bounds = array<i64: 3>, scalar_prefetch = 0 : i64, scratch_operands = 0 : i64, tpu.core_type = #tpu.core_type<tc>, window_params = [{transform_indices = @transform_0, window_bounds = array<i64: 8, 896>}, {pipeline_mode = #tpu.pipeline_mode<synchronous>, transform_indices = @transform_1, window_bounds = array<i64: 896, 640>}, {pipeline_mode = #tpu.pipeline_mode<synchronous>, transform_indices = @transform_2, window_bounds = array<i64: 1, 640>}, {pipeline_mode = #tpu.pipeline_mode<synchronous>, transform_indices = @transform_3, window_bounds = array<i64: 640, 384>}, {pipeline_mode = #tpu.pipeline_mode<synchronous>, transform_indices = @transform_4, window_bounds = array<i64: 1, 384>}, {pipeline_mode = #tpu.pipeline_mode<synchronous>, transform_indices = @transform_5, window_bounds = array<i64: 384, 256>}, {pipeline_mode = #tpu.pipeline_mode<synchronous>, transform_indices = @transform_6, window_bounds = array<i64: 1, 256>}, {pipeline_mode = #tpu.pipeline_mode<synchronous>, transform_indices = @transform_7, window_bounds = array<i64: 256, 128>}, {pipeline_mode = #tpu.pipeline_mode<synchronous>, transform_indices = @transform_8, window_bounds = array<i64: 1, 128>}, {pipeline_mode = #tpu.pipeline_mode<synchronous>, transform_indices = @transform_9, window_bounds = array<i64: 128, 128>}, {pipeline_mode = #tpu.pipeline_mode<synchronous>, transform_indices = @transform_10, window_bounds = array<i64: 1, 128>}, {transform_indices = @transform_11, window_bounds = array<i64: 8, 128>}]} {
    %c0 = arith.constant 0 : index
    %c0_0 = arith.constant 0 : index
    %0 = vector.load %arg1[%c0, %c0_0] : memref<8x896xbf16, #tpu.memory_space<vmem>>, vector<8x896xbf16>
    %c0_1 = arith.constant 0 : index
    %c0_2 = arith.constant 0 : index
    %1 = vector.load %arg2[%c0_1, %c0_2] : memref<896x640xbf16, #tpu.memory_space<vmem>>, vector<896x640xbf16>
    %cst = arith.constant dense<0.000000e+00> : vector<8x640xf32>
    %2 = tpu.matmul %0, %1, %cst {dimension_numbers = #tpu.dot_dimension_numbers<[1], [0], [0], [1], [0, 0, 1, 1], [], []>} : vector<8x896xbf16>, vector<896x640xbf16>, vector<8x640xf32> -> vector<8x640xf32>
    %c0_3 = arith.constant 0 : index
    %c0_4 = arith.constant 0 : index
    %3 = vector.load %arg3[%c0_3, %c0_4] : memref<1x640xf32, #tpu.memory_space<vmem>>, vector<1x640xf32>
    %4 = vector.broadcast %3 : vector<1x640xf32> to vector<8x640xf32>
    %5 = arith.addf %2, %4 : vector<8x640xf32>
    %cst_5 = arith.constant 0.000000e+00 : f32
    %6 = vector.broadcast %cst_5 : f32 to vector<8x640xf32>
    %7 = arith.maximumf %5, %6 : vector<8x640xf32>
    %8 = arith.truncf %7 : vector<8x640xf32> to vector<8x640xbf16>
    %c0_6 = arith.constant 0 : index
    %c0_7 = arith.constant 0 : index
    %9 = vector.load %arg4[%c0_6, %c0_7] : memref<640x384xbf16, #tpu.memory_space<vmem>>, vector<640x384xbf16>
    %cst_8 = arith.constant dense<0.000000e+00> : vector<8x384xf32>
    %10 = tpu.matmul %8, %9, %cst_8 {dimension_numbers = #tpu.dot_dimension_numbers<[1], [0], [0], [1], [0, 0, 1, 1], [], []>} : vector<8x640xbf16>, vector<640x384xbf16>, vector<8x384xf32> -> vector<8x384xf32>
    %c0_9 = arith.constant 0 : index
    %c0_10 = arith.constant 0 : index
    %11 = vector.load %arg5[%c0_9, %c0_10] : memref<1x384xf32, #tpu.memory_space<vmem>>, vector<1x384xf32>
    %12 = vector.broadcast %11 : vector<1x384xf32> to vector<8x384xf32>
    %13 = arith.addf %10, %12 : vector<8x384xf32>
    %cst_11 = arith.constant 0.000000e+00 : f32
    %14 = vector.broadcast %cst_11 : f32 to vector<8x384xf32>
    %15 = arith.maximumf %13, %14 : vector<8x384xf32>
    %16 = arith.truncf %15 : vector<8x384xf32> to vector<8x384xbf16>
    %c0_12 = arith.constant 0 : index
    %c0_13 = arith.constant 0 : index
    %17 = vector.load %arg6[%c0_12, %c0_13] : memref<384x256xbf16, #tpu.memory_space<vmem>>, vector<384x256xbf16>
    %cst_14 = arith.constant dense<0.000000e+00> : vector<8x256xf32>
    %18 = tpu.matmul %16, %17, %cst_14 {dimension_numbers = #tpu.dot_dimension_numbers<[1], [0], [0], [1], [0, 0, 1, 1], [], []>} : vector<8x384xbf16>, vector<384x256xbf16>, vector<8x256xf32> -> vector<8x256xf32>
    %c0_15 = arith.constant 0 : index
    %c0_16 = arith.constant 0 : index
    %19 = vector.load %arg7[%c0_15, %c0_16] : memref<1x256xf32, #tpu.memory_space<vmem>>, vector<1x256xf32>
    %20 = vector.broadcast %19 : vector<1x256xf32> to vector<8x256xf32>
    %21 = arith.addf %18, %20 : vector<8x256xf32>
    %cst_17 = arith.constant 0.000000e+00 : f32
    %22 = vector.broadcast %cst_17 : f32 to vector<8x256xf32>
    %23 = arith.maximumf %21, %22 : vector<8x256xf32>
    %24 = arith.truncf %23 : vector<8x256xf32> to vector<8x256xbf16>
    %c0_18 = arith.constant 0 : index
    %c0_19 = arith.constant 0 : index
    %25 = vector.load %arg8[%c0_18, %c0_19] : memref<256x128xbf16, #tpu.memory_space<vmem>>, vector<256x128xbf16>
    %cst_20 = arith.constant dense<0.000000e+00> : vector<8x128xf32>
    %26 = tpu.matmul %24, %25, %cst_20 {dimension_numbers = #tpu.dot_dimension_numbers<[1], [0], [0], [1], [0, 0, 1, 1], [], []>} : vector<8x256xbf16>, vector<256x128xbf16>, vector<8x128xf32> -> vector<8x128xf32>
    %c0_21 = arith.constant 0 : index
    %c0_22 = arith.constant 0 : index
    %27 = vector.load %arg9[%c0_21, %c0_22] : memref<1x128xf32, #tpu.memory_space<vmem>>, vector<1x128xf32>
    %28 = vector.broadcast %27 : vector<1x128xf32> to vector<8x128xf32>
    %29 = arith.addf %26, %28 : vector<8x128xf32>
    %cst_23 = arith.constant 0.000000e+00 : f32
    %30 = vector.broadcast %cst_23 : f32 to vector<8x128xf32>
    %31 = arith.maximumf %29, %30 : vector<8x128xf32>
    %32 = arith.truncf %31 : vector<8x128xf32> to vector<8x128xbf16>
    %c0_24 = arith.constant 0 : index
    %c0_25 = arith.constant 0 : index
    %33 = vector.load %arg10[%c0_24, %c0_25] : memref<128x128xbf16, #tpu.memory_space<vmem>>, vector<128x128xbf16>
    %cst_26 = arith.constant dense<0.000000e+00> : vector<8x128xf32>
    %34 = tpu.matmul %32, %33, %cst_26 {dimension_numbers = #tpu.dot_dimension_numbers<[1], [0], [0], [1], [0, 0, 1, 1], [], []>} : vector<8x128xbf16>, vector<128x128xbf16>, vector<8x128xf32> -> vector<8x128xf32>
    %c0_27 = arith.constant 0 : index
    %c0_28 = arith.constant 0 : index
    %35 = vector.load %arg11[%c0_27, %c0_28] : memref<1x128xf32, #tpu.memory_space<vmem>>, vector<1x128xf32>
    %36 = vector.broadcast %35 : vector<1x128xf32> to vector<8x128xf32>
    %37 = arith.addf %34, %36 : vector<8x128xf32>
    %c0_29 = arith.constant 0 : index
    %c0_30 = arith.constant 0 : index
    %38 = vector.load %arg12[%c0_29, %c0_30] : memref<8x128xf32, #tpu.memory_space<vmem>>, vector<8x128xf32>
    tpu.vector_store %arg12[%c0_29, %c0_30], %37 {strides = array<i32>} : memref<8x128xf32, #tpu.memory_space<vmem>>, vector<8x128xf32>,
    return
  }
  func.func @transform_0(%arg0: i32) -> (i32, i32) {
    %c0_i32 = arith.constant 0 : i32
    %c0_i32_0 = arith.constant 0 : i32
    return %arg0, %c0_i32 : i32, i32
  }
  func.func @transform_1(%arg0: i32) -> (i32, i32) {
    %c0_i32 = arith.constant 0 : i32
    %c0_i32_0 = arith.constant 0 : i32
    %c0_i32_1 = arith.constant 0 : i32
    return %c0_i32, %c0_i32_0 : i32, i32
  }
  func.func @transform_2(%arg0: i32) -> (i32, i32) {
    %c0_i32 = arith.constant 0 : i32
    %c0_i32_0 = arith.constant 0 : i32
    %c0_i32_1 = arith.constant 0 : i32
    return %c0_i32, %c0_i32_0 : i32, i32
  }
  func.func @transform_3(%arg0: i32) -> (i32, i32) {
    %c0_i32 = arith.constant 0 : i32
    %c0_i32_0 = arith.constant 0 : i32
    %c0_i32_1 = arith.constant 0 : i32
    return %c0_i32, %c0_i32_0 : i32, i32
  }
  func.func @transform_4(%arg0: i32) -> (i32, i32) {
    %c0_i32 = arith.constant 0 : i32
    %c0_i32_0 = arith.constant 0 : i32
    %c0_i32_1 = arith.constant 0 : i32
    return %c0_i32, %c0_i32_0 : i32, i32
  }
  func.func @transform_5(%arg0: i32) -> (i32, i32) {
    %c0_i32 = arith.constant 0 : i32
    %c0_i32_0 = arith.constant 0 : i32
    %c0_i32_1 = arith.constant 0 : i32
    return %c0_i32, %c0_i32_0 : i32, i32
  }
  func.func @transform_6(%arg0: i32) -> (i32, i32) {
    %c0_i32 = arith.constant 0 : i32
    %c0_i32_0 = arith.constant 0 : i32
    %c0_i32_1 = arith.constant 0 : i32
    return %c0_i32, %c0_i32_0 : i32, i32
  }
  func.func @transform_7(%arg0: i32) -> (i32, i32) {
    %c0_i32 = arith.constant 0 : i32
    %c0_i32_0 = arith.constant 0 : i32
    %c0_i32_1 = arith.constant 0 : i32
    return %c0_i32, %c0_i32_0 : i32, i32
  }
  func.func @transform_8(%arg0: i32) -> (i32, i32) {
    %c0_i32 = arith.constant 0 : i32
    %c0_i32_0 = arith.constant 0 : i32
    %c0_i32_1 = arith.constant 0 : i32
    return %c0_i32, %c0_i32_0 : i32, i32
  }
  func.func @transform_9(%arg0: i32) -> (i32, i32) {
    %c0_i32 = arith.constant 0 : i32
    %c0_i32_0 = arith.constant 0 : i32
    %c0_i32_1 = arith.constant 0 : i32
    return %c0_i32, %c0_i32_0 : i32, i32
  }
  func.func @transform_10(%arg0: i32) -> (i32, i32) {
    %c0_i32 = arith.constant 0 : i32
    %c0_i32_0 = arith.constant 0 : i32
    %c0_i32_1 = arith.constant 0 : i32
    return %c0_i32, %c0_i32_0 : i32, i32
  }
  func.func @transform_11(%arg0: i32) -> (i32, i32) {
    %c0_i32 = arith.constant 0 : i32
    %c0_i32_0 = arith.constant 0 : i32
    return %arg0, %c0_i32 : i32, i32
  }
}

</mosaic_0001>

<bundles_post_ra>
// kernel: tpu_custom_call.1
= control target key start
LH: loop header
LB: loop body
LE: loop exit
PB: predicated region body
PF: predicated region fallthrough
CT: control target
= control target key end

     0   :  { %s8070_s0 = inlined_call_operand.hbm [shape: bf16[24,896], index: 0, kind: input, shape index: {}]   ;;  %s8071_s1 = inlined_call_operand.hbm [shape: bf16[896,640], index: 1, kind: input, shape index: {}]   ;;  %s8072_s2 = inlined_call_operand.hbm [shape: f32[1,640], index: 2, kind: input, shape index: {}]   ;;  %s8073_s3 = inlined_call_operand.hbm [shape: bf16[640,384], index: 3, kind: input, shape index: {}]   ;;  %s8074_s4 = inlined_call_operand.hbm [shape: f32[1,384], index: 4, kind: input, shape index: {}]   ;;  %s8075_s5 = inlined_call_operand.hbm [shape: bf16[384,256], index: 5, kind: input, shape index: {}]   ;;  %s8076_s6 = inlined_call_operand.hbm [shape: f32[1,256], index: 6, kind: input, shape index: {}]   ;;  %s8077_s7 = inlined_call_operand.hbm [shape: bf16[256,128], index: 7, kind: input, shape index: {}]   ;;  %s8078_s8 = inlined_call_operand.hbm [shape: f32[1,128], index: 8, kind: input, shape index: {}]   ;;  %s8079_s9 = inlined_call_operand.hbm [shape: bf16[128,128], index: 9, kind: input, shape index: {}]   ;;  %s8080_s10 = inlined_call_operand.hbm [shape: f32[1,128], index: 10, kind: input, shape index: {}]   ;;  %s8081_s11 = inlined_call_operand.hbm [shape: f32[24,128], index: 11, kind: output, shape index: {}]  }
   0x1   :  { %8085 = sst [smem:[#allocation29_spill]] %s8070_s0 }
   0x2   :  { %8086 = sst [smem:[#allocation30_spill]] %s8071_s1 }
   0x3   :  { %8087 = sst [smem:[#allocation31_spill]] %s8072_s2 }
   0x4   :  { %8088 = sst [smem:[#allocation32_spill]] %s8073_s3 }
   0x5   :  { %8089 = sst [smem:[#allocation33_spill]] %s8074_s4 }
   0x6   :  { %8090 = sst [smem:[#allocation34_spill]] %s8075_s5 }
   0x7   :  { %8091 = sst [smem:[#allocation35_spill]] %s8081_s11 }
   0x8   :  { %16 = vsyncpa [#allocation3], 0 }
   0x9   :  { %18 = vsyncpa [#allocation3 + $0x1], 0 }
   0xa   :  { %19 = vsyncpa [#allocation6], 0 }
   0xb   :  { %20 = vsyncpa [#allocation9], 0 }
   0xc   :  { %21 = vsyncpa [#allocation12], 0 }
   0xd   :  { %22 = vsyncpa [#allocation15], 0 }
   0xe   :  { %23 = vsyncpa [#allocation18], 0 }
   0xf   :  { %24 = vsyncpa [#allocation4], 0 }
  0x10   :  { %26 = vsyncpa [#allocation4 + $0x1], 0  ;;  %s7713_s17 = smov 0   ;;  %s7715_s18 = smov 0  }
  0x11   :  { %s7717_s19 = smov 0   ;;  %s7719_s20 = smov 0  }
  0x12 LB: > { %s8092_s1 = sld [smem:[#allocation30_spill]]  ;;  %s7737_s24 = sadd.s32 4294967295, %s7633_s20   ;;  %s7633_s20 = sphi %s7719_s20, %s8110_s20   ;;  %s7629_s19 = sphi %s7717_s19, %s8109_s19   ;;  %s7625_s18 = sphi %s7715_s18, %s8108_s18   ;;  %s7621_s17 = sphi %s7713_s17, %s8107_s17  }
  0x13   : > { %p4667_p0 = scmp.ge.s32.totalorder %s7633_s20, 1  ;;  %p53_p1 = scmp.eq.s32.totalorder %s7737_s24, 0 }
  0x14   : > { %p299_p2 = scmp.lt.s32.totalorder %s7633_s20, 4  ;;  %s7635_s26 = smov [#allocation5]  }
  0x15   : > { %s312_s27 = sshll.u32 %s7635_s26, 4  ;;  %s8095_s3 = sld [smem:[#allocation32_spill]]  ;;  %s313_s27 = int_to_ptr.vmem [resolvable:$true] %s312_s27 }
  0x16   : > { %p7742_p3 = pnand %p4667_p0, %p299_p2  ;;  %s7636_s13 = smov [#allocation8]  }
  0x17   : > { %s338_s14 = sshll.u32 %s7636_s13, 4  ;;  %s7637_s15 = smov 320   ;;  %s339_s14 = int_to_ptr.vmem [resolvable:$true] %s338_s14 }
  0x18   : > { %s310_s23 = sshll.u32 %s8092_s1, 4  ;;  %p7103_p4 = pneg %p7742_p3  ;;  %s311_s23 = int_to_ptr.hbm [resolvable:$true] %s310_s23 }
  0x19   : > { %s8093_s25 = scalar_select %p7742_p3, 1, 0 }
  0x1a   : > { %p7753_p5 = pnand %p7103_p4, %p53_p1  ;;  %s7638_s16 = smov 20  }
  0x1b   : > { %8094 = sst [smem:[#allocation28_spill]] %s8093_s25  ;;  %s336_s30 = sshll.u32 %s8095_s3, 4  ;;  %s337_s30 = int_to_ptr.hbm [resolvable:$true] %s336_s30 }
  0x1c   : > { %7106 = dma.hbm_to_vmem [thread:$0]  (!%p7753_p5), %s311_s23, 35840, %s313_s27, [#allocation6], %s7637_s15, %s7637_s15, %s7638_s16  }
  0x1d   : > { %s7639_s21 = smov 192   ;;  %s7640_s22 = smov 12  }
  0x1e   : > { %7112 = dma.hbm_to_vmem [thread:$0]  (!%p7753_p5), %s337_s30, 15360, %s339_s14, [#allocation9], %s7639_s21, %s7639_s21, %s7640_s22  }
  0x1f   : > { %s8097_s5 = sld [smem:[#allocation34_spill]]  ;;  %s7641_s1 = smov [#allocation11]  }
  0x20   : > { %s364_s3 = sshll.u32 %s7641_s1, 4  ;;  %s388_s25 = sshll.u32 %s8077_s7, 4  ;;  %s365_s3 = int_to_ptr.vmem [resolvable:$true] %s364_s3  ;;  %s389_s25 = int_to_ptr.hbm [resolvable:$true] %s388_s25 }
  0x21   : > { %s7642_s0 = smov 128   ;;  %s7643_s23 = smov 8  }
  0x22   : > { %s7644_s27 = smov [#allocation14]   ;;  %s7645_s14 = smov 64  }
  0x23   : > { %s390_s30 = sshll.u32 %s7644_s27, 4  ;;  %s7646_s15 = smov 4   ;;  %s391_s30 = int_to_ptr.vmem [resolvable:$true] %s390_s30 }
  0x24   : > { %7124 = dma.hbm_to_vmem [thread:$0]  (!%p7753_p5), %s389_s25, 2048, %s391_s30, [#allocation15], %s7645_s14, %s7645_s14, %s7646_s15  }
  0x25   : > { %s362_s29 = sshll.u32 %s8097_s5, 4  ;;  %s414_s21 = sshll.u32 %s8079_s9, 4  ;;  %s363_s29 = int_to_ptr.hbm [resolvable:$true] %s362_s29  ;;  %s415_s21 = int_to_ptr.hbm [resolvable:$true] %s414_s21 }
  0x26   : > { %7118 = dma.hbm_to_vmem [thread:$0]  (!%p7753_p5), %s363_s29, 6144, %s365_s3, [#allocation12], %s7642_s0, %s7642_s0, %s7643_s23  }
  0x27   : > { %s7647_s11 = smov [#allocation17]   ;;  %s8098_s2 = sld [smem:[#allocation31_spill]] }
  0x28   : > { %s416_s22 = sshll.u32 %s7647_s11, 4  ;;  %s7648_s28 = smov [#allocation7]   ;;  %s417_s22 = int_to_ptr.vmem [resolvable:$true] %s416_s22 }
  0x29   : > { %7130 = dma.hbm_to_vmem [thread:$0]  (!%p7753_p5), %s415_s21, 1024, %s417_s22, [#allocation18], %s7645_s14, %s7645_s14, %s7646_s15  }
  0x2a   : > { %s327_s29 = sshll.u32 %s7648_s28, 4  ;;  %s8099_s4 = sld [smem:[#allocation33_spill]]  ;;  %s328_s29 = int_to_ptr.vmem [resolvable:$true] %s327_s29 }
  0x2b   : > { %s377_s1 = sshll.u32 %s8076_s6, 4  ;;  %s7649_s16 = smov [#allocation10]   ;;  %s378_s1 = int_to_ptr.hbm [resolvable:$true] %s377_s1 }
  0x2c   : > { %s353_s11 = sshll.u32 %s7649_s16, 4  ;;  %s7650_s14 = smov [#allocation13]   ;;  %s354_s11 = int_to_ptr.vmem [resolvable:$true] %s353_s11 }
  0x2d   : > { %s325_s3 = sshll.u32 %s8098_s2, 4  ;;  %s379_s15 = sshll.u32 %s7650_s14, 4  ;;  %s326_s3 = int_to_ptr.hbm [resolvable:$true] %s325_s3  ;;  %s380_s15 = int_to_ptr.vmem [resolvable:$true] %s379_s15 }
  0x2e   : > { %7109 = dma.hbm_to_vmem [thread:$0]  (!%p7753_p5), %s326_s3, 80, %s328_s29, [#allocation6]  }
  0x2f   : > { %s403_s26 = sshll.u32 %s8078_s8, 4  ;;  %s429_s28 = sshll.u32 %s8080_s10, 4  ;;  %s404_s26 = int_to_ptr.hbm [resolvable:$true] %s403_s26  ;;  %s430_s28 = int_to_ptr.hbm [resolvable:$true] %s429_s28 }
  0x30   : > { %s351_s23 = sshll.u32 %s8099_s4, 4  ;;  %s7651_s29 = smov [#allocation16]   ;;  %s352_s23 = int_to_ptr.hbm [resolvable:$true] %s351_s23 }
  0x31   : > { %7115 = dma.hbm_to_vmem [thread:$0]  (!%p7753_p5), %s352_s23, 48, %s354_s11, [#allocation9]  }
  0x32   : > { %7121 = dma.hbm_to_vmem [thread:$0]  (!%p7753_p5), %s378_s1, 32, %s380_s15, [#allocation12]  }
  0x33   : > { %s405_s13 = sshll.u32 %s7651_s29, 4  ;;  %s7652_s25 = smov [#allocation19]   ;;  %s406_s13 = int_to_ptr.vmem [resolvable:$true] %s405_s13 }
  0x34   : > { %7127 = dma.hbm_to_vmem [thread:$0]  (!%p7753_p5), %s404_s26, 16, %s406_s13, [#allocation15]  }
  0x35   : > { %s431_s23 = sshll.u32 %s7652_s25, 4  ;;  %s4666_s27 = sadd.s32 4294967294, %s7633_s20   ;;  %s432_s23 = int_to_ptr.vmem [resolvable:$true] %s431_s23 }
  0x36   : > { %7133 = dma.hbm_to_vmem [thread:$0]  (!%p7753_p5), %s430_s28, 16, %s432_s23, [#allocation18]  }
  0x37   : > { %s7803_s30 = sadd.s32 1, %s7633_s20   ;;  %s39_s16 = sadd.s32 1, %s7629_s19 }
  0x38   : > { %s36_s1 = ssub.s32 %s7633_s20, %s7803_s30  ;;  %p46_p7 = scmp.ne.s32.totalorder %s7629_s19, %s7625_s18 }
  0x39   : > { %p37_p6 = scmp.eq.s32.totalorder %s36_s1, 0  ;;  %p47_p8 = scmp.eq.s32.totalorder %s7633_s20, 0 }
  0x3a   : > { %p52_p9 = scmp.ne.s32.totalorder %s7625_s18, %s7621_s17  ;;  %p286_p12 = scmp.eq.s32.totalorder %s7737_s24, 2 }
  0x3b   : > { %s7814_s11 = scalar_select %p37_p6, %s7629_s19, %s39_s16  }
  0x3c   : > { %p48_p10 = por %p47_p8, %p46_p7  ;;  %p7818_p11 = por %p53_p1, %p52_p9 }
  0x3d   : > { %p292_p13 = scmp.eq.s32.totalorder %s4666_s27, 2  ;;  %p7152_p0 = scmp.lt.s32.totalorder %s7633_s20, 3 }
  0x3e   : > { %s442_s12 = sand.u32 1, %s7629_s19   ;;  %p7825_p2 = por %p286_p12, %p46_p7 }
  0x3f   : > { %p7829_p4 = por %p292_p13, %p52_p9  ;;  %s7056_s22 = smul.u32 28, %s442_s12 }
  0x40   : > { %s7057_s26 = smul.u32 28, %s7633_s20  ;;  %p7834_p5 = pnand %p7152_p0, %p48_p10 }
  0x41   : > { %s8104_s29 = sld [smem:[#allocation29_spill]]  ;;  %s446_s25 = scalar_lea.vmem [#allocation2], %s7056_s22 }
  0x42   : > { %s455_s23 = sshll.u32 %s446_s25, 4  ;;  %s443_s1 = scalar_lea.sflag [#allocation3], %s442_s12  ;;  %s456_s23 = int_to_ptr.vmem [resolvable:$true] %s455_s23 }
  0x43   : > { %p7521_p7 = pneg %p7834_p5 }
  0x47   : > { %s451_s13 = scalar_lea.hbm %s8104_s29, %s7057_s26  ;;  %s7524_s3 = scalar_lea.hbm %s8104_s29, 84 }
  0x48   : > { %s453_s27 = sshll.u32 %s451_s13, 4  ;;  %s454_s27 = int_to_ptr.hbm [resolvable:$true] %s453_s27 }
  0x49   : > { %s7517_s16 = sshra.s32 %s454_s27, 4  ;;  %s7518_s16 = int_to_ptr.hbm [resolvable:$true] %s7517_s16 }
  0x4a   : > { %s7519_s2 = scalar_lea.hbm %s7518_s16, 28  ;;  %p7525_p10 = scmp.lt.s32.totalorder %s7518_s16, %s8104_s29 }
  0x4b   : > { %p7520_p6 = scmp.ne.s32.totalorder %s7518_s16, %s7519_s2  ;;  %p7526_p12 = scmp.lt.s32.totalorder %s7524_s3, %s7519_s2 }
  0x4d   : > { %p7522_p8 = pnand %p7521_p7, %p7520_p6  ;;  %p7527_p13 = por %p7526_p12, %p7525_p10 }
  0x4f   : > { %p7523_p9 = pneg %p7522_p8 }
  0x51   : > { %p7528_p0 = pnand %p7527_p13, %p7523_p9 }
  0x53   : > { %7531 = shalt.err (!%p7528_p0)
}
  0x54   : > { %7137 = dma.hbm_to_vmem [thread:$0]  (!%p7834_p5), %s454_s27, 448, %s456_s23, %s443_s1  }
  0x55   : > { %464 = sbr.rel (%p7742_p3) target bundleno = 1115 (0x45b), region = 64  ;;  %s7854_s22 = sand.u32 (!%p7742_p3), 1, %s7625_s18  }
  0x56   : > { %s7058_s4 = smul.u32 (!%p7742_p3), 28, %s7854_s22  ;;  %s467_s5 = scalar_lea.sflag (!%p7742_p3), [#allocation3], %s7854_s22 }
  0x58   : > { %s7858_s13 = scalar_lea.vmem (!%p7742_p3), [#allocation2], %s7058_s4 }
  0x5a   : > { %7592 = dma.done.wait (%p7818_p11), %s467_s5, 448  }
  0x5b   : > { %7594 = vsyncadd (%p7818_p11), %s467_s5, 4294966848 }
  0x5c   : > { %7596 = dma.done.wait (%p53_p1), [#allocation6], 35920  }
  0x5d   : > { %7598 = vsyncadd (%p53_p1), [#allocation6], 4294931376 }
  0x5e   : > { %7600 = dma.done.wait (%p53_p1), [#allocation9], 15408  }
  0x5f   : > { %7602 = vsyncadd (%p53_p1), [#allocation9], 4294951888 }
  0x60   : > { %7604 = dma.done.wait (%p53_p1), [#allocation12], 6176  }
  0x61   : > { %7606 = vsyncadd (%p53_p1), [#allocation12], 4294961120 }
  0x62   : > { %7608 = dma.done.wait (%p53_p1), [#allocation15], 2064  }
  0x63   : > { %7610 = vsyncadd (%p53_p1), [#allocation15], 4294965232 }
  0x64   : > { %7612 = dma.done.wait (%p53_p1), [#allocation18], 1040  }
  0x65   : > { %7614 = vsyncadd (%p53_p1), [#allocation18], 4294966256  ;;  %v4834_v0 = vld [vmem:[#allocation5 + $0x118] sm:$0xf]  ;;  %v6621_v1 = vld [vmem:[#allocation5 + $0x128] sm:$0xf0] }
  0x66   : > { %v4994_v2 = vld [vmem:[#allocation5 + $0x258] sm:$0xf]  ;;  %v4835_v3 = vor.u32 %v6621_v1, %v4834_v0  ;;  %v6661_v4 = vld [vmem:[#allocation5 + $0x268] sm:$0xf0]  ;;  %v4814_v11 = vld [vmem:[#allocation5 + $0xf0] sm:$0xf] }
  0x67   : > { %v5154_v5 = vld [vmem:[#allocation5 + $0x398] sm:$0xf]  ;;  %v6701_v6 = vld [vmem:[#allocation5 + $0x3a8] sm:$0xf0]  ;;  %v4995_v7 = vor.u32 %v6661_v4, %v4994_v2  ;;  %v6616_v13 = vld [vmem:[#allocation5 + $0x100] sm:$0xf0] }
  0x68   : > { %v5155_v8 = vor.u32 %v6701_v6, %v5154_v5  ;;  %v5314_v9 = vld [vmem:[#allocation5 + $0x4d8] sm:$0xf]  ;;  %v6741_v10 = vld [vmem:[#allocation5 + $0x4e8] sm:$0xf0]  ;;  %2393 = vmatpush.bf16.msra.mxu0 %v4835_v3  ;;  %v4974_v14 = vld [vmem:[#allocation5 + $0x230] sm:$0xf]  ;;  %v4815_v16 = vor.u32 %v6616_v13, %v4814_v11 }
  0x69   : > { %v5315_v12 = vor.u32 %v6741_v10, %v5314_v9  ;;  %v6656_v15 = vld [vmem:[#allocation5 + $0x240] sm:$0xf0]  ;;  %2406 = vmatpush.bf16.msra.mxu1 %v4995_v7  ;;  %v5134_v18 = vld [vmem:[#allocation5 + $0x370] sm:$0xf]  ;;  %v4794_v23 = vld [vmem:[#allocation5 + $0xc8] sm:$0xf] }
  0x6a   : > { %2419 = vmatpush.bf16.msra.mxu2 %v5155_v8  ;;  %v4975_v17 = vor.u32 %v6656_v15, %v4974_v14  ;;  %v6696_v19 = vld [vmem:[#allocation5 + $0x380] sm:$0xf0]  ;;  %v5294_v20 = vld [vmem:[#allocation5 + $0x4b0] sm:$0xf]  ;;  %v6611_v24 = vld [vmem:[#allocation5 + $0xd8] sm:$0xf0] }
  0x6b   : > { %2432 = vmatpush.bf16.msra.mxu3 %v5315_v12  ;;  %v5135_v21 = vor.u32 %v6696_v19, %v5134_v18  ;;  %v6736_v22 = vld [vmem:[#allocation5 + $0x4c0] sm:$0xf0]  ;;  %v4954_v26 = vld [vmem:[#allocation5 + $0x208] sm:$0xf]  ;;  %v6651_v27 = vld [vmem:[#allocation5 + $0x218] sm:$0xf0]  ;;  %v4795_v29 = vor.u32 %v6611_v24, %v4794_v23 }
  0x6c   : > { %v5295_v25 = vor.u32 %v6736_v22, %v5294_v20  ;;  %v5114_v28 = vld [vmem:[#allocation5 + $0x348] sm:$0xf]  ;;  %2394 = vmatpush.bf16.msra.mxu0 %v4815_v16  ;;  %v6691_v30 = vld [vmem:[#allocation5 + $0x358] sm:$0xf0]  ;;  %v4955_v33 = vor.u32 %v6651_v27, %v4954_v26  ;;  %v4774_v35 = vld [vmem:[#allocation5 + $0xa0] sm:$0xf] }
  0x6d   : > { %v5274_v31 = vld [vmem:[#allocation5 + $0x488] sm:$0xf]  ;;  %v6731_v32 = vld [vmem:[#allocation5 + $0x498] sm:$0xf0]  ;;  %2407 = vmatpush.bf16.msra.mxu1 %v4975_v17  ;;  %v5115_v34 = vor.u32 %v6691_v30, %v5114_v28  ;;  %v6606_v36 = vld [vmem:[#allocation5 + $0xb0] sm:$0xf0] }
  0x6e   : > { %2420 = vmatpush.bf16.msra.mxu2 %v5135_v21  ;;  %v4934_v37 = vld [vmem:[#allocation5 + $0x1e0] sm:$0xf]  ;;  %v5275_v38 = vor.u32 %v6731_v32, %v5274_v31  ;;  %v6646_v39 = vld [vmem:[#allocation5 + $0x1f0] sm:$0xf0]  ;;  %v4775_v44 = vor.u32 %v6606_v36, %v4774_v35  ;;  %v4754_v47 = vld [vmem:[#allocation5 + $0x78] sm:$0xf] }
  0x6f   : > { %2433 = vmatpush.bf16.msra.mxu3 %v5295_v25  ;;  %v5094_v40 = vld [vmem:[#allocation5 + $0x320] sm:$0xf]  ;;  %v6686_v41 = vld [vmem:[#allocation5 + $0x330] sm:$0xf0]  ;;  %v4935_v45 = vor.u32 %v6646_v39, %v4934_v37  ;;  %v6601_v48 = vld [vmem:[#allocation5 + $0x88] sm:$0xf0] }
  0x70   : > { %v5254_v42 = vld [vmem:[#allocation5 + $0x460] sm:$0xf]  ;;  %v6726_v43 = vld [vmem:[#allocation5 + $0x470] sm:$0xf0]  ;;  %2395 = vmatpush.bf16.msra.mxu0 %v4795_v29  ;;  %v5095_v46 = vor.u32 %v6686_v41, %v5094_v40  ;;  %v4914_v49 = vld [vmem:[#allocation5 + $0x1b8] sm:$0xf]  ;;  %v4755_v56 = vor.u32 %v6601_v48, %v4754_v47 }
  0x71   : > { %2408 = vmatpush.bf16.msra.mxu1 %v4955_v33  ;;  %v5255_v50 = vor.u32 %v6726_v43, %v5254_v42  ;;  %v6641_v51 = vld [vmem:[#allocation5 + $0x1c8] sm:$0xf0]  ;;  %v5074_v52 = vld [vmem:[#allocation5 + $0x2f8] sm:$0xf]  ;;  %v4734_v59 = vld [vmem:[#allocation5 + $0x50] sm:$0xf] }
  0x72   : > { %2421 = vmatpush.bf16.msra.mxu2 %v5115_v34  ;;  %v6681_v53 = vld [vmem:[#allocation5 + $0x308] sm:$0xf0]  ;;  %v5234_v54 = vld [vmem:[#allocation5 + $0x438] sm:$0xf]  ;;  %v4915_v57 = vor.u32 %v6641_v51, %v4914_v49  ;;  %v6596_v60 = vld [vmem:[#allocation5 + $0x60] sm:$0xf0] }
  0x73   : > { %2434 = vmatpush.bf16.msra.mxu3 %v5275_v38  ;;  %v6721_v55 = vld [vmem:[#allocation5 + $0x448] sm:$0xf0]  ;;  %v5075_v58 = vor.u32 %v6681_v53, %v5074_v52  ;;  %v4894_v61 = vld [vmem:[#allocation5 + $0x190] sm:$0xf]  ;;  %v6636_v63 = vld [vmem:[#allocation5 + $0x1a0] sm:$0xf0]  ;;  %v4735_v4 = vor.u32 %v6596_v60, %v4734_v59 }
  0x74   : > { %2396 = vmatpush.bf16.msra.mxu0 %v4775_v44  ;;  %v5235_v62 = vor.u32 %v6721_v55, %v5234_v54  ;;  %v5054_v0 = vld [vmem:[#allocation5 + $0x2d0] sm:$0xf]  ;;  %v6676_v1 = vld [vmem:[#allocation5 + $0x2e0] sm:$0xf0]  ;;  %v4895_v5 = vor.u32 %v6636_v63, %v4894_v61  ;;  %v4714_v7 = vld [vmem:[#allocation5 + $0x28] sm:$0xf] }
  0x75   : > { %2409 = vmatpush.bf16.msra.mxu1 %v4935_v45  ;;  %v5214_v2 = vld [vmem:[#allocation5 + $0x410] sm:$0xf]  ;;  %v6716_v3 = vld [vmem:[#allocation5 + $0x420] sm:$0xf0]  ;;  %v5055_v6 = vor.u32 %v6676_v1, %v5054_v0  ;;  %v6591_v8 = vld [vmem:[#allocation5 + $0x38] sm:$0xf0] }
  0x76   : > { %2422 = vmatpush.bf16.msra.mxu2 %v5095_v46  ;;  %v4874_v9 = vld [vmem:[#allocation5 + $0x168] sm:$0xf]  ;;  %v5215_v10 = vor.u32 %v6716_v3, %v5214_v2  ;;  %v6631_v11 = vld [vmem:[#allocation5 + $0x178] sm:$0xf0]  ;;  %v4715_v16 = vor.u32 %v6591_v8, %v4714_v7  ;;  %v4694_v17 = vld [vmem:[#allocation5] sm:$0xf] }
  0x77   : > { %2435 = vmatpush.bf16.msra.mxu3 %v5255_v50  ;;  %v5034_v12 = vld [vmem:[#allocation5 + $0x2a8] sm:$0xf]  ;;  %v6671_v13 = vld [vmem:[#allocation5 + $0x2b8] sm:$0xf0]  ;;  %v6586_v18 = vld [vmem:[#allocation5 + $0x10] sm:$0xf0]  ;;  %v4875_v19 = vor.u32 %v6631_v11, %v4874_v9 }
  0x78   : > { %2397 = vmatpush.bf16.msra.mxu0 %v4755_v56  ;;  %v5194_v14 = vld [vmem:[#allocation5 + $0x3e8] sm:$0xf]  ;;  %v6711_v15 = vld [vmem:[#allocation5 + $0x3f8] sm:$0xf0]  ;;  %v5035_v20 = vor.u32 %v6671_v13, %v5034_v12  ;;  %v4854_v21 = vld [vmem:[#allocation5 + $0x140] sm:$0xf]  ;;  %v4695_v31 = vor.u32 %v6586_v18, %v4694_v17 }
  0x79   : > { %2410 = vmatpush.bf16.msra.mxu1 %v4915_v57  ;;  %v6626_v22 = vld [vmem:[#allocation5 + $0x150] sm:$0xf0]  ;;  %v5014_v23 = vld [vmem:[#allocation5 + $0x280] sm:$0xf]  ;;  %v5195_v24 = vor.u32 %v6711_v15, %v5194_v14  ;;  %v5474_v28 = vld [vmem:[#allocation5 + $0x618] sm:$0xf] }
  0x7a   : > { %2423 = vmatpush.bf16.msra.mxu2 %v5075_v58  ;;  %v6666_v25 = vld [vmem:[#allocation5 + $0x290] sm:$0xf0]  ;;  %v5174_v26 = vld [vmem:[#allocation5 + $0x3c0] sm:$0xf]  ;;  %v6781_v29 = vld [vmem:[#allocation5 + $0x628] sm:$0xf0]  ;;  %v4855_v35 = vor.u32 %v6626_v22, %v4854_v21 }
  0x7b   : > { %2436 = vmatpush.bf16.msra.mxu3 %v5235_v62  ;;  %v6706_v27 = vld [vmem:[#allocation5 + $0x3d0] sm:$0xf0]  ;;  %v5634_v30 = vld [vmem:[#allocation5 + $0x758] sm:$0xf]  ;;  %v6821_v32 = vld [vmem:[#allocation5 + $0x768] sm:$0xf0]  ;;  %v5015_v36 = vor.u32 %v6666_v25, %v5014_v23  ;;  %v5475_v40 = vor.u32 %v6781_v29, %v5474_v28 }
  0x7c   : > { %2398 = vmatpush.bf16.msra.mxu0 %v4735_v4  ;;  %v5794_v33 = vld [vmem:[#allocation5 + $0x898] sm:$0xf]  ;;  %v6861_v34 = vld [vmem:[#allocation5 + $0x8a8] sm:$0xf0]  ;;  %v6619_v37 = vld [vmem:[#allocation5 + $0x11c] sm:$0xf]  ;;  %v5175_v39 = vor.u32 %v6706_v27, %v5174_v26  ;;  %v5635_v41 = vor.u32 %v6821_v32, %v5634_v30 }
  0x7d   : > { %2411 = vmatpush.bf16.msra.mxu1 %v4895_v5  ;;  %v4836_v38 = vld [vmem:[#allocation5 + $0x12c] sm:$0xf0]  ;;  %v5795_v42 = vor.u32 %v6861_v34, %v5794_v33  ;;  %v6776_v44 = vld [vmem:[#allocation5 + $0x600] sm:$0xf0]  ;;  %v6614_v50 = vld [vmem:[#allocation5 + $0xf4] sm:$0xf] }
  0x7e   : > { %2424 = vmatpush.bf16.msra.mxu2 %v5055_v6  ;;  %v5454_v43 = vld [vmem:[#allocation5 + $0x5f0] sm:$0xf]  ;;  %v4839_v46 = vor.u32 %v6619_v37, %v4836_v38  ;;  %v6816_v47 = vld [vmem:[#allocation5 + $0x740] sm:$0xf0]  ;;  %v4816_v51 = vld [vmem:[#allocation5 + $0x104] sm:$0xf0] }
  0x7f   : > { %2437 = vmatpush.bf16.msra.mxu3 %v5215_v10  ;;  %v5614_v45 = vld [vmem:[#allocation5 + $0x730] sm:$0xf]  ;;  %v6856_v49 = vld [vmem:[#allocation5 + $0x880] sm:$0xf0]  ;;  %v5455_v52 = vor.u32 %v6776_v44, %v5454_v43  ;;  %v5434_v53 = vld [vmem:[#allocation5 + $0x5c8] sm:$0xf]  ;;  %v4819_v59 = vor.u32 %v6614_v50, %v4816_v51 }
  0x80   : > { %2399 = vmatpush.bf16.msra.mxu0 %v4715_v16  ;;  %v5774_v48 = vld [vmem:[#allocation5 + $0x870] sm:$0xf]  ;;  %v5615_v54 = vor.u32 %v6816_v47, %v5614_v45  ;;  %v6771_v56 = vld [vmem:[#allocation5 + $0x5d8] sm:$0xf0]  ;;  %v5594_v57 = vld [vmem:[#allocation5 + $0x708] sm:$0xf] }
  0x81   : > { %2412 = vmatpush.bf16.msra.mxu1 %v4875_v19  ;;  %v5775_v55 = vor.u32 %v6856_v49, %v5774_v48  ;;  %v6811_v58 = vld [vmem:[#allocation5 + $0x718] sm:$0xf0]  ;;  %v5754_v60 = vld [vmem:[#allocation5 + $0x848] sm:$0xf]  ;;  %v6609_v62 = vld [vmem:[#allocation5 + $0xcc] sm:$0xf]  ;;  %v5435_v0 = vor.u32 %v6771_v56, %v5434_v53 }
  0x82   : > { %2425 = vmatpush.bf16.msra.mxu2 %v5035_v20  ;;  %v6851_v61 = vld [vmem:[#allocation5 + $0x858] sm:$0xf0]  ;;  %v4796_v63 = vld [vmem:[#allocation5 + $0xdc] sm:$0xf0]  ;;  %v5595_v1 = vor.u32 %v6811_v58, %v5594_v57  ;;  %v561_v2 = vld [vmem:[%s7858_s13 + $0x8] sm:$0xff]  ;;  %s6581_s2 = sshll.u32 %s7737_s24, 3 }
  0x83   : > { %2438 = vmatpush.bf16.msra.mxu3 %v5195_v24  ;;  %v560_v3 = vld [vmem:[%s7858_s13] sm:$0xff]  ;;  %v5755_v4 = vor.u32 %v6851_v61, %v5754_v60  ;;  %v5414_v5 = vld [vmem:[#allocation5 + $0x5a0] sm:$0xf]  ;;  %v6766_v6 = vld [vmem:[#allocation5 + $0x5b0] sm:$0xf0]  ;;  %v918_v8 = vunpack.c.l.b16 %v561_v2  ;;  %v4799_v11 = vor.u32 %v6609_v62, %v4796_v63  ;;  %v919_v15 = vunpack.c.h.b16 %v561_v2  ;;  %s4691_s14 = sshll.u32 %s7854_s22, 3 }
  0x84   : > { %2400 = vmatpush.bf16.msra.mxu0 %v4695_v31  ;;  %v5574_v7 = vld [vmem:[#allocation5 + $0x6e0] sm:$0xf]  ;;  %v916_v9 = vunpack.c.l.b16 %v560_v3  ;;  %v917_v10 = vunpack.c.h.b16 %v560_v3  ;;  %v6806_v12 = vld [vmem:[#allocation5 + $0x6f0] sm:$0xf0]  ;;  %v6604_v16 = vld [vmem:[#allocation5 + $0xa4] sm:$0xf]  ;;  %v5415_v20 = vor.u32 %v6766_v6, %v5414_v5 }
  0x85   : > { %2413 = vmatpush.bf16.msra.mxu1 %v4855_v35  ;;  %v5734_v13 = vld [vmem:[#allocation5 + $0x820] sm:$0xf]  ;;  %v6846_v14 = vld [vmem:[#allocation5 + $0x830] sm:$0xf0]  ;;  %v4776_v17 = vld [vmem:[#allocation5 + $0xb4] sm:$0xf0]  ;;  %v7886_v18 = vpack.c.b16 %v918_v8, %v918_v8  ;;  %v7892_v22 = vpack.c.b16 %v919_v15, %v919_v15  ;;  %v5575_v23 = vor.u32 %v6806_v12, %v5574_v7 }
  0x86   : > { %2426 = vmatpush.bf16.msra.mxu2 %v5015_v36  ;;  %v7888_v19 = vpack.c.b16 %v916_v9, %v916_v9  ;;  %v7890_v21 = vpack.c.b16 %v917_v10, %v917_v10  ;;  %v5735_v24 = vor.u32 %v6846_v14, %v5734_v13  ;;  %v5394_v25 = vld [vmem:[#allocation5 + $0x578] sm:$0xf]  ;;  %v6761_v26 = vld [vmem:[#allocation5 + $0x588] sm:$0xf0]  ;;  %v4779_v28 = vor.u32 %v6604_v16, %v4776_v17  ;;  %v6599_v32 = vld [vmem:[#allocation5 + $0x7c] sm:$0xf] }
  0x87   : > { %2439 = vmatpush.bf16.msra.mxu3 %v5175_v39  ;;  %v5554_v27 = vld [vmem:[#allocation5 + $0x6b8] sm:$0xf]  ;;  %v6801_v29 = vld [vmem:[#allocation5 + $0x6c8] sm:$0xf0]  ;;  %v4756_v33 = vld [vmem:[#allocation5 + $0x8c] sm:$0xf0]  ;;  %v5395_v34 = vor.u32 %v6761_v26, %v5394_v25 }
  0x88   : > { %2445 = vmatpush.bf16.msrb.mxu0 %v5475_v40  ;;  %v5714_v30 = vld [vmem:[#allocation5 + $0x7f8] sm:$0xf]  ;;  %v6841_v31 = vld [vmem:[#allocation5 + $0x808] sm:$0xf0]  ;;  %2414 = vmatmul.bf16.vlgmr.msra.gmra.mxu1 %v7890_v21  ;;  %v5555_v35 = vor.u32 %v6801_v29, %v5554_v27  ;;  %v5374_v37 = vld [vmem:[#allocation5 + $0x550] sm:$0xf]  ;;  %v4759_v40 = vor.u32 %v6599_v32, %v4756_v33 }
  0x89   : > { %2458 = vmatpush.bf16.msrb.mxu1 %v5635_v41  ;;  %2427 = vmatmul.bf16.vlgmr.msra.gmra.mxu2 %v7886_v18  ;;  %v5715_v36 = vor.u32 %v6841_v31, %v5714_v30  ;;  %v6756_v38 = vld [vmem:[#allocation5 + $0x560] sm:$0xf0]  ;;  %v5534_v39 = vld [vmem:[#allocation5 + $0x690] sm:$0xf]  ;;  %v6594_v44 = vld [vmem:[#allocation5 + $0x54] sm:$0xf] }
  0x8a   : > { %2471 = vmatpush.bf16.msrb.mxu2 %v5795_v42  ;;  %2401 = vmatmul.bf16.vlgmr.msra.gmra.mxu0 %v7888_v19  ;;  %v6796_v41 = vld [vmem:[#allocation5 + $0x6a0] sm:$0xf0]  ;;  %v5694_v42 = vld [vmem:[#allocation5 + $0x7d0] sm:$0xf]  ;;  %v4736_v45 = vld [vmem:[#allocation5 + $0x64] sm:$0xf0] }
  0x8b   : > { %2484 = vmatpush.bf16.msrb.mxu3 %v4839_v46  ;;  %v6836_v43 = vld [vmem:[#allocation5 + $0x7e0] sm:$0xf0]  ;;  %v5375_v46 = vor.u32 %v6756_v38, %v5374_v37  ;;  %v5535_v47 = vor.u32 %v6796_v41, %v5534_v39  ;;  %v5354_v49 = vld [vmem:[#allocation5 + $0x528] sm:$0xf]  ;;  %v6751_v50 = vld [vmem:[#allocation5 + $0x538] sm:$0xf0] }
  0x8c   : > { %2446 = vmatpush.bf16.msrb.mxu0 %v5455_v52  ;;  %2440 = vmatmul.bf16.vlgmr.msra.gmra.mxu3 %v7892_v22  ;;  %v5695_v48 = vor.u32 %v6836_v43, %v5694_v42  ;;  %v5514_v51 = vld [vmem:[#allocation5 + $0x668] sm:$0xf]  ;;  %v4739_v52 = vor.u32 %v6594_v44, %v4736_v45  ;;  %v6791_v53 = vld [vmem:[#allocation5 + $0x678] sm:$0xf0]  ;;  %v6589_v56 = vld [vmem:[#allocation5 + $0x2c] sm:$0xf] }
  0x8d   : > { %2459 = vmatpush.bf16.msrb.mxu1 %v5615_v54  ;;  %v5674_v54 = vld [vmem:[#allocation5 + $0x7a8] sm:$0xf]  ;;  %v4716_v57 = vld [vmem:[#allocation5 + $0x3c] sm:$0xf0]  ;;  %v6746_v60 = vld [vmem:[#allocation5 + $0x510] sm:$0xf0]  ;;  %v5515_v63 = vor.u32 %v6791_v53, %v5514_v51 }
  0x8e   : > { %2472 = vmatpush.bf16.msrb.mxu2 %v5775_v55  ;;  %v6831_v55 = vld [vmem:[#allocation5 + $0x7b8] sm:$0xf0]  ;;  %v5334_v58 = vld [vmem:[#allocation5 + $0x500] sm:$0xf]  ;;  %v6786_v62 = vld [vmem:[#allocation5 + $0x650] sm:$0xf0] }
  0x8f   : > { %2485 = vmatpush.bf16.msrb.mxu3 %v4819_v59  ;;  %v5355_v59 = vor.u32 %v6751_v50, %v5354_v49  ;;  %v5494_v61 = vld [vmem:[#allocation5 + $0x640] sm:$0xf]  ;;  %v6826_v2 = vld [vmem:[#allocation5 + $0x790] sm:$0xf0]  ;;  %v6584_v5 = vld [vmem:[#allocation5 + $0x4] sm:$0xf] }
  0x90   : > { %2447 = vmatpush.bf16.msrb.mxu0 %v5435_v0  ;;  %v5675_v0 = vor.u32 %v6831_v55, %v5674_v54  ;;  %v563_v3 = vld [vmem:[%s7858_s13 + $0x18] sm:$0xf]  ;;  %v4696_v6 = vld [vmem:[#allocation5 + $0x14] sm:$0xf0]  ;;  %v4996_v9 = vld [vmem:[#allocation5 + $0x26c] sm:$0xf0]  ;;  %v5495_v16 = vor.u32 %v6786_v62, %v5494_v61 }
  0x91   : > { %2460 = vmatpush.bf16.msrb.mxu1 %v5595_v1  ;;  %v5654_v1 = vld [vmem:[#allocation5 + $0x780] sm:$0xf]  ;;  %v562_v7 = vld [vmem:[%s7858_s13 + $0x10] sm:$0xff]  ;;  %v5156_v12 = vld [vmem:[#allocation5 + $0x3ac] sm:$0xf0]  ;;  %v922_v15 = vunpack.c.l.b16 %v563_v3  ;;  %v4699_v26 = vor.u32 %v6584_v5, %v4696_v6  ;;  %s8106_s23 = sld [smem:[#allocation35_spill]] }
  0x92   : > { %2473 = vmatpush.bf16.msrb.mxu2 %v5755_v4  ;;  %v4719_v4 = vor.u32 %v6589_v56, %v4716_v57  ;;  %v6659_v8 = vld [vmem:[#allocation5 + $0x25c] sm:$0xf]  ;;  %v5316_v14 = vld [vmem:[#allocation5 + $0x4ec] sm:$0xf0]  ;;  %v5655_v17 = vor.u32 %v6826_v2, %v5654_v1  ;;  %v921_v25 = vunpack.c.h.b16 %v562_v7  ;;  %v6654_v30 = vld [vmem:[#allocation5 + $0x234] sm:$0xf] }
  0x93   : > { %2486 = vmatpush.bf16.msrb.mxu3 %v4799_v11  ;;  %v6699_v10 = vld [vmem:[#allocation5 + $0x39c] sm:$0xf]  ;;  %v5335_v11 = vor.u32 %v6746_v60, %v5334_v58  ;;  %v4999_v27 = vor.u32 %v6659_v8, %v4996_v9  ;;  %v4976_v31 = vld [vmem:[#allocation5 + $0x244] sm:$0xf0]  ;;  %v6694_v32 = vld [vmem:[#allocation5 + $0x374] sm:$0xf]  ;;  %v7900_v37 = vpack.c.b16 %v922_v15, %v922_v15 }
  0x94   : > { %2448 = vmatpush.bf16.msrb.mxu0 %v5415_v20  ;;  %v6739_v13 = vld [vmem:[#allocation5 + $0x4dc] sm:$0xf]  ;;  %v6774_v38 = vld [vmem:[#allocation5 + $0x5f4] sm:$0xf]  ;;  %v5456_v39 = vld [vmem:[#allocation5 + $0x604] sm:$0xf0]  ;;  %v7904_v41 = vpack.c.b16 %v921_v25, %v921_v25  ;;  %v4979_v42 = vor.u32 %v6654_v30, %v4976_v31 }
  0x95   : > { %2461 = vmatpush.bf16.msrb.mxu1 %v5575_v23  ;;  %v6779_v20 = vld [vmem:[#allocation5 + $0x61c] sm:$0xf]  ;;  %v5476_v23 = vld [vmem:[#allocation5 + $0x62c] sm:$0xf0]  ;;  %v5319_v29 = vor.u32 %v6739_v13, %v5316_v14  ;;  %v6649_v45 = vld [vmem:[#allocation5 + $0x20c] sm:$0xf] }
  0x96   : > { %2474 = vmatpush.bf16.msrb.mxu2 %v5735_v24  ;;  %v920_v24 = vunpack.c.l.b16 %v562_v7  ;;  %v5479_v33 = vor.u32 %v6779_v20, %v5476_v23  ;;  %v5116_v49 = vld [vmem:[#allocation5 + $0x35c] sm:$0xf0]  ;;  %v6729_v50 = vld [vmem:[#allocation5 + $0x48c] sm:$0xf]  ;;  %v6644_v57 = vld [vmem:[#allocation5 + $0x1e4] sm:$0xf] }
  0x97   : > { %2487 = vmatpush.bf16.msrb.mxu3 %v4779_v28  ;;  %v5159_v28 = vor.u32 %v6699_v10, %v5156_v12  ;;  %v5276_v51 = vld [vmem:[#allocation5 + $0x49c] sm:$0xf0]  ;;  %v4936_v58 = vld [vmem:[#allocation5 + $0x1f4] sm:$0xf0]  ;;  %v6724_v62 = vld [vmem:[#allocation5 + $0x464] sm:$0xf]  ;;  %s4496_s27 = scalar_lea.hbm %s8106_s23, %s6581_s2 }
  0x98   : > { %2449 = vmatpush.bf16.msrb.mxu0 %v5395_v34  ;;  %v5136_v34 = vld [vmem:[#allocation5 + $0x384] sm:$0xf0]  ;;  %v5436_v53 = vld [vmem:[#allocation5 + $0x5dc] sm:$0xf0]  ;;  %v5279_v56 = vor.u32 %v6729_v50, %v5276_v51  ;;  %v5096_v61 = vld [vmem:[#allocation5 + $0x334] sm:$0xf0]  ;;  %v4939_v2 = vor.u32 %v6644_v57, %v4936_v58 }
  0x99   : > { %2462 = vmatpush.bf16.msrb.mxu1 %v5555_v35  ;;  %v6734_v35 = vld [vmem:[#allocation5 + $0x4b4] sm:$0xf]  ;;  %v5139_v43 = vor.u32 %v6694_v32, %v5136_v34  ;;  %v5416_v1 = vld [vmem:[#allocation5 + $0x5b4] sm:$0xf0]  ;;  %v6639_v5 = vld [vmem:[#allocation5 + $0x1bc] sm:$0xf] }
  0x9a   : > { %2475 = vmatpush.bf16.msrb.mxu2 %v5715_v36  ;;  %v5296_v36 = vld [vmem:[#allocation5 + $0x4c4] sm:$0xf0]  ;;  %v4916_v6 = vld [vmem:[#allocation5 + $0x1cc] sm:$0xf0]  ;;  %v6679_v7 = vld [vmem:[#allocation5 + $0x2fc] sm:$0xf] }
  0x9b   : > { %2488 = vmatpush.bf16.msrb.mxu3 %v4759_v40  ;;  %v7902_v40 = vpack.c.b16 %v920_v24, %v920_v24  ;;  %v5299_v44 = vor.u32 %v6734_v35, %v5296_v36  ;;  %v5076_v9 = vld [vmem:[#allocation5 + $0x30c] sm:$0xf0]  ;;  %v6719_v10 = vld [vmem:[#allocation5 + $0x43c] sm:$0xf]  ;;  %v4919_v14 = vor.u32 %v6639_v5, %v4916_v6  ;;  %v4896_v20 = vld [vmem:[#allocation5 + $0x1a4] sm:$0xf0] }
  0x9c   : > { %2450 = vmatpush.bf16.msrb.mxu0 %v5375_v46  ;;  %v4956_v46 = vld [vmem:[#allocation5 + $0x21c] sm:$0xf0]  ;;  %v6759_v12 = vld [vmem:[#allocation5 + $0x57c] sm:$0xf]  ;;  %v5396_v13 = vld [vmem:[#allocation5 + $0x58c] sm:$0xf0]  ;;  %v5079_v15 = vor.u32 %v6679_v7, %v5076_v9 }
  0x9d   : > { %2463 = vmatpush.bf16.msrb.mxu1 %v5535_v47  ;;  %v6689_v47 = vld [vmem:[#allocation5 + $0x34c] sm:$0xf]  ;;  %v4959_v54 = vor.u32 %v6649_v45, %v4956_v46  ;;  %v6674_v23 = vld [vmem:[#allocation5 + $0x2d4] sm:$0xf]  ;;  %v5399_v24 = vor.u32 %v6759_v12, %v5396_v13  ;;  %v5056_v25 = vld [vmem:[#allocation5 + $0x2e4] sm:$0xf0] }
  0x9e   : > { %2476 = vmatpush.bf16.msrb.mxu2 %v5695_v48  ;;  %v5459_v48 = vor.u32 %v6774_v38, %v5456_v39  ;;  %v5119_v55 = vor.u32 %v6689_v47, %v5116_v49  ;;  %v5059_v31 = vor.u32 %v6674_v23, %v5056_v25  ;;  %v4876_v34 = vld [vmem:[#allocation5 + $0x17c] sm:$0xf0]  ;;  %v6669_v35 = vld [vmem:[#allocation5 + $0x2ac] sm:$0xf]  ;;  %v6624_v46 = vld [vmem:[#allocation5 + $0x144] sm:$0xf] }
  0x9f   : > { %2489 = vmatpush.bf16.msrb.mxu3 %v4739_v52  ;;  %v6769_v52 = vld [vmem:[#allocation5 + $0x5cc] sm:$0xf]  ;;  %v5036_v38 = vld [vmem:[#allocation5 + $0x2bc] sm:$0xf0]  ;;  %v4856_v47 = vld [vmem:[#allocation5 + $0x154] sm:$0xf0] }
  0xa0   : > { %2451 = vmatpush.bf16.msrb.mxu0 %v5355_v59  ;;  %v6684_v59 = vld [vmem:[#allocation5 + $0x324] sm:$0xf]  ;;  %v5439_v60 = vor.u32 %v6769_v52, %v5436_v53  ;;  %v6709_v39 = vld [vmem:[#allocation5 + $0x3ec] sm:$0xf]  ;;  %v5016_v51 = vld [vmem:[#allocation5 + $0x294] sm:$0xf0] }
  0xa1   : > { %2464 = vmatpush.bf16.msrb.mxu1 %v5515_v63  ;;  %v5256_v63 = vld [vmem:[#allocation5 + $0x474] sm:$0xf0]  ;;  %v5099_v3 = vor.u32 %v6684_v59, %v5096_v61  ;;  %v6664_v50 = vld [vmem:[#allocation5 + $0x284] sm:$0xf]  ;;  %v6819_v57 = vld [vmem:[#allocation5 + $0x75c] sm:$0xf] }
  0xa2   : > { %2477 = vmatpush.bf16.msrb.mxu2 %v5675_v0  ;;  %v6764_v0 = vld [vmem:[#allocation5 + $0x5a4] sm:$0xf]  ;;  %v5636_v58 = vld [vmem:[#allocation5 + $0x76c] sm:$0xf0]  ;;  %v6859_v59 = vld [vmem:[#allocation5 + $0x89c] sm:$0xf] }
  0xa3   : > { %2490 = vmatpush.bf16.msrb.mxu3 %v4719_v4  ;;  %v5259_v4 = vor.u32 %v6724_v62, %v5256_v63  ;;  %v5419_v8 = vor.u32 %v6764_v0, %v5416_v1  ;;  %v6704_v52 = vld [vmem:[#allocation5 + $0x3c4] sm:$0xf]  ;;  %v5796_v61 = vld [vmem:[#allocation5 + $0x8ac] sm:$0xf0]  ;;  %v4842_v62 = vld [vmem:[#allocation5 + $0x120] sm:$0xf]  ;;  %v5019_v0 = vor.u32 %v6664_v50, %v5016_v51  ;;  %v5639_v5 = vor.u32 %v6819_v57, %v5636_v58 }
  0xa4   : > { %2452 = vmatpush.bf16.msrb.mxu0 %v5335_v11  ;;  %v5236_v11 = vld [vmem:[#allocation5 + $0x44c] sm:$0xf0]  ;;  %v6622_v63 = vld [vmem:[#allocation5 + $0x130] sm:$0xf0]  ;;  %v5799_v6 = vor.u32 %v6859_v59, %v5796_v61  ;;  %v5616_v9 = vld [vmem:[#allocation5 + $0x744] sm:$0xf0] }
  0xa5   : > { %2465 = vmatpush.bf16.msrb.mxu1 %v5495_v16  ;;  %v5239_v16 = vor.u32 %v6719_v10, %v5236_v11  ;;  %v4843_v7 = vor.u32 %v6622_v63, %v4842_v62  ;;  %v6854_v10 = vld [vmem:[#allocation5 + $0x874] sm:$0xf]  ;;  %v5776_v12 = vld [vmem:[#allocation5 + $0x884] sm:$0xf0]  ;;  %v4822_v13 = vld [vmem:[#allocation5 + $0xf8] sm:$0xf] }
  0xa6   : > { %2478 = vmatpush.bf16.msrb.mxu2 %v5655_v17  ;;  %v6634_v17 = vld [vmem:[#allocation5 + $0x194] sm:$0xf]  ;;  %v5596_v25 = vld [vmem:[#allocation5 + $0x71c] sm:$0xf0]  ;;  %v6799_v51 = vld [vmem:[#allocation5 + $0x6bc] sm:$0xf] }
  0xa7   : > { %2491 = vmatpush.bf16.msrb.mxu3 %v4699_v26  ;;  %2453 = vmatmul.bf16.vlgmr.msrb.gmra.mxu0 %v7902_v40  ;;  %v6714_v26 = vld [vmem:[#allocation5 + $0x414] sm:$0xf]  ;;  %v4899_v30 = vor.u32 %v6634_v17, %v4896_v20  ;;  %v5779_v20 = vor.u32 %v6854_v10, %v5776_v12  ;;  %v4922_v58 = vld [vmem:[#allocation5 + $0x1c0] sm:$0xf]  ;;  %s559_s1 = scalar_lea.vmem [#allocation20], %s4691_s14  ;;  %s4500_s3 = sshll.u32 %s4496_s27, 4  ;;  %s4501_s3 = int_to_ptr.hbm [resolvable:$true] %s4500_s3 }
  0xa8   : > { %2497 = vmatpush.bf16.msra.mxu0 %v4999_v27  ;;  %2466 = vmatmul.bf16.vlgmr.msrb.gmra.mxu1 %v7904_v41  ;;  %v5216_v27 = vld [vmem:[#allocation5 + $0x424] sm:$0xf0]  ;;  %v6602_v57 = vld [vmem:[#allocation5 + $0x90] sm:$0xf0]  ;;  %v5516_v12 = vld [vmem:[#allocation5 + $0x67c] sm:$0xf0] }
  0xa9   : > { %2510 = vmatpush.bf16.msra.mxu1 %v5159_v28  ;;  %2479 = vmatmul.bf16.vlgmr.msrb.gmra.mxu2 %v7900_v37  ;;  %v6754_v28 = vld [vmem:[#allocation5 + $0x554] sm:$0xf]  ;;  %v5219_v32 = vor.u32 %v6714_v26, %v5216_v27  ;;  %v6849_v26 = vld [vmem:[#allocation5 + $0x84c] sm:$0xf]  ;;  %s4498_s16 = sshll.u32 %s559_s1, 4  ;;  %s4486_s28 = scalar_lea.sflag [#allocation4], %s7854_s22  ;;  %s4499_s16 = int_to_ptr.vmem [resolvable:$true] %s4498_s16 }
  0xaa   : > { %2523 = vmatpush.bf16.msra.mxu2 %v5319_v29  ;;  %2492 = vmatmul.bf16.vlgmr.msrb.gmra.mxu3 %v7888_v19  ;;  %v5376_v29 = vld [vmem:[#allocation5 + $0x564] sm:$0xf0]  ;;  %v6642_v59 = vld [vmem:[#allocation5 + $0x1d0] sm:$0xf0]  ;;  %s7561_s26 = sshra.s32 %s4501_s3, 4  ;;  %s7567_s5 = scalar_lea.hbm %s8106_s23, 24  ;;  %s7562_s26 = int_to_ptr.hbm [resolvable:$true] %s7561_s26 }
  0xab   : > { %2536 = vmatpush.bf16.msra.mxu3 %v5479_v33  ;;  %v6629_v33 = vld [vmem:[#allocation5 + $0x16c] sm:$0xf]  ;;  %v5379_v36 = vor.u32 %v6754_v28, %v5376_v29  ;;  %v5756_v28 = vld [vmem:[#allocation5 + $0x85c] sm:$0xf0]  ;;  %v4802_v29 = vld [vmem:[#allocation5 + $0xd0] sm:$0xf]  ;;  %p7568_p5 = scmp.lt.s32.totalorder %s7562_s26, %s8106_s23 }
  0xac   : > { %2498 = vmatpush.bf16.msra.mxu0 %v4979_v42  ;;  %v5196_v42 = vld [vmem:[#allocation5 + $0x3fc] sm:$0xf0]  ;;  %v4879_v45 = vor.u32 %v6629_v33, %v4876_v34  ;;  %v5759_v34 = vor.u32 %v6849_v26, %v5756_v28  ;;  %v6794_v63 = vld [vmem:[#allocation5 + $0x694] sm:$0xf]  ;;  %v5496_v26 = vld [vmem:[#allocation5 + $0x654] sm:$0xf0] }
  0xad   : > { %2511 = vmatpush.bf16.msra.mxu1 %v5139_v43  ;;  %v6749_v43 = vld [vmem:[#allocation5 + $0x52c] sm:$0xf]  ;;  %v5199_v49 = vor.u32 %v6709_v39, %v5196_v42  ;;  %v6844_v39 = vld [vmem:[#allocation5 + $0x824] sm:$0xf]  ;;  %s7563_s12 = scalar_lea.hbm %s7562_s26, 8 }
  0xae   : > { %2524 = vmatpush.bf16.msra.mxu2 %v5299_v44  ;;  %v5356_v44 = vld [vmem:[#allocation5 + $0x53c] sm:$0xf0]  ;;  %p7564_p1 = scmp.ne.s32.totalorder %s7562_s26, %s7563_s12  ;;  %p7569_p6 = scmp.lt.s32.totalorder %s7567_s5, %s7563_s12 }
  0xaf   : > { %2537 = vmatpush.bf16.msra.mxu3 %v5459_v48  ;;  %v5039_v48 = vor.u32 %v6669_v35, %v5036_v38  ;;  %v5359_v53 = vor.u32 %v6749_v43, %v5356_v44  ;;  %v5576_v38 = vld [vmem:[#allocation5 + $0x6f4] sm:$0xf0]  ;;  %v4782_v44 = vld [vmem:[#allocation5 + $0xa8] sm:$0xf] }
  0xb0   : > { %2499 = vmatpush.bf16.msra.mxu0 %v4959_v54  ;;  %v5176_v54 = vld [vmem:[#allocation5 + $0x3d4] sm:$0xf0]  ;;  %p7565_p3 = pnand %p7564_p1, %p7825_p2  ;;  %p7570_p7 = por %p7569_p6, %p7568_p5 }
  0xb1   : > { %2512 = vmatpush.bf16.msra.mxu1 %v5119_v55  ;;  %v6744_v55 = vld [vmem:[#allocation5 + $0x504] sm:$0xf]  ;;  %v5179_v1 = vor.u32 %v6704_v52, %v5176_v54  ;;  %v5736_v43 = vld [vmem:[#allocation5 + $0x834] sm:$0xf0]  ;;  %v5556_v52 = vld [vmem:[#allocation5 + $0x6cc] sm:$0xf0] }
  0xb2   : > { %2525 = vmatpush.bf16.msra.mxu2 %v5279_v56  ;;  %v5336_v56 = vld [vmem:[#allocation5 + $0x514] sm:$0xf0]  ;;  %p7566_p11 = pneg %p7565_p3 }
  0xb3   : > { %2538 = vmatpush.bf16.msra.mxu3 %v5439_v60  ;;  %v4859_v60 = vor.u32 %v6624_v46, %v4856_v47  ;;  %v4942_v46 = vld [vmem:[#allocation5 + $0x1e8] sm:$0xf]  ;;  %v6647_v47 = vld [vmem:[#allocation5 + $0x1f8] sm:$0xf0] }
  0xb4   : > { %2500 = vmatpush.bf16.msra.mxu0 %v4939_v2  ;;  %v5002_v2 = vld [vmem:[#allocation5 + $0x260] sm:$0xf]  ;;  %v4943_v54 = vor.u32 %v6647_v47, %v4942_v46  ;;  %p7571_p8 = pnand %p7570_p7, %p7566_p11 }
  0xb5   : > { %2513 = vmatpush.bf16.msra.mxu1 %v5099_v3  ;;  %v6662_v3 = vld [vmem:[#allocation5 + $0x270] sm:$0xf0] }
  0xb6   : > { %2526 = vmatpush.bf16.msra.mxu2 %v5259_v4  ;;  %v5339_v4 = vor.u32 %v6744_v55, %v5336_v56  ;;  %v5003_v11 = vor.u32 %v6662_v3, %v5002_v2  ;;  %v5716_v55 = vld [vmem:[#allocation5 + $0x80c] sm:$0xf0]  ;;  %v4762_v56 = vld [vmem:[#allocation5 + $0x80] sm:$0xf]  ;;  %v4923_v2 = vor.u32 %v6642_v59, %v4922_v58  ;;  %v5696_v3 = vld [vmem:[#allocation5 + $0x7e4] sm:$0xf0] }
  0xb7   : > { %2539 = vmatpush.bf16.msra.mxu3 %v5419_v8  ;;  %v6814_v8 = vld [vmem:[#allocation5 + $0x734] sm:$0xf]  ;;  %v4763_v62 = vor.u32 %v6602_v57, %v4762_v56  ;;  %v5302_v56 = vld [vmem:[#allocation5 + $0x4b8] sm:$0xf]  ;;  %v6737_v58 = vld [vmem:[#allocation5 + $0x4c8] sm:$0xf0] }
  0xb8   : > { %2501 = vmatpush.bf16.msra.mxu0 %v4919_v14  ;;  %v6617_v14 = vld [vmem:[#allocation5 + $0x108] sm:$0xf0]  ;;  %v5619_v17 = vor.u32 %v6814_v8, %v5616_v9  ;;  %v5462_v59 = vld [vmem:[#allocation5 + $0x5f8] sm:$0xf] }
  0xb9   : > { %2514 = vmatpush.bf16.msra.mxu1 %v5079_v15  ;;  %v4982_v15 = vld [vmem:[#allocation5 + $0x238] sm:$0xf]  ;;  %v4823_v23 = vor.u32 %v6617_v14, %v4822_v13  ;;  %v6829_v13 = vld [vmem:[#allocation5 + $0x7ac] sm:$0xf] }
  0xba   : > { %2527 = vmatpush.bf16.msra.mxu2 %v5239_v16  ;;  %v6657_v16 = vld [vmem:[#allocation5 + $0x248] sm:$0xf0] }
  0xbb   : > { %2540 = vmatpush.bf16.msra.mxu3 %v5399_v24  ;;  %v6809_v24 = vld [vmem:[#allocation5 + $0x70c] sm:$0xf]  ;;  %v4983_v27 = vor.u32 %v6657_v16, %v4982_v15  ;;  %v5676_v15 = vld [vmem:[#allocation5 + $0x7bc] sm:$0xf0]  ;;  %v4722_v16 = vld [vmem:[#allocation5 + $0x30] sm:$0xf] }
  0xbc   : > { %2502 = vmatpush.bf16.msra.mxu0 %v4899_v30  ;;  %v6612_v30 = vld [vmem:[#allocation5 + $0xe0] sm:$0xf0]  ;;  %v5599_v33 = vor.u32 %v6809_v24, %v5596_v25 }
  0xbd   : > { %2515 = vmatpush.bf16.msra.mxu1 %v5059_v31  ;;  %v4962_v31 = vld [vmem:[#allocation5 + $0x210] sm:$0xf]  ;;  %v4803_v35 = vor.u32 %v6612_v30, %v4802_v29  ;;  %v6784_v25 = vld [vmem:[#allocation5 + $0x644] sm:$0xf]  ;;  %v5656_v30 = vld [vmem:[#allocation5 + $0x794] sm:$0xf0] }
  0xbe   : > { %2528 = vmatpush.bf16.msra.mxu2 %v5219_v32  ;;  %v6652_v32 = vld [vmem:[#allocation5 + $0x220] sm:$0xf0] }
  0xbf   : > { %2541 = vmatpush.bf16.msra.mxu3 %v5379_v36  ;;  %v6804_v36 = vld [vmem:[#allocation5 + $0x6e4] sm:$0xf]  ;;  %v4963_v42 = vor.u32 %v6652_v32, %v4962_v31  ;;  %v4702_v31 = vld [vmem:[#allocation5 + $0x8] sm:$0xf] }
  0xc0   : > { %2503 = vmatpush.bf16.msra.mxu0 %v4879_v45  ;;  %v6607_v45 = vld [vmem:[#allocation5 + $0xb8] sm:$0xf0]  ;;  %v6824_v29 = vld [vmem:[#allocation5 + $0x784] sm:$0xf] }
  0xc1   : > { %2516 = vmatpush.bf16.msra.mxu1 %v5039_v48  ;;  %v5579_v48 = vor.u32 %v6804_v36, %v5576_v38  ;;  %v4783_v50 = vor.u32 %v6607_v45, %v4782_v44  ;;  %v5162_v36 = vld [vmem:[#allocation5 + $0x3a0] sm:$0xf]  ;;  %v6702_v38 = vld [vmem:[#allocation5 + $0x3b0] sm:$0xf0]  ;;  %v5659_v46 = vor.u32 %v6824_v29, %v5656_v30 }
  0xc2   : > { %2529 = vmatpush.bf16.msra.mxu2 %v5199_v49  ;;  %v5739_v49 = vor.u32 %v6844_v39, %v5736_v43  ;;  %v5322_v39 = vld [vmem:[#allocation5 + $0x4e0] sm:$0xf]  ;;  %v6742_v43 = vld [vmem:[#allocation5 + $0x4f0] sm:$0xf0] }
  0xc3   : > { %2542 = vmatpush.bf16.msra.mxu3 %v5359_v53  ;;  %v6839_v53 = vld [vmem:[#allocation5 + $0x7fc] sm:$0xf]  ;;  %v5482_v44 = vld [vmem:[#allocation5 + $0x620] sm:$0xf]  ;;  %v6782_v45 = vld [vmem:[#allocation5 + $0x630] sm:$0xf0] }
  0xc4   : > { %2504 = vmatpush.bf16.msra.mxu0 %v4859_v60  ;;  %v5559_v60 = vor.u32 %v6799_v51, %v5556_v52  ;;  %v5719_v61 = vor.u32 %v6839_v53, %v5716_v55  ;;  %v5163_v51 = vor.u32 %v6702_v38, %v5162_v36  ;;  %v5323_v52 = vor.u32 %v6742_v43, %v5322_v39  ;;  %v6697_v55 = vld [vmem:[#allocation5 + $0x388] sm:$0xf0]  ;;  %v5082_v30 = vld [vmem:[#allocation5 + $0x300] sm:$0xf]  ;;  %v6762_v36 = vld [vmem:[#allocation5 + $0x590] sm:$0xf0] }
  0xc5   : > { %2517 = vmatpush.bf16.msra.mxu1 %v5019_v0  ;;  %v5536_v0 = vld [vmem:[#allocation5 + $0x6a4] sm:$0xf0]  ;;  %v5483_v53 = vor.u32 %v6782_v45, %v5482_v44  ;;  %v5562_v38 = vld [vmem:[#allocation5 + $0x6c0] sm:$0xf]  ;;  %v6802_v39 = vld [vmem:[#allocation5 + $0x6d0] sm:$0xf0] }
  0xc6   : > { %2530 = vmatpush.bf16.msra.mxu2 %v5179_v1  ;;  %v6834_v1 = vld [vmem:[#allocation5 + $0x7d4] sm:$0xf]  ;;  %v5539_v8 = vor.u32 %v6794_v63, %v5536_v0  ;;  %v5303_v0 = vor.u32 %v6737_v58, %v5302_v56  ;;  %v5062_v45 = vld [vmem:[#allocation5 + $0x2d8] sm:$0xf]  ;;  %v6672_v58 = vld [vmem:[#allocation5 + $0x2c0] sm:$0xf0] }
  0xc7   : > { %2543 = vmatpush.bf16.msra.mxu3 %v5339_v4  ;;  %2505 = vmatmul.bf16.vlgmr.msra.gmra.mxu0 %v7890_v21  ;;  %v4742_v4 = vld [vmem:[#allocation5 + $0x58] sm:$0xf]  ;;  %v5699_v9 = vor.u32 %v6834_v1, %v5696_v3  ;;  %v6692_v3 = vld [vmem:[#allocation5 + $0x360] sm:$0xf0] }
  0xc8   : > { %2549 = vmatpush.bf16.msrb.mxu0 %v5639_v5  ;;  %2518 = vmatmul.bf16.vlgmr.msra.gmra.mxu1 %v7886_v18  ;;  %v6597_v5 = vld [vmem:[#allocation5 + $0x68] sm:$0xf0] }
  0xc9   : > { %2562 = vmatpush.bf16.msrb.mxu1 %v5799_v6  ;;  %2531 = vmatmul.bf16.vlgmr.msra.gmra.mxu2 %v7892_v22  ;;  %v4902_v6 = vld [vmem:[#allocation5 + $0x198] sm:$0xf]  ;;  %v4743_v10 = vor.u32 %v6597_v5, %v4742_v4  ;;  %v5282_v4 = vld [vmem:[#allocation5 + $0x490] sm:$0xf] }
  0xca   : > { %2575 = vmatpush.bf16.msrb.mxu2 %v4843_v7  ;;  %2544 = vmatmul.bf16.vlgmr.msra.gmra.mxu3 %v7902_v40  ;;  %v6637_v7 = vld [vmem:[#allocation5 + $0x1a8] sm:$0xf0] }
  0xcb   : > { %2588 = vmatpush.bf16.msrb.mxu3 %v5003_v11  ;;  %v6789_v11 = vld [vmem:[#allocation5 + $0x66c] sm:$0xf]  ;;  %v4903_v14 = vor.u32 %v6637_v7, %v4902_v6  ;;  %v6732_v6 = vld [vmem:[#allocation5 + $0x4a0] sm:$0xf0]  ;;  %v5442_v7 = vld [vmem:[#allocation5 + $0x5d0] sm:$0xf] }
  0xcc   : > { %2550 = vmatpush.bf16.msrb.mxu0 %v5619_v17  ;;  %v6592_v17 = vld [vmem:[#allocation5 + $0x40] sm:$0xf0]  ;;  %v5519_v24 = vor.u32 %v6789_v11, %v5516_v12  ;;  %v5283_v12 = vor.u32 %v6732_v6, %v5282_v4  ;;  %v6667_v4 = vld [vmem:[#allocation5 + $0x298] sm:$0xf0] }
  0xcd   : > { %2563 = vmatpush.bf16.msrb.mxu1 %v5779_v20  ;;  %v4882_v20 = vld [vmem:[#allocation5 + $0x170] sm:$0xf]  ;;  %v4723_v28 = vor.u32 %v6592_v17, %v4722_v16  ;;  %v5262_v16 = vld [vmem:[#allocation5 + $0x468] sm:$0xf] }
  0xce   : > { %2576 = vmatpush.bf16.msrb.mxu2 %v4823_v23  ;;  %v6632_v23 = vld [vmem:[#allocation5 + $0x180] sm:$0xf0] }
  0xcf   : > { %2589 = vmatpush.bf16.msrb.mxu3 %v4983_v27  ;;  %v5679_v27 = vor.u32 %v6829_v13, %v5676_v15  ;;  %v4883_v32 = vor.u32 %v6632_v23, %v4882_v20  ;;  %v6687_v15 = vld [vmem:[#allocation5 + $0x338] sm:$0xf0]  ;;  %v5422_v23 = vld [vmem:[#allocation5 + $0x5a8] sm:$0xf] }
  0xd0   : > { %2551 = vmatpush.bf16.msrb.mxu0 %v5599_v33  ;;  %v6587_v33 = vld [vmem:[#allocation5 + $0x18] sm:$0xf0] }
  0xd1   : > { %2564 = vmatpush.bf16.msrb.mxu1 %v5759_v34  ;;  %v4862_v34 = vld [vmem:[#allocation5 + $0x148] sm:$0xf]  ;;  %v4703_v47 = vor.u32 %v6587_v33, %v4702_v31  ;;  %v6727_v20 = vld [vmem:[#allocation5 + $0x478] sm:$0xf0]  ;;  %v6682_v31 = vld [vmem:[#allocation5 + $0x310] sm:$0xf0] }
  0xd2   : > { %2577 = vmatpush.bf16.msrb.mxu2 %v4803_v35  ;;  %v6627_v35 = vld [vmem:[#allocation5 + $0x158] sm:$0xf0] }
  0xd3   : > { %2590 = vmatpush.bf16.msrb.mxu3 %v4963_v42  ;;  %v5499_v42 = vor.u32 %v6784_v25, %v5496_v26  ;;  %v5582_v25 = vld [vmem:[#allocation5 + $0x6e8] sm:$0xf]  ;;  %v6807_v26 = vld [vmem:[#allocation5 + $0x6f8] sm:$0xf0] }
  0xd4   : > { %2552 = vmatpush.bf16.msrb.mxu0 %v5579_v48  ;;  %v5642_v48 = vld [vmem:[#allocation5 + $0x760] sm:$0xf]  ;;  %v5583_v33 = vor.u32 %v6807_v26, %v5582_v25 }
  0xd5   : > { %2565 = vmatpush.bf16.msrb.mxu1 %v5739_v49  ;;  %v6822_v49 = vld [vmem:[#allocation5 + $0x770] sm:$0xf0] }
  0xd6   : > { %2578 = vmatpush.bf16.msrb.mxu2 %v4783_v50  ;;  %v4863_v50 = vor.u32 %v6627_v35, %v4862_v34  ;;  %v5643_v57 = vor.u32 %v6822_v49, %v5642_v48  ;;  %v6722_v34 = vld [vmem:[#allocation5 + $0x450] sm:$0xf0]  ;;  %v5402_v35 = vld [vmem:[#allocation5 + $0x580] sm:$0xf]  ;;  %v5563_v48 = vor.u32 %v6802_v39, %v5562_v38  ;;  %v6717_v49 = vld [vmem:[#allocation5 + $0x428] sm:$0xf0] }
  0xd7   : > { %2591 = vmatpush.bf16.msrb.mxu3 %v4943_v54  ;;  %v5142_v54 = vld [vmem:[#allocation5 + $0x378] sm:$0xf]  ;;  %v5403_v44 = vor.u32 %v6762_v36, %v5402_v35  ;;  %v6615_v35 = vld [vmem:[#allocation5 + $0xfc] sm:$0xf]  ;;  %v4824_v38 = vld [vmem:[#allocation5 + $0x10c] sm:$0xf0] }
  0xd8   : > { %2553 = vmatpush.bf16.msrb.mxu0 %v5559_v60  ;;  %v6777_v60 = vld [vmem:[#allocation5 + $0x608] sm:$0xf0]  ;;  %v5143_v63 = vor.u32 %v6697_v55, %v5142_v54  ;;  %v6655_v39 = vld [vmem:[#allocation5 + $0x23c] sm:$0xf] }
  0xd9   : > { %2566 = vmatpush.bf16.msrb.mxu1 %v5719_v61  ;;  %v5622_v61 = vld [vmem:[#allocation5 + $0x738] sm:$0xf]  ;;  %v5463_v1 = vor.u32 %v6777_v60, %v5462_v59  ;;  %v5202_v59 = vld [vmem:[#allocation5 + $0x3f0] sm:$0xf] }
  0xda   : > { %2579 = vmatpush.bf16.msrb.mxu2 %v4763_v62  ;;  %v6817_v62 = vld [vmem:[#allocation5 + $0x748] sm:$0xf0] }
  0xdb   : > { %2592 = vmatpush.bf16.msrb.mxu3 %v4923_v2  ;;  %v5122_v2 = vld [vmem:[#allocation5 + $0x350] sm:$0xf]  ;;  %v5623_v5 = vor.u32 %v6817_v62, %v5622_v61  ;;  %v6712_v61 = vld [vmem:[#allocation5 + $0x400] sm:$0xf0] }
  0xdc   : > { %2554 = vmatpush.bf16.msrb.mxu0 %v5539_v8  ;;  %v6772_v8 = vld [vmem:[#allocation5 + $0x5e0] sm:$0xf0]  ;;  %v5123_v11 = vor.u32 %v6692_v3, %v5122_v2  ;;  %v5362_v62 = vld [vmem:[#allocation5 + $0x530] sm:$0xf]  ;;  %v5022_v3 = vld [vmem:[#allocation5 + $0x288] sm:$0xf] }
  0xdd   : > { %2567 = vmatpush.bf16.msrb.mxu1 %v5699_v9  ;;  %v5602_v9 = vld [vmem:[#allocation5 + $0x710] sm:$0xf]  ;;  %v5443_v13 = vor.u32 %v6772_v8, %v5442_v7  ;;  %v5182_v7 = vld [vmem:[#allocation5 + $0x3c8] sm:$0xf]  ;;  %v6707_v8 = vld [vmem:[#allocation5 + $0x3d8] sm:$0xf0] }
  0xde   : > { %2580 = vmatpush.bf16.msrb.mxu2 %v4743_v10  ;;  %v6812_v10 = vld [vmem:[#allocation5 + $0x720] sm:$0xf0]  ;;  %v5183_v25 = vor.u32 %v6707_v8, %v5182_v7 }
  0xdf   : > { %2593 = vmatpush.bf16.msrb.mxu3 %v4903_v14  ;;  %v5102_v14 = vld [vmem:[#allocation5 + $0x328] sm:$0xf]  ;;  %v5603_v17 = vor.u32 %v6812_v10, %v5602_v9 }
  0xe0   : > { %2555 = vmatpush.bf16.msrb.mxu0 %v5519_v24  ;;  %v6767_v24 = vld [vmem:[#allocation5 + $0x5b8] sm:$0xf0]  ;;  %v5342_v9 = vld [vmem:[#allocation5 + $0x508] sm:$0xf] }
  0xe1   : > { %2568 = vmatpush.bf16.msrb.mxu1 %v5679_v27  ;;  %v5103_v27 = vor.u32 %v6687_v15, %v5102_v14  ;;  %v5423_v29 = vor.u32 %v6767_v24, %v5422_v23  ;;  %v5802_v14 = vld [vmem:[#allocation5 + $0x8a0] sm:$0xf]  ;;  %v6862_v15 = vld [vmem:[#allocation5 + $0x8b0] sm:$0xf0]  ;;  %v6660_v23 = vld [vmem:[#allocation5 + $0x264] sm:$0xf] }
  0xe2   : > { %2581 = vmatpush.bf16.msrb.mxu2 %v4723_v28  ;;  %v5263_v28 = vor.u32 %v6727_v20, %v5262_v16  ;;  %v6620_v16 = vld [vmem:[#allocation5 + $0x124] sm:$0xf]  ;;  %v4844_v20 = vld [vmem:[#allocation5 + $0x134] sm:$0xf0] }
  0xe3   : > { %2594 = vmatpush.bf16.msrb.mxu3 %v4883_v32  ;;  %v5242_v32 = vld [vmem:[#allocation5 + $0x440] sm:$0xf]  ;;  %v5004_v24 = vld [vmem:[#allocation5 + $0x274] sm:$0xf0] }
  0xe4   : > { %2556 = vmatpush.bf16.msrb.mxu0 %v5499_v42  ;;  %v5083_v42 = vor.u32 %v6682_v31, %v5082_v30  ;;  %v5243_v43 = vor.u32 %v6722_v34, %v5242_v32  ;;  %v5803_v30 = vor.u32 %v6862_v15, %v5802_v14  ;;  %v4847_v31 = vor.u32 %v6620_v16, %v4844_v20  ;;  %v6857_v34 = vld [vmem:[#allocation5 + $0x888] sm:$0xf0]  ;;  %v4924_v14 = vld [vmem:[#allocation5 + $0x1d4] sm:$0xf0]  ;;  %v7922_v15 = vld [vmem:[#allocation7] sm:$0x1f] }
  0xe5   : > { %2569 = vmatpush.bf16.msrb.mxu1 %v5659_v46  ;;  %v6677_v46 = vld [vmem:[#allocation5 + $0x2e8] sm:$0xf0]  ;;  %v5007_v32 = vor.u32 %v6660_v23, %v5004_v24  ;;  %v6680_v16 = vld [vmem:[#allocation5 + $0x304] sm:$0xf]  ;;  %v5702_v23 = vld [vmem:[#allocation5 + $0x7d8] sm:$0xf] }
  0xe6   : > { %2582 = vmatpush.bf16.msrb.mxu2 %v4703_v47  ;;  %v5222_v47 = vld [vmem:[#allocation5 + $0x418] sm:$0xf]  ;;  %v5063_v54 = vor.u32 %v6677_v46, %v5062_v45  ;;  %v4827_v46 = vor.u32 %v6615_v35, %v4824_v38 }
  0xe7   : > { %2595 = vmatpush.bf16.msrb.mxu3 %v4863_v50  ;;  %2557 = vmatmul.bf16.vlgmr.msrb.gmra.mxu0 %v7904_v41  ;;  %v5382_v50 = vld [vmem:[#allocation5 + $0x558] sm:$0xf]  ;;  %v5223_v55 = vor.u32 %v6717_v49, %v5222_v47  ;;  %v6852_v49 = vld [vmem:[#allocation5 + $0x860] sm:$0xf0] }
  0xe8   : > { %2601 = vmatpush.bf16.msra.mxu0 %v5163_v51  ;;  %2570 = vmatmul.bf16.vlgmr.msrb.gmra.mxu1 %v7900_v37  ;;  %v6757_v51 = vld [vmem:[#allocation5 + $0x568] sm:$0xf0] }
  0xe9   : > { %2614 = vmatpush.bf16.msra.mxu1 %v5323_v52  ;;  %2583 = vmatmul.bf16.vlgmr.msrb.gmra.mxu2 %v7888_v19  ;;  %v5542_v52 = vld [vmem:[#allocation5 + $0x698] sm:$0xf]  ;;  %v5383_v56 = vor.u32 %v6757_v51, %v5382_v50  ;;  %v6610_v50 = vld [vmem:[#allocation5 + $0xd4] sm:$0xf] }
  0xea   : > { %2627 = vmatpush.bf16.msra.mxu2 %v5483_v53  ;;  %2596 = vmatmul.bf16.vlgmr.msrb.gmra.mxu3 %v7890_v21  ;;  %v6797_v53 = vld [vmem:[#allocation5 + $0x6a8] sm:$0xf0] }
  0xeb   : > { %2640 = vmatpush.bf16.msra.mxu3 %v5643_v57  ;;  %v5042_v57 = vld [vmem:[#allocation5 + $0x2b0] sm:$0xf]  ;;  %v5543_v60 = vor.u32 %v6797_v53, %v5542_v52  ;;  %v4804_v52 = vld [vmem:[#allocation5 + $0xe4] sm:$0xf0]  ;;  %v6650_v53 = vld [vmem:[#allocation5 + $0x214] sm:$0xf] }
  0xec   : > { %2602 = vmatpush.bf16.msra.mxu0 %v5143_v63  ;;  %v6752_v63 = vld [vmem:[#allocation5 + $0x540] sm:$0xf0]  ;;  %v5043_v2 = vor.u32 %v6672_v58, %v5042_v57  ;;  %v4807_v58 = vor.u32 %v6610_v50, %v4804_v52  ;;  %v4884_v50 = vld [vmem:[#allocation5 + $0x184] sm:$0xf0] }
  0xed   : > { %2615 = vmatpush.bf16.msra.mxu1 %v5303_v0  ;;  %v5522_v0 = vld [vmem:[#allocation5 + $0x670] sm:$0xf]  ;;  %v5363_v6 = vor.u32 %v6752_v63, %v5362_v62  ;;  %v6605_v62 = vld [vmem:[#allocation5 + $0xac] sm:$0xf]  ;;  %v5044_v52 = vld [vmem:[#allocation5 + $0x2c4] sm:$0xf0] }
  0xee   : > { %2628 = vmatpush.bf16.msra.mxu2 %v5463_v1  ;;  %v6792_v1 = vld [vmem:[#allocation5 + $0x680] sm:$0xf0] }
  0xef   : > { %2641 = vmatpush.bf16.msra.mxu3 %v5623_v5  ;;  %v5203_v5 = vor.u32 %v6712_v61, %v5202_v59  ;;  %v5523_v10 = vor.u32 %v6792_v1, %v5522_v0  ;;  %v6847_v61 = vld [vmem:[#allocation5 + $0x838] sm:$0xf0]  ;;  %v4784_v0 = vld [vmem:[#allocation5 + $0xbc] sm:$0xf0]  ;;  %v6645_v1 = vld [vmem:[#allocation5 + $0x1ec] sm:$0xf] }
  0xf0   : > { %2603 = vmatpush.bf16.msra.mxu0 %v5123_v11  ;;  %v6747_v11 = vld [vmem:[#allocation5 + $0x518] sm:$0xf0]  ;;  %v4787_v7 = vor.u32 %v6605_v62, %v4784_v0  ;;  %v4864_v0 = vld [vmem:[#allocation5 + $0x15c] sm:$0xf0] }
  0xf1   : > { %2616 = vmatpush.bf16.msra.mxu1 %v5283_v12  ;;  %v5502_v12 = vld [vmem:[#allocation5 + $0x648] sm:$0xf]  ;;  %v5343_v26 = vor.u32 %v6747_v11, %v5342_v9  ;;  %v6842_v9 = vld [vmem:[#allocation5 + $0x810] sm:$0xf0]  ;;  %v4764_v11 = vld [vmem:[#allocation5 + $0x94] sm:$0xf0] }
  0xf2   : > { %2629 = vmatpush.bf16.msra.mxu2 %v5443_v13  ;;  %v6787_v13 = vld [vmem:[#allocation5 + $0x658] sm:$0xf0] }
  0xf3   : > { %2642 = vmatpush.bf16.msra.mxu3 %v5603_v17  ;;  %v5023_v17 = vor.u32 %v6667_v4, %v5022_v3  ;;  %v6685_v3 = vld [vmem:[#allocation5 + $0x32c] sm:$0xf]  ;;  %v5104_v4 = vld [vmem:[#allocation5 + $0x33c] sm:$0xf0] }
  0xf4   : > { %2604 = vmatpush.bf16.msra.mxu0 %v5103_v27  ;;  %v6700_v27 = vld [vmem:[#allocation5 + $0x3a4] sm:$0xf] }
  0xf5   : > { %2617 = vmatpush.bf16.msra.mxu1 %v5263_v28  ;;  %v5164_v28 = vld [vmem:[#allocation5 + $0x3b4] sm:$0xf0] }
  0xf6   : > { %2630 = vmatpush.bf16.msra.mxu2 %v5423_v29  ;;  %v5503_v29 = vor.u32 %v6787_v13, %v5502_v12  ;;  %v5167_v36 = vor.u32 %v6700_v27, %v5164_v28  ;;  %v5107_v12 = vor.u32 %v6685_v3, %v5104_v4  ;;  %v6640_v13 = vld [vmem:[#allocation5 + $0x1c4] sm:$0xf]  ;;  %v6595_v27 = vld [vmem:[#allocation5 + $0x5c] sm:$0xf]  ;;  %v902_v28 = vperm.slane %v7922_v15, 0 }
  0xf7   : > { %2643 = vmatpush.bf16.msra.mxu3 %v5583_v33  ;;  %v5782_v33 = vld [vmem:[#allocation5 + $0x878] sm:$0xf]  ;;  %v6740_v4 = vld [vmem:[#allocation5 + $0x4e4] sm:$0xf] }
  0xf8   : > { %2605 = vmatpush.bf16.msra.mxu0 %v5083_v42  ;;  %v4984_v42 = vld [vmem:[#allocation5 + $0x24c] sm:$0xf0]  ;;  %v5783_v45 = vor.u32 %v6857_v34, %v5782_v33  ;;  %v6675_v33 = vld [vmem:[#allocation5 + $0x2dc] sm:$0xf] }
  0xf9   : > { %2618 = vmatpush.bf16.msra.mxu1 %v5243_v43  ;;  %v6695_v43 = vld [vmem:[#allocation5 + $0x37c] sm:$0xf]  ;;  %v4987_v47 = vor.u32 %v6655_v39, %v4984_v42  ;;  %v5064_v34 = vld [vmem:[#allocation5 + $0x2ec] sm:$0xf0] }
  0xfa   : > { %2631 = vmatpush.bf16.msra.mxu2 %v5403_v44  ;;  %v5144_v44 = vld [vmem:[#allocation5 + $0x38c] sm:$0xf0] }
  0xfb   : > { %2644 = vmatpush.bf16.msra.mxu3 %v5563_v48  ;;  %v5762_v48 = vld [vmem:[#allocation5 + $0x850] sm:$0xf]  ;;  %v5147_v51 = vor.u32 %v6695_v43, %v5144_v44  ;;  %v6832_v44 = vld [vmem:[#allocation5 + $0x7c0] sm:$0xf0] }
  0xfc   : > { %2606 = vmatpush.bf16.msra.mxu0 %v5063_v54  ;;  %v4964_v54 = vld [vmem:[#allocation5 + $0x224] sm:$0xf0]  ;;  %v5763_v57 = vor.u32 %v6852_v49, %v5762_v48  ;;  %v5682_v43 = vld [vmem:[#allocation5 + $0x7b0] sm:$0xf]  ;;  %v6630_v49 = vld [vmem:[#allocation5 + $0x174] sm:$0xf] }
  0xfd   : > { %2619 = vmatpush.bf16.msra.mxu1 %v5223_v55  ;;  %v6690_v55 = vld [vmem:[#allocation5 + $0x354] sm:$0xf]  ;;  %v4967_v59 = vor.u32 %v6650_v53, %v4964_v54  ;;  %v4724_v48 = vld [vmem:[#allocation5 + $0x44] sm:$0xf0]  ;;  %v5683_v54 = vor.u32 %v6832_v44, %v5682_v43 }
  0xfe   : > { %2632 = vmatpush.bf16.msra.mxu2 %v5383_v56  ;;  %v5124_v56 = vld [vmem:[#allocation5 + $0x364] sm:$0xf0]  ;;  %v6730_v44 = vld [vmem:[#allocation5 + $0x494] sm:$0xf] }
  0xff   : > { %2645 = vmatpush.bf16.msra.mxu3 %v5543_v60  ;;  %v5742_v60 = vld [vmem:[#allocation5 + $0x828] sm:$0xf]  ;;  %v5127_v63 = vor.u32 %v6690_v55, %v5124_v56  ;;  %v6827_v56 = vld [vmem:[#allocation5 + $0x798] sm:$0xf0] }
 0x100   : > { %2607 = vmatpush.bf16.msra.mxu0 %v5043_v2  ;;  %v4944_v2 = vld [vmem:[#allocation5 + $0x1fc] sm:$0xf0]  ;;  %v5662_v55 = vld [vmem:[#allocation5 + $0x788] sm:$0xf] }
 0x101   : > { %2620 = vmatpush.bf16.msra.mxu1 %v5203_v5  ;;  %v5743_v5 = vor.u32 %v6847_v61, %v5742_v60  ;;  %v4947_v8 = vor.u32 %v6645_v1, %v4944_v2  ;;  %v4704_v60 = vld [vmem:[#allocation5 + $0x1c] sm:$0xf0]  ;;  %v6625_v61 = vld [vmem:[#allocation5 + $0x14c] sm:$0xf] }
 0x102   : > { %2633 = vmatpush.bf16.msra.mxu2 %v5363_v6  ;;  %v5722_v6 = vld [vmem:[#allocation5 + $0x800] sm:$0xf]  ;;  %v6665_v1 = vld [vmem:[#allocation5 + $0x28c] sm:$0xf] }
 0x103   : > { %2646 = vmatpush.bf16.msra.mxu3 %v5523_v10  ;;  %v6600_v10 = vld [vmem:[#allocation5 + $0x84] sm:$0xf]  ;;  %v5723_v20 = vor.u32 %v6842_v9, %v5722_v6  ;;  %v5024_v2 = vld [vmem:[#allocation5 + $0x29c] sm:$0xf0]  ;;  %v5484_v9 = vld [vmem:[#allocation5 + $0x634] sm:$0xf0] }
 0x104   : > { %2608 = vmatpush.bf16.msra.mxu0 %v5023_v17  ;;  %v5084_v17 = vld [vmem:[#allocation5 + $0x314] sm:$0xf0]  ;;  %v4767_v24 = vor.u32 %v6600_v10, %v4764_v11  ;;  %v6780_v6 = vld [vmem:[#allocation5 + $0x624] sm:$0xf] }
 0x105   : > { %2621 = vmatpush.bf16.msra.mxu1 %v5183_v25  ;;  %v4927_v25 = vor.u32 %v6640_v13, %v4924_v14  ;;  %v2415_v38 = vpop.f32.mrf.mxu1  ;;  %v6820_v10 = vld [vmem:[#allocation5 + $0x764] sm:$0xf]  ;;  %v5644_v11 = vld [vmem:[#allocation5 + $0x774] sm:$0xf0] }
 0x106   : > { %2634 = vmatpush.bf16.msra.mxu2 %v5343_v26  ;;  %v6837_v26 = vld [vmem:[#allocation5 + $0x7e8] sm:$0xf0] }
 0x107   : > { %2647 = vmatpush.bf16.msra.mxu3 %v5503_v29  ;;  %2609 = vmatmul.bf16.vlgmr.msra.gmra.mxu0 %v7886_v18  ;;  %v5087_v29 = vor.u32 %v6680_v16, %v5084_v17  ;;  %v5703_v35 = vor.u32 %v6837_v26, %v5702_v23  ;;  %v4867_v17 = vor.u32 %v6625_v61, %v4864_v0  ;;  %v5804_v23 = vld [vmem:[#allocation5 + $0x8b4] sm:$0xf0]  ;;  %v5424_v61 = vld [vmem:[#allocation5 + $0x5bc] sm:$0xf0]  ;;  %v6845_v0 = vld [vmem:[#allocation5 + $0x82c] sm:$0xf] }
 0x108   : > { %2653 = vmatpush.bf16.msrb.mxu0 %v5803_v30  ;;  %2622 = vmatmul.bf16.vlgmr.msra.gmra.mxu1 %v7892_v22  ;;  %v4744_v30 = vld [vmem:[#allocation5 + $0x6c] sm:$0xf0]  ;;  %v5487_v26 = vor.u32 %v6780_v6, %v5484_v9  ;;  %v6760_v9 = vld [vmem:[#allocation5 + $0x584] sm:$0xf] }
 0x109   : > { %2666 = vmatpush.bf16.msrb.mxu1 %v4847_v31  ;;  %2635 = vmatmul.bf16.vlgmr.msra.gmra.mxu2 %v7902_v40  ;;  %v6635_v31 = vld [vmem:[#allocation5 + $0x19c] sm:$0xf]  ;;  %v4747_v39 = vor.u32 %v6595_v27, %v4744_v30  ;;  %v5647_v27 = vor.u32 %v6820_v10, %v5644_v11 }
 0x10a   : > { %2679 = vmatpush.bf16.msrb.mxu2 %v5007_v32  ;;  %2648 = vmatmul.bf16.vlgmr.msra.gmra.mxu3 %v7904_v41  ;;  %v4904_v32 = vld [vmem:[#allocation5 + $0x1ac] sm:$0xf0]  ;;  %v6775_v30 = vld [vmem:[#allocation5 + $0x5fc] sm:$0xf] }
 0x10b   : > { %2692 = vmatpush.bf16.msrb.mxu3 %v5167_v36  ;;  %v2402_v36 = vpop.f32.mrf.mxu0  ;;  %v4907_v42 = vor.u32 %v6635_v31, %v4904_v32  ;;  %v5464_v32 = vld [vmem:[#allocation5 + $0x60c] sm:$0xf0] }
 0x10c   : > { %2654 = vmatpush.bf16.msrb.mxu0 %v5783_v45  ;;  %v6590_v45 = vld [vmem:[#allocation5 + $0x34] sm:$0xf]  ;;  %v2428_v62 = vpop.f32.mrf.mxu2 }
 0x10d   : > { %2667 = vmatpush.bf16.msrb.mxu1 %v4827_v46  ;;  %v2403_v46 = vadd.f32 %v2402_v36, %v902_v28  ;;  %v2417_v13 = vpop.f32.mrf.mxu1  ;;  %v6735_v28 = vld [vmem:[#allocation5 + $0x4bc] sm:$0xf]  ;;  %v5784_v36 = vld [vmem:[#allocation5 + $0x88c] sm:$0xf0] }
 0x10e   : > { %2680 = vmatpush.bf16.msrb.mxu2 %v4987_v47  ;;  %v5067_v47 = vor.u32 %v6675_v33, %v5064_v34  ;;  %v6815_v33 = vld [vmem:[#allocation5 + $0x73c] sm:$0xf]  ;;  %v5624_v34 = vld [vmem:[#allocation5 + $0x74c] sm:$0xf0]  ;;  %v6800_v13 = vld [vmem:[#allocation5 + $0x6c4] sm:$0xf] }
 0x10f   : > { %2693 = vmatpush.bf16.msrb.mxu3 %v5147_v51  ;;  %v6670_v51 = vld [vmem:[#allocation5 + $0x2b4] sm:$0xf]  ;;  %v2416_v53 = vadd.f32 %v2415_v38, %v2403_v46  ;;  %v5627_v43 = vor.u32 %v6815_v33, %v5624_v34  ;;  %v5544_v33 = vld [vmem:[#allocation5 + $0x6ac] sm:$0xf0] }
 0x110   : > { %2655 = vmatpush.bf16.msrb.mxu0 %v5763_v57  ;;  %v4727_v57 = vor.u32 %v6590_v45, %v4724_v48  ;;  %v5284_v45 = vld [vmem:[#allocation5 + $0x4a4] sm:$0xf0]  ;;  %v6770_v46 = vld [vmem:[#allocation5 + $0x5d4] sm:$0xf] }
 0x111   : > { %2668 = vmatpush.bf16.msrb.mxu1 %v4807_v58  ;;  %v4887_v58 = vor.u32 %v6630_v49, %v4884_v50  ;;  %v2429_v3 = vadd.f32 %v2428_v62, %v2416_v53  ;;  %v5444_v49 = vld [vmem:[#allocation5 + $0x5e4] sm:$0xf0]  ;;  %v6810_v50 = vld [vmem:[#allocation5 + $0x714] sm:$0xf]  ;;  %v6805_v62 = vld [vmem:[#allocation5 + $0x6ec] sm:$0xf] }
 0x112   : > { %2681 = vmatpush.bf16.msrb.mxu2 %v4967_v59  ;;  %v6585_v59 = vld [vmem:[#allocation5 + $0xc] sm:$0xf]  ;;  %v5764_v53 = vld [vmem:[#allocation5 + $0x864] sm:$0xf0] }
 0x113   : > { %2694 = vmatpush.bf16.msrb.mxu3 %v5127_v63  ;;  %v5047_v63 = vor.u32 %v6670_v51, %v5044_v52  ;;  %v4707_v16 = vor.u32 %v6585_v59, %v4704_v60  ;;  %v5604_v51 = vld [vmem:[#allocation5 + $0x724] sm:$0xf0]  ;;  %v6850_v52 = vld [vmem:[#allocation5 + $0x854] sm:$0xf]  ;;  %v6765_v59 = vld [vmem:[#allocation5 + $0x5ac] sm:$0xf] }
 0x114   : > { %2656 = vmatpush.bf16.msrb.mxu0 %v5743_v5  ;;  %v5324_v5 = vld [vmem:[#allocation5 + $0x4f4] sm:$0xf0]  ;;  %v2430_v38 = vpop.f32.mrf.mxu2  ;;  %v5767_v60 = vor.u32 %v6850_v52, %v5764_v53  ;;  %v6830_v52 = vld [vmem:[#allocation5 + $0x7b4] sm:$0xf]  ;;  %v5684_v53 = vld [vmem:[#allocation5 + $0x7c4] sm:$0xf0] }
 0x115   : > { %2669 = vmatpush.bf16.msrb.mxu1 %v4787_v7  ;;  %v2441_v7 = vpop.f32.mrf.mxu3 }
 0x116   : > { %2682 = vmatpush.bf16.msrb.mxu2 %v4947_v8  ;;  %v5663_v8 = vor.u32 %v6827_v56, %v5662_v55  ;;  %v7925_v14 = vadd.f32 %v2441_v7, %v2429_v3  ;;  %v5447_v55 = vor.u32 %v6770_v46, %v5444_v49  ;;  %v5607_v56 = vor.u32 %v6810_v50, %v5604_v51  ;;  %v6720_v7 = vld [vmem:[#allocation5 + $0x444] sm:$0xf]  ;;  %v5204_v46 = vld [vmem:[#allocation5 + $0x404] sm:$0xf0]  ;;  %v6790_v50 = vld [vmem:[#allocation5 + $0x674] sm:$0xf] }
 0x117   : > { %2695 = vmatpush.bf16.msrb.mxu3 %v5107_v12  ;;  %v2404_v12 = vpop.f32.mrf.mxu0  ;;  %v5364_v49 = vld [vmem:[#allocation5 + $0x544] sm:$0xf0] }
 0x118   : > { %2657 = vmatpush.bf16.msrb.mxu0 %v5723_v20  ;;  %v6860_v20 = vld [vmem:[#allocation5 + $0x8a4] sm:$0xf]  ;;  %v5404_v12 = vld [vmem:[#allocation5 + $0x594] sm:$0xf0]  ;;  %v5524_v51 = vld [vmem:[#allocation5 + $0x684] sm:$0xf0] }
 0x119   : > { %2670 = vmatpush.bf16.msrb.mxu1 %v4767_v24  ;;  %v5027_v24 = vor.u32 %v6665_v1, %v5024_v2  ;;  %v5807_v31 = vor.u32 %v6860_v20, %v5804_v23  ;;  %v5744_v1 = vld [vmem:[#allocation5 + $0x83c] sm:$0xf0]  ;;  %v5724_v20 = vld [vmem:[#allocation5 + $0x814] sm:$0xf0] }
 0x11a   : > { %2683 = vmatpush.bf16.msrb.mxu2 %v4927_v25  ;;  %v5327_v25 = vor.u32 %v6740_v4, %v5324_v5  ;;  %v5427_v5 = vor.u32 %v6765_v59, %v5424_v61  ;;  %v5747_v11 = vor.u32 %v6845_v0, %v5744_v1  ;;  %v6745_v59 = vld [vmem:[#allocation5 + $0x50c] sm:$0xf]  ;;  %v5504_v0 = vld [vmem:[#allocation5 + $0x65c] sm:$0xf0] }
 0x11b   : > { %2696 = vmatpush.bf16.msrb.mxu3 %v5087_v29  ;;  %v5304_v29 = vld [vmem:[#allocation5 + $0x4cc] sm:$0xf0]  ;;  %v6785_v61 = vld [vmem:[#allocation5 + $0x64c] sm:$0xf] }
 0x11c   : > { %2658 = vmatpush.bf16.msrb.mxu0 %v5703_v35  ;;  %v6855_v35 = vld [vmem:[#allocation5 + $0x87c] sm:$0xf]  ;;  %v6825_v1 = vld [vmem:[#allocation5 + $0x78c] sm:$0xf] }
 0x11d   : > { %2671 = vmatpush.bf16.msrb.mxu1 %v4747_v39  ;;  %v5307_v39 = vor.u32 %v6735_v28, %v5304_v29  ;;  %v5787_v48 = vor.u32 %v6855_v35, %v5784_v36  ;;  %v5224_v28 = vld [vmem:[#allocation5 + $0x42c] sm:$0xf0]  ;;  %v6755_v29 = vld [vmem:[#allocation5 + $0x55c] sm:$0xf] }
 0x11e   : > { %2684 = vmatpush.bf16.msrb.mxu2 %v4907_v42  ;;  %v5467_v42 = vor.u32 %v6775_v30, %v5464_v32  ;;  %v6795_v32 = vld [vmem:[#allocation5 + $0x69c] sm:$0xf]  ;;  %v5704_v36 = vld [vmem:[#allocation5 + $0x7ec] sm:$0xf0] }
 0x11f   : > { %2697 = vmatpush.bf16.msrb.mxu3 %v5067_v47  ;;  %v2443_v47 = vpop.f32.mrf.mxu3  ;;  %v6835_v35 = vld [vmem:[#allocation5 + $0x7dc] sm:$0xf] }
 0x120   : > { %2659 = vmatpush.bf16.msrb.mxu0 %v5683_v54  ;;  %v5287_v54 = vor.u32 %v6730_v44, %v5284_v45  ;;  %v5547_v44 = vor.u32 %v6795_v32, %v5544_v33  ;;  %v6710_v45 = vld [vmem:[#allocation5 + $0x3f4] sm:$0xf]  ;;  %v4810_v33 = vld [vmem:[#allocation5 + $0xd8] sm:$0xf] }
 0x121   : > { %2672 = vmatpush.bf16.msrb.mxu1 %v4727_v57  ;;  %v6725_v57 = vld [vmem:[#allocation5 + $0x46c] sm:$0xf]  ;;  %v6750_v47 = vld [vmem:[#allocation5 + $0x534] sm:$0xf] }
 0x122   : > { %2685 = vmatpush.bf16.msrb.mxu2 %v4887_v58  ;;  %v5264_v58 = vld [vmem:[#allocation5 + $0x47c] sm:$0xf0] }
 0x123   : > { %2698 = vmatpush.bf16.msrb.mxu3 %v5047_v63  ;;  %v5584_v63 = vld [vmem:[#allocation5 + $0x6fc] sm:$0xf0]  ;;  %v5267_v2 = vor.u32 %v6725_v57, %v5264_v58  ;;  %v5367_v57 = vor.u32 %v6750_v47, %v5364_v49  ;;  %v5527_v58 = vor.u32 %v6790_v50, %v5524_v51  ;;  %v6693_v47 = vld [vmem:[#allocation5 + $0x368] sm:$0xf0] }
 0x124   : > { %2660 = vmatpush.bf16.msrb.mxu0 %v5663_v8  ;;  %v2454_v3 = vpop.f32.mrf.mxu0  ;;  %v5587_v6 = vor.u32 %v6805_v62, %v5584_v63  ;;  %v5244_v8 = vld [vmem:[#allocation5 + $0x454] sm:$0xf0]  ;;  %v5687_v63 = vor.u32 %v6830_v52, %v5684_v53  ;;  %v6733_v49 = vld [vmem:[#allocation5 + $0x4a8] sm:$0xf0]  ;;  %v4790_v52 = vld [vmem:[#allocation5 + $0xb0] sm:$0xf] }
 0x125   : > { %2673 = vmatpush.bf16.msrb.mxu1 %v4707_v16  ;;  %v2467_v4 = vpop.f32.mrf.mxu1  ;;  %v2455_v10 = vadd.f32 %v2454_v3, %v7925_v14  ;;  %v5564_v16 = vld [vmem:[#allocation5 + $0x6d4] sm:$0xf0]  ;;  %v4850_v3 = vld [vmem:[#allocation5 + $0x128] sm:$0xf]  ;;  %v6608_v53 = vld [vmem:[#allocation5 + $0xc0] sm:$0xf0] }
 0x126   : > { %2686 = vmatpush.bf16.msrb.mxu2 %v4867_v17  ;;  %v6840_v17 = vld [vmem:[#allocation5 + $0x804] sm:$0xf] }
 0x127   : > { %2699 = vmatpush.bf16.msrb.mxu3 %v5027_v24  ;;  %2661 = vmatmul.bf16.vlgmr.msrb.gmra.mxu0 %v7900_v37  ;;  %v2468_v23 = vadd.f32 %v2467_v4, %v2455_v10  ;;  %v5247_v24 = vor.u32 %v6720_v7, %v5244_v8  ;;  %v5727_v14 = vor.u32 %v6840_v17, %v5724_v20  ;;  %v6623_v4 = vld [vmem:[#allocation5 + $0x138] sm:$0xf0]  ;;  %v5170_v8 = vld [vmem:[#allocation5 + $0x3a8] sm:$0xf] }
 0x128   : > { %2705 = vmatpush.bf16.msra.mxu0 %v5327_v25  ;;  %2674 = vmatmul.bf16.vlgmr.msrb.gmra.mxu1 %v7888_v19  ;;  %v5407_v25 = vor.u32 %v6760_v9, %v5404_v12  ;;  %v6663_v7 = vld [vmem:[#allocation5 + $0x278] sm:$0xf0]  ;;  %v5330_v12 = vld [vmem:[#allocation5 + $0x4e8] sm:$0xf]  ;;  %v4851_v17 = vor.u32 %v6623_v4, %v4850_v3 }
 0x129   : > { %2718 = vmatpush.bf16.msra.mxu1 %v5487_v26  ;;  %2687 = vmatmul.bf16.vlgmr.msrb.gmra.mxu2 %v7890_v21  ;;  %v5567_v26 = vor.u32 %v6800_v13, %v5564_v16  ;;  %v6703_v9 = vld [vmem:[#allocation5 + $0x3b8] sm:$0xf0]  ;;  %v4770_v3 = vld [vmem:[#allocation5 + $0x88] sm:$0xf] }
 0x12a   : > { %2731 = vmatpush.bf16.msra.mxu2 %v5647_v27  ;;  %2700 = vmatmul.bf16.vlgmr.msrb.gmra.mxu3 %v7886_v18  ;;  %v6715_v27 = vld [vmem:[#allocation5 + $0x41c] sm:$0xf] }
 0x12b   : > { %2744 = vmatpush.bf16.msra.mxu3 %v5807_v31  ;;  %v5384_v31 = vld [vmem:[#allocation5 + $0x56c] sm:$0xf0]  ;;  %v5227_v38 = vor.u32 %v6715_v27, %v5224_v28  ;;  %v6743_v13 = vld [vmem:[#allocation5 + $0x4f8] sm:$0xf0]  ;;  %v6658_v28 = vld [vmem:[#allocation5 + $0x250] sm:$0xf0] }
 0x12c   : > { %2706 = vmatpush.bf16.msra.mxu0 %v5307_v39  ;;  %v2480_v30 = vpop.f32.mrf.mxu2  ;;  %v2456_v39 = vpop.f32.mrf.mxu0  ;;  %v5331_v27 = vor.u32 %v6743_v13, %v5330_v12  ;;  %v6603_v4 = vld [vmem:[#allocation5 + $0x98] sm:$0xf0]  ;;  %v5250_v12 = vld [vmem:[#allocation5 + $0x448] sm:$0xf] }
 0x12d   : > { %2719 = vmatpush.bf16.msra.mxu1 %v5467_v42  ;;  %v7932_v34 = vadd.f32 %v2480_v30, %v2468_v23  ;;  %v2469_v42 = vpop.f32.mrf.mxu1  ;;  %v5171_v23 = vor.u32 %v6703_v9, %v5170_v8  ;;  %v6698_v30 = vld [vmem:[#allocation5 + $0x390] sm:$0xf0]  ;;  %v6613_v39 = vld [vmem:[#allocation5 + $0xe8] sm:$0xf0]  ;;  %v6643_v9 = vld [vmem:[#allocation5 + $0x1d8] sm:$0xf0] }
 0x12e   : > { %2732 = vmatpush.bf16.msra.mxu2 %v5627_v43  ;;  %v5387_v43 = vor.u32 %v6755_v29, %v5384_v31  ;;  %v5150_v29 = vld [vmem:[#allocation5 + $0x380] sm:$0xf]  ;;  %v6738_v31 = vld [vmem:[#allocation5 + $0x4d0] sm:$0xf0]  ;;  %v4970_v42 = vld [vmem:[#allocation5 + $0x218] sm:$0xf]  ;;  %v4811_v50 = vor.u32 %v6613_v39, %v4810_v33 }
 0x12f   : > { %2745 = vmatpush.bf16.msra.mxu3 %v5787_v48  ;;  %v5707_v48 = vor.u32 %v6835_v35, %v5704_v36  ;;  %v2493_v35 = vpop.f32.mrf.mxu3  ;;  %v6723_v13 = vld [vmem:[#allocation5 + $0x458] sm:$0xf0]  ;;  %v6718_v33 = vld [vmem:[#allocation5 + $0x430] sm:$0xf0] }
 0x130   : > { %2707 = vmatpush.bf16.msra.mxu0 %v5287_v54  ;;  %v5207_v54 = vor.u32 %v6710_v45, %v5204_v46  ;;  %v6653_v45 = vld [vmem:[#allocation5 + $0x228] sm:$0xf0]  ;;  %v5130_v46 = vld [vmem:[#allocation5 + $0x358] sm:$0xf] }
 0x131   : > { %2720 = vmatpush.bf16.msra.mxu1 %v5447_v55  ;;  %v6705_v55 = vld [vmem:[#allocation5 + $0x3cc] sm:$0xf]  ;;  %v5131_v51 = vor.u32 %v6693_v47, %v5130_v46 }
 0x132   : > { %2733 = vmatpush.bf16.msra.mxu2 %v5607_v56  ;;  %v5184_v56 = vld [vmem:[#allocation5 + $0x3dc] sm:$0xf0] }
 0x133   : > { %2746 = vmatpush.bf16.msra.mxu3 %v5767_v60  ;;  %v5344_v60 = vld [vmem:[#allocation5 + $0x51c] sm:$0xf0] }
 0x134   : > { %2708 = vmatpush.bf16.msra.mxu0 %v5267_v2  ;;  %v2482_v62 = vpop.f32.mrf.mxu2  ;;  %v5664_v2 = vld [vmem:[#allocation5 + $0x79c] sm:$0xf0]  ;;  %v5347_v10 = vor.u32 %v6745_v59, %v5344_v60  ;;  %v6688_v59 = vld [vmem:[#allocation5 + $0x340] sm:$0xf0]  ;;  %v5270_v60 = vld [vmem:[#allocation5 + $0x470] sm:$0xf] }
 0x135   : > { %2721 = vmatpush.bf16.msra.mxu1 %v5427_v5  ;;  %v5010_v5 = vld [vmem:[#allocation5 + $0x268] sm:$0xf]  ;;  %v5667_v16 = vor.u32 %v6825_v1, %v5664_v2  ;;  %v4791_v62 = vor.u32 %v6608_v53, %v4790_v52  ;;  %v4710_v53 = vld [vmem:[#allocation5 + $0x10] sm:$0xf] }
 0x136   : > { %2734 = vmatpush.bf16.msra.mxu2 %v5587_v6  ;;  %v5187_v6 = vor.u32 %v6705_v55, %v5184_v56  ;;  %v5011_v20 = vor.u32 %v6663_v7, %v5010_v5  ;;  %v4930_v5 = vld [vmem:[#allocation5 + $0x1c8] sm:$0xf] }
 0x137   : > { %2747 = vmatpush.bf16.msra.mxu3 %v5747_v11  ;;  %v5507_v11 = vor.u32 %v6785_v61, %v5504_v0  ;;  %v6728_v61 = vld [vmem:[#allocation5 + $0x480] sm:$0xf0]  ;;  %v2495_v7 = vpop.f32.mrf.mxu3 }
 0x138   : > { %2709 = vmatpush.bf16.msra.mxu0 %v5247_v24  ;;  %v4830_v24 = vld [vmem:[#allocation5 + $0x100] sm:$0xf]  ;;  %v5271_v8 = vor.u32 %v6728_v61, %v5270_v60  ;;  %v6863_v7 = vld [vmem:[#allocation5 + $0x8b8] sm:$0xf0] }
 0x139   : > { %2722 = vmatpush.bf16.msra.mxu1 %v5407_v25  ;;  %v6618_v25 = vld [vmem:[#allocation5 + $0x110] sm:$0xf0] }
 0x13a   : > { %2735 = vmatpush.bf16.msra.mxu2 %v5567_v26  ;;  %v4990_v26 = vld [vmem:[#allocation5 + $0x240] sm:$0xf]  ;;  %v4831_v32 = vor.u32 %v6618_v25, %v4830_v24  ;;  %v6598_v25 = vld [vmem:[#allocation5 + $0x70] sm:$0xf0] }
 0x13b   : > { %2748 = vmatpush.bf16.msra.mxu3 %v5727_v14  ;;  %v5310_v14 = vld [vmem:[#allocation5 + $0x4c0] sm:$0xf]  ;;  %v4991_v36 = vor.u32 %v6658_v28, %v4990_v26  ;;  %v5251_v28 = vor.u32 %v6723_v13, %v5250_v12 }
 0x13c   : > { %2710 = vmatpush.bf16.msra.mxu0 %v5227_v38  ;;  %v5151_v38 = vor.u32 %v6698_v30, %v5150_v29  ;;  %v4750_v24 = vld [vmem:[#allocation5 + $0x60] sm:$0xf]  ;;  %v6638_v29 = vld [vmem:[#allocation5 + $0x1b0] sm:$0xf0] }
 0x13d   : > { %2723 = vmatpush.bf16.msra.mxu1 %v5387_v43  ;;  %v903_v43 = vperm.slane %v7922_v15, 1  ;;  %v4971_v15 = vor.u32 %v6653_v45, %v4970_v42  ;;  %v4910_v26 = vld [vmem:[#allocation5 + $0x1a0] sm:$0xf]  ;;  %v4890_v45 = vld [vmem:[#allocation5 + $0x178] sm:$0xf] }
 0x13e   : > { %2736 = vmatpush.bf16.msra.mxu2 %v5547_v44  ;;  %v5311_v44 = vor.u32 %v6738_v31, %v5310_v14  ;;  %v5070_v30 = vld [vmem:[#allocation5 + $0x2e0] sm:$0xf]  ;;  %v6678_v14 = vld [vmem:[#allocation5 + $0x2f0] sm:$0xf0]  ;;  %v4911_v39 = vor.u32 %v6638_v29, %v4910_v26 }
 0x13f   : > { %2749 = vmatpush.bf16.msra.mxu3 %v5707_v48  ;;  %v5290_v48 = vld [vmem:[#allocation5 + $0x498] sm:$0xf]  ;;  %v2494_v55 = vadd.f32 %v2493_v35, %v903_v43  ;;  %v4751_v35 = vor.u32 %v6598_v25, %v4750_v24  ;;  %v5071_v42 = vor.u32 %v6678_v14, %v5070_v30  ;;  %v6778_v24 = vld [vmem:[#allocation5 + $0x610] sm:$0xf0]  ;;  %v5630_v25 = vld [vmem:[#allocation5 + $0x740] sm:$0xf] }
 0x140   : > { %2711 = vmatpush.bf16.msra.mxu0 %v5207_v54  ;;  %v4950_v54 = vld [vmem:[#allocation5 + $0x1f0] sm:$0xf]  ;;  %v5291_v56 = vor.u32 %v6733_v49, %v5290_v48  ;;  %v4730_v43 = vld [vmem:[#allocation5 + $0x38] sm:$0xf]  ;;  %v6633_v48 = vld [vmem:[#allocation5 + $0x188] sm:$0xf0] }
 0x141   : > { %2724 = vmatpush.bf16.msra.mxu1 %v5367_v57  ;;  %v6648_v57 = vld [vmem:[#allocation5 + $0x200] sm:$0xf0]  ;;  %v5050_v49 = vld [vmem:[#allocation5 + $0x2b8] sm:$0xf]  ;;  %v6858_v29 = vld [vmem:[#allocation5 + $0x890] sm:$0xf0] }
 0x142   : > { %2737 = vmatpush.bf16.msra.mxu2 %v5527_v58  ;;  %v5110_v58 = vld [vmem:[#allocation5 + $0x330] sm:$0xf]  ;;  %v4951_v1 = vor.u32 %v6648_v57, %v4950_v54  ;;  %v6588_v54 = vld [vmem:[#allocation5 + $0x20] sm:$0xf0]  ;;  %v5886_v30 = vld [vmem:[#allocation8 + $0x90] sm:$0xf] }
 0x143   : > { %2750 = vmatpush.bf16.msra.mxu3 %v5687_v63  ;;  %v5111_v2 = vor.u32 %v6688_v59, %v5110_v58  ;;  %v4870_v57 = vld [vmem:[#allocation5 + $0x150] sm:$0xf]  ;;  %v6628_v58 = vld [vmem:[#allocation5 + $0x160] sm:$0xf0] }
 0x144   : > { %2712 = vmatpush.bf16.msra.mxu0 %v5187_v6  ;;  %v2506_v63 = vpop.f32.mrf.mxu0  ;;  %v5030_v59 = vld [vmem:[#allocation5 + $0x290] sm:$0xf]  ;;  %v6883_v14 = vld [vmem:[#allocation8 + $0x98] sm:$0xf0] }
 0x145   : > { %2725 = vmatpush.bf16.msra.mxu1 %v5347_v10  ;;  %v2519_v0 = vpop.f32.mrf.mxu1  ;;  %v2507_v6 = vadd.f32 %v2506_v63, %v2494_v55  ;;  %v5090_v10 = vld [vmem:[#allocation5 + $0x308] sm:$0xf]  ;;  %v4891_v55 = vor.u32 %v6633_v48, %v4890_v45  ;;  %v5190_v63 = vld [vmem:[#allocation5 + $0x3d0] sm:$0xf]  ;;  %v6853_v45 = vld [vmem:[#allocation5 + $0x868] sm:$0xf0] }
 0x146   : > { %2738 = vmatpush.bf16.msra.mxu2 %v5507_v11  ;;  %v6683_v11 = vld [vmem:[#allocation5 + $0x318] sm:$0xf0]  ;;  %v6880_v48 = vld [vmem:[#allocation8 + $0x80] sm:$0xf0] }
 0x147   : > { %2751 = vmatpush.bf16.msra.mxu3 %v5667_v16  ;;  %2713 = vmatmul.bf16.vlgmr.msra.gmra.mxu0 %v7892_v22  ;;  %v2520_v16 = vadd.f32 %v2519_v0, %v2507_v6  ;;  %v6708_v0 = vld [vmem:[#allocation5 + $0x3e0] sm:$0xf0]  ;;  %v5810_v6 = vld [vmem:[#allocation5 + $0x8a8] sm:$0xf] }
 0x148   : > { %2757 = vmatpush.bf16.msrb.mxu0 %v4851_v17  ;;  %2726 = vmatmul.bf16.vlgmr.msra.gmra.mxu1 %v7902_v40  ;;  %v4771_v17 = vor.u32 %v6603_v4, %v4770_v3  ;;  %v5650_v3 = vld [vmem:[#allocation5 + $0x768] sm:$0xf]  ;;  %v4711_v4 = vor.u32 %v6588_v54, %v4710_v53  ;;  %v5191_v13 = vor.u32 %v6708_v0, %v5190_v63  ;;  %v6808_v54 = vld [vmem:[#allocation5 + $0x700] sm:$0xf0] }
 0x149   : > { %2770 = vmatpush.bf16.msrb.mxu1 %v5011_v20  ;;  %2739 = vmatmul.bf16.vlgmr.msra.gmra.mxu2 %v7904_v41  ;;  %v4931_v20 = vor.u32 %v6643_v9, %v4930_v5  ;;  %v6823_v5 = vld [vmem:[#allocation5 + $0x778] sm:$0xf0]  ;;  %v5570_v63 = vld [vmem:[#allocation5 + $0x6c8] sm:$0xf] }
 0x14a   : > { %2783 = vmatpush.bf16.msrb.mxu2 %v5171_v23  ;;  %2752 = vmatmul.bf16.vlgmr.msra.gmra.mxu3 %v7900_v37  ;;  %v5091_v23 = vor.u32 %v6683_v11, %v5090_v10  ;;  %v5898_v10 = vld [vmem:[#allocation8 + $0xa8] sm:$0xf]  ;;  %v6886_v11 = vld [vmem:[#allocation8 + $0xb0] sm:$0xf0] }
 0x14b   : > { %2796 = vmatpush.bf16.msrb.mxu3 %v5331_v27  ;;  %v5899_v26 = vor.u32 %v6886_v11, %v5898_v10  ;;  %v6758_v10 = vld [vmem:[#allocation5 + $0x570] sm:$0xf0]  ;;  %v5550_v11 = vld [vmem:[#allocation5 + $0x6a0] sm:$0xf] }
 0x14c   : > { %2758 = vmatpush.bf16.msrb.mxu0 %v4831_v32  ;;  %v2532_v27 = vpop.f32.mrf.mxu2  ;;  %v5230_v32 = vld [vmem:[#allocation5 + $0x420] sm:$0xf] }
 0x14d   : > { %2771 = vmatpush.bf16.msrb.mxu1 %v4991_v36  ;;  %v7939_v31 = vadd.f32 %v2532_v27, %v2520_v16  ;;  %v2508_v36 = vpop.f32.mrf.mxu0  ;;  %v7941_v46 = vpop.f32.mrf.mxu3  ;;  %v5231_v47 = vor.u32 %v6718_v33, %v5230_v32  ;;  %v6818_v27 = vld [vmem:[#allocation5 + $0x750] sm:$0xf0] }
 0x14e   : > { %2784 = vmatpush.bf16.msrb.mxu2 %v5151_v38  ;;  %v2521_v38 = vpop.f32.mrf.mxu1  ;;  %v5631_v33 = vor.u32 %v6818_v27, %v5630_v25  ;;  %v5450_v36 = vld [vmem:[#allocation5 + $0x5d8] sm:$0xf] }
 0x14f   : > { %2797 = vmatpush.bf16.msrb.mxu3 %v5311_v44  ;;  %v6593_v44 = vld [vmem:[#allocation5 + $0x48] sm:$0xf0] }
 0x150   : > { %2759 = vmatpush.bf16.msrb.mxu0 %v4811_v50  ;;  %v6673_v50 = vld [vmem:[#allocation5 + $0x2c8] sm:$0xf0]  ;;  %v4731_v52 = vor.u32 %v6593_v44, %v4730_v43  ;;  %v5770_v44 = vld [vmem:[#allocation5 + $0x858] sm:$0xf] }
 0x151   : > { %2772 = vmatpush.bf16.msrb.mxu1 %v4971_v15  ;;  %v5210_v15 = vld [vmem:[#allocation5 + $0x3f8] sm:$0xf]  ;;  %v6773_v38 = vld [vmem:[#allocation5 + $0x5e8] sm:$0xf0] }
 0x152   : > { %2785 = vmatpush.bf16.msrb.mxu2 %v5131_v51  ;;  %v6713_v51 = vld [vmem:[#allocation5 + $0x408] sm:$0xf0] }
 0x153   : > { %2798 = vmatpush.bf16.msrb.mxu3 %v5291_v56  ;;  %v5051_v56 = vor.u32 %v6673_v50, %v5050_v49  ;;  %v5211_v61 = vor.u32 %v6713_v51, %v5210_v15  ;;  %v6813_v43 = vld [vmem:[#allocation5 + $0x728] sm:$0xf0]  ;;  %v5451_v49 = vor.u32 %v6773_v38, %v5450_v36  ;;  %v5771_v15 = vor.u32 %v6853_v45, %v5770_v44  ;;  %v5430_v51 = vld [vmem:[#allocation5 + $0x5b0] sm:$0xf]  ;;  %v5690_v38 = vld [vmem:[#allocation5 + $0x7b8] sm:$0xf] }
 0x154   : > { %2760 = vmatpush.bf16.msrb.mxu0 %v4791_v62  ;;  %v2534_v60 = vpop.f32.mrf.mxu2  ;;  %v6668_v62 = vld [vmem:[#allocation5 + $0x2a0] sm:$0xf0]  ;;  %v6793_v36 = vld [vmem:[#allocation5 + $0x688] sm:$0xf0]  ;;  %v5350_v45 = vld [vmem:[#allocation5 + $0x510] sm:$0xf] }
 0x155   : > { %2773 = vmatpush.bf16.msrb.mxu1 %v4951_v1  ;;  %v5490_v1 = vld [vmem:[#allocation5 + $0x628] sm:$0xf]  ;;  %v5031_v9 = vor.u32 %v6668_v62, %v5030_v59  ;;  %v2547_v12 = vpop.f32.mrf.mxu3  ;;  %v6763_v62 = vld [vmem:[#allocation5 + $0x598] sm:$0xf0] }
 0x156   : > { %2786 = vmatpush.bf16.msrb.mxu2 %v5111_v2  ;;  %v6783_v2 = vld [vmem:[#allocation5 + $0x638] sm:$0xf0] }
 0x157   : > { %2799 = vmatpush.bf16.msrb.mxu3 %v5271_v8  ;;  %v4871_v8 = vor.u32 %v6628_v58, %v4870_v57  ;;  %v5491_v16 = vor.u32 %v6783_v2, %v5490_v1  ;;  %v5862_v57 = vld [vmem:[#allocation8 + $0x60] sm:$0xf]  ;;  %v6803_v1 = vld [vmem:[#allocation5 + $0x6d8] sm:$0xf0] }
 0x158   : > { %2761 = vmatpush.bf16.msrb.mxu0 %v4771_v17  ;;  %v5651_v17 = vor.u32 %v6823_v5, %v5650_v3  ;;  %v5730_v2 = vld [vmem:[#allocation5 + $0x808] sm:$0xf]  ;;  %v6843_v3 = vld [vmem:[#allocation5 + $0x818] sm:$0xf0] }
 0x159   : > { %2774 = vmatpush.bf16.msrb.mxu1 %v4931_v20  ;;  %v5811_v20 = vor.u32 %v6863_v7, %v5810_v6  ;;  %v6874_v5 = vld [vmem:[#allocation8 + $0x50] sm:$0xf0]  ;;  %v5571_v7 = vor.u32 %v6803_v1, %v5570_v63  ;;  %v6186_v1 = vld [vmem:[#allocation8 + $0x2e8] sm:$0xf] }
 0x15a   : > { %2787 = vmatpush.bf16.msrb.mxu2 %v5091_v23  ;;  %v5470_v23 = vld [vmem:[#allocation5 + $0x600] sm:$0xf] }
 0x15b   : > { %2800 = vmatpush.bf16.msrb.mxu3 %v5251_v28  ;;  %v5790_v28 = vld [vmem:[#allocation5 + $0x880] sm:$0xf]  ;;  %v5471_v32 = vor.u32 %v6778_v24, %v5470_v23  ;;  %v5838_v23 = vld [vmem:[#allocation8 + $0x30] sm:$0xf] }
 0x15c   : > { %2762 = vmatpush.bf16.msrb.mxu0 %v4751_v35  ;;  %v5791_v35 = vor.u32 %v6858_v29, %v5790_v28  ;;  %v6871_v24 = vld [vmem:[#allocation8 + $0x38] sm:$0xf0] }
 0x15d   : > { %2775 = vmatpush.bf16.msrb.mxu1 %v4911_v39  ;;  %v5610_v39 = vld [vmem:[#allocation5 + $0x718] sm:$0xf] }
 0x15e   : > { %2788 = vmatpush.bf16.msrb.mxu2 %v5071_v42  ;;  %v5887_v42 = vor.u32 %v6883_v14, %v5886_v30  ;;  %v5611_v50 = vor.u32 %v6813_v43, %v5610_v39  ;;  %v5370_v14 = vld [vmem:[#allocation5 + $0x538] sm:$0xf]  ;;  %v6833_v39 = vld [vmem:[#allocation5 + $0x7c8] sm:$0xf0] }
 0x15f   : > { %2801 = vmatpush.bf16.msrb.mxu3 %v5231_v47  ;;  %v5874_v47 = vld [vmem:[#allocation8 + $0x78] sm:$0xf]  ;;  %v6868_v43 = vld [vmem:[#allocation8 + $0x20] sm:$0xf0] }
 0x160   : > { %2763 = vmatpush.bf16.msrb.mxu0 %v4731_v52  ;;  %v6768_v52 = vld [vmem:[#allocation5 + $0x5c0] sm:$0xf0]  ;;  %v5875_v53 = vor.u32 %v6880_v48, %v5874_v47  ;;  %v5691_v48 = vor.u32 %v6833_v39, %v5690_v38  ;;  %v6949_v38 = vld [vmem:[#allocation8 + $0x2a8] sm:$0xf0] }
 0x161   : > { %2776 = vmatpush.bf16.msrb.mxu1 %v4891_v55  ;;  %v5750_v55 = vld [vmem:[#allocation5 + $0x830] sm:$0xf] }
 0x162   : > { %2789 = vmatpush.bf16.msrb.mxu2 %v5051_v56  ;;  %v6848_v56 = vld [vmem:[#allocation5 + $0x840] sm:$0xf0] }
 0x163   : > { %2802 = vmatpush.bf16.msrb.mxu3 %v5211_v61  ;;  %v5751_v60 = vor.u32 %v6848_v56, %v5750_v55  ;;  %v5410_v61 = vld [vmem:[#allocation5 + $0x588] sm:$0xf]  ;;  %v6865_v55 = vld [vmem:[#allocation8 + $0x8] sm:$0xf0]  ;;  %v5994_v56 = vld [vmem:[#allocation8 + $0x168] sm:$0xf] }
 0x164   : > { %2764 = vmatpush.bf16.msrb.mxu0 %v4711_v4  ;;  %v7947_v58 = vpop.f32.mrf.mxu0  ;;  %v5850_v4 = vld [vmem:[#allocation8 + $0x48] sm:$0xf]  ;;  %v5411_v6 = vor.u32 %v6763_v62, %v5410_v61 }
 0x165   : > { %2777 = vmatpush.bf16.msrb.mxu1 %v4871_v8  ;;  %v7949_v59 = vpop.f32.mrf.mxu1  ;;  %v5731_v8 = vor.u32 %v6843_v3, %v5730_v2  ;;  %v5851_v12 = vor.u32 %v6874_v5, %v5850_v4  ;;  %v6958_v2 = vld [vmem:[#allocation8 + $0x2f0] sm:$0xf0]  ;;  %v2848_v3 = vmax.f32 %v7932_v34, 0.0  ;;  %v5982_v5 = vld [vmem:[#allocation8 + $0x150] sm:$0xf] }
 0x166   : > { %2790 = vmatpush.bf16.msrb.mxu2 %v5031_v9  ;;  %v5390_v9 = vld [vmem:[#allocation5 + $0x560] sm:$0xf] }
 0x167   : > { %2803 = vmatpush.bf16.msrb.mxu3 %v5191_v13  ;;  %2765 = vmatmul.bf16.vlgmr.msrb.gmra.mxu0 %v7888_v19  ;;  %v6877_v19 = vld [vmem:[#allocation8 + $0x68] sm:$0xf0]  ;;  %v5391_v27 = vor.u32 %v6758_v10, %v5390_v9  ;;  %v6187_v9 = vor.u32 %v6958_v2, %v6186_v1  ;;  %v5922_v1 = vld [vmem:[#allocation8 + $0xd8] sm:$0xf]  ;;  %v6892_v2 = vld [vmem:[#allocation8 + $0xe0] sm:$0xf0] }
 0x168   : > { %2809 = vmatpush.bf16.msra.mxu0 %v5491_v16  ;;  %2778 = vmatmul.bf16.vlgmr.msrb.gmra.mxu1 %v7890_v21  ;;  %v5431_v21 = vor.u32 %v6768_v52, %v5430_v51  ;;  %v5863_v0 = vor.u32 %v6877_v19, %v5862_v57  ;;  %v6798_v13 = vld [vmem:[#allocation5 + $0x6b0] sm:$0xf0]  ;;  %v5710_v16 = vld [vmem:[#allocation5 + $0x7e0] sm:$0xf]  ;;  %v5670_v52 = vld [vmem:[#allocation5 + $0x790] sm:$0xf] }
 0x169   : > { %2822 = vmatpush.bf16.msra.mxu1 %v5651_v17  ;;  %2791 = vmatmul.bf16.vlgmr.msrb.gmra.mxu2 %v7886_v18  ;;  %v5590_v18 = vld [vmem:[#allocation5 + $0x6f0] sm:$0xf]  ;;  %v6838_v17 = vld [vmem:[#allocation5 + $0x7f0] sm:$0xf0]  ;;  %v5551_v29 = vor.u32 %v6798_v13, %v5550_v11  ;;  %v6910_v57 = vld [vmem:[#allocation8 + $0x170] sm:$0xf0]  ;;  %v7956_v13 = vpack.c.bf16 %v2848_v3, %v2848_v3 }
 0x16a   : > { %2835 = vmatpush.bf16.msra.mxu2 %v5811_v20  ;;  %2804 = vmatmul.bf16.vlgmr.msrb.gmra.mxu3 %v7892_v22  ;;  %v5591_v22 = vor.u32 %v6808_v54, %v5590_v18  ;;  %v5711_v30 = vor.u32 %v6838_v17, %v5710_v16  ;;  %v6828_v18 = vld [vmem:[#allocation5 + $0x7a0] sm:$0xf0]  ;;  %v6174_v11 = vld [vmem:[#allocation8 + $0x2d0] sm:$0xf]  ;;  %v5970_v16 = vld [vmem:[#allocation8 + $0x138] sm:$0xf] }
 0x16b   : > { %3666 = vmatpush.bf16.msra.mxu3 %v5899_v26  ;;  %v5671_v62 = vor.u32 %v6828_v18, %v5670_v52  ;;  %v6904_v17 = vld [vmem:[#allocation8 + $0x140] sm:$0xf0]  ;;  %v6946_v52 = vld [vmem:[#allocation8 + $0x290] sm:$0xf0]  ;;  %v2546_v18 = vadd.f32 %v7941_v46, %v7939_v31 }
 0x16c   : > { %2810 = vmatpush.bf16.msra.mxu0 %v5471_v32  ;;  %v7951_v20 = vpop.f32.mrf.mxu2  ;;  %v2560_v26 = vpop.f32.mrf.mxu0  ;;  %v6753_v32 = vld [vmem:[#allocation5 + $0x548] sm:$0xf0] }
 0x16d   : > { %2823 = vmatpush.bf16.msra.mxu1 %v5631_v33  ;;  %v7953_v25 = vpop.f32.mrf.mxu3  ;;  %v2573_v28 = vpop.f32.mrf.mxu1  ;;  %v5530_v33 = vld [vmem:[#allocation5 + $0x678] sm:$0xf]  ;;  %v5371_v44 = vor.u32 %v6753_v32, %v5370_v14  ;;  %v6901_v14 = vld [vmem:[#allocation8 + $0x128] sm:$0xf0]  ;;  %v6054_v32 = vld [vmem:[#allocation8 + $0x1e0] sm:$0xf]  ;;  %v2559_v31 = vadd.f32 %v7947_v58, %v2546_v18 }
 0x16e   : > { %2836 = vmatpush.bf16.msra.mxu2 %v5791_v35  ;;  %v5839_v35 = vor.u32 %v6871_v24, %v5838_v23  ;;  %v5531_v47 = vor.u32 %v6793_v36, %v5530_v33  ;;  %v6066_v23 = vld [vmem:[#allocation8 + $0x1f8] sm:$0xf]  ;;  %v6928_v24 = vld [vmem:[#allocation8 + $0x200] sm:$0xf0]  ;;  %v6925_v33 = vld [vmem:[#allocation8 + $0x1e8] sm:$0xf0] }
 0x16f   : > { %3667 = vmatpush.bf16.msra.mxu3 %v5887_v42  ;;  %v5826_v42 = vld [vmem:[#allocation8 + $0x18] sm:$0xf]  ;;  %v6150_v36 = vld [vmem:[#allocation8 + $0x2a0] sm:$0xf]  ;;  %v6055_v39 = vor.u32 %v6925_v33, %v6054_v32  ;;  %v6879_v18 = vld [vmem:[#allocation8 + $0x7c] sm:$0xf] }
 0x170   : > { %2811 = vmatpush.bf16.msra.mxu0 %v5451_v49  ;;  %v6748_v49 = vld [vmem:[#allocation5 + $0x520] sm:$0xf0]  ;;  %v5827_v51 = vor.u32 %v6868_v43, %v5826_v42  ;;  %v6162_v28 = vld [vmem:[#allocation8 + $0x2b8] sm:$0xf]  ;;  %v5946_v42 = vld [vmem:[#allocation8 + $0x108] sm:$0xf] }
 0x171   : > { %2824 = vmatpush.bf16.msra.mxu1 %v5611_v50  ;;  %v5510_v50 = vld [vmem:[#allocation5 + $0x650] sm:$0xf]  ;;  %v6898_v43 = vld [vmem:[#allocation8 + $0x110] sm:$0xf0]  ;;  %v5910_v58 = vld [vmem:[#allocation8 + $0xc0] sm:$0xf] }
 0x172   : > { %2837 = vmatpush.bf16.msra.mxu2 %v5771_v15  ;;  %v6788_v15 = vld [vmem:[#allocation5 + $0x660] sm:$0xf0] }
 0x173   : > { %3668 = vmatpush.bf16.msra.mxu3 %v5875_v53  ;;  %v5814_v53 = vld [vmem:[#allocation8] sm:$0xf]  ;;  %v5511_v61 = vor.u32 %v6788_v15, %v5510_v50  ;;  %v5947_v15 = vor.u32 %v6898_v43, %v5946_v42  ;;  %v6906_v42 = vld [vmem:[#allocation8 + $0x154] sm:$0xf] }
 0x174   : > { %2812 = vmatpush.bf16.msra.mxu0 %v5431_v21  ;;  %v2586_v54 = vpop.f32.mrf.mxu2  ;;  %v5351_v21 = vor.u32 %v6748_v49, %v5350_v45  ;;  %v5815_v63 = vor.u32 %v6865_v55, %v5814_v53  ;;  %v6042_v45 = vld [vmem:[#allocation8 + $0x1c8] sm:$0xf]  ;;  %v7966_v49 = vld [vmem:[#allocation7] sm:$0x1f]  ;;  %v5984_v43 = vld [vmem:[#allocation8 + $0x15c] sm:$0xf0] }
 0x175   : > { %2825 = vmatpush.bf16.msra.mxu1 %v5591_v22  ;;  %v2599_v19 = vpop.f32.mrf.mxu3  ;;  %v6090_v22 = vld [vmem:[#allocation8 + $0x228] sm:$0xf]  ;;  %v904_v50 = vperm.slane %v7966_v49, 2  ;;  %v5934_v54 = vld [vmem:[#allocation8 + $0xf0] sm:$0xf] }
 0x176   : > { %2838 = vmatpush.bf16.msra.mxu2 %v5751_v60  ;;  %v6934_v60 = vld [vmem:[#allocation8 + $0x230] sm:$0xf0]  ;;  %v6895_v55 = vld [vmem:[#allocation8 + $0xf8] sm:$0xf0] }
 0x177   : > { %3669 = vmatpush.bf16.msra.mxu3 %v5863_v0  ;;  %v5995_v0 = vor.u32 %v6910_v57, %v5994_v56  ;;  %v6091_v4 = vor.u32 %v6934_v60, %v6090_v22  ;;  %v6030_v57 = vld [vmem:[#allocation8 + $0x1b0] sm:$0xf]  ;;  %v6919_v19 = vld [vmem:[#allocation8 + $0x1b8] sm:$0xf0]  ;;  %v2585_v60 = vadd.f32 %v7951_v20, %v904_v50  ;;  %v5923_v20 = vor.u32 %v6892_v2, %v5922_v1 }
 0x178   : > { %2813 = vmatpush.bf16.msra.mxu0 %v5411_v6  ;;  %v6907_v6 = vld [vmem:[#allocation8 + $0x158] sm:$0xf0]  ;;  %v6031_v46 = vor.u32 %v6919_v19, %v6030_v57 }
 0x179   : > { %2826 = vmatpush.bf16.msra.mxu1 %v5571_v7  ;;  %v6078_v7 = vld [vmem:[#allocation8 + $0x210] sm:$0xf]  ;;  %v5983_v10 = vor.u32 %v6907_v6, %v5982_v5  ;;  %v6916_v5 = vld [vmem:[#allocation8 + $0x1a0] sm:$0xf0] }
 0x17a   : > { %2839 = vmatpush.bf16.msra.mxu2 %v5731_v8  ;;  %v6931_v8 = vld [vmem:[#allocation8 + $0x218] sm:$0xf0] }
 0x17b   : > { %3670 = vmatpush.bf16.msra.mxu3 %v5851_v12  ;;  %v6955_v12 = vld [vmem:[#allocation8 + $0x2d8] sm:$0xf0]  ;;  %v6079_v34 = vor.u32 %v6931_v8, %v6078_v7  ;;  %v2598_v7 = vadd.f32 %v7953_v25, %v2585_v60  ;;  %v6114_v8 = vld [vmem:[#allocation8 + $0x258] sm:$0xf]  ;;  %v6068_v60 = vld [vmem:[#allocation8 + $0x204] sm:$0xf0] }
 0x17c   : > { %2814 = vmatpush.bf16.msra.mxu0 %v5391_v27  ;;  %v6175_v26 = vor.u32 %v6955_v12, %v6174_v11  ;;  %v5971_v27 = vor.u32 %v6904_v17, %v5970_v16  ;;  %v6889_v12 = vld [vmem:[#allocation8 + $0xc8] sm:$0xf0] }
 0x17d   : > { %2827 = vmatpush.bf16.msra.mxu1 %v5551_v29  ;;  %v6952_v29 = vld [vmem:[#allocation8 + $0x2c0] sm:$0xf0]  ;;  %v6913_v17 = vld [vmem:[#allocation8 + $0x188] sm:$0xf0] }
 0x17e   : > { %2840 = vmatpush.bf16.msra.mxu2 %v5711_v30  ;;  %v6067_v30 = vor.u32 %v6928_v24, %v6066_v23  ;;  %v6885_v23 = vld [vmem:[#allocation8 + $0xac] sm:$0xf]  ;;  %v5900_v24 = vld [vmem:[#allocation8 + $0xb4] sm:$0xf0] }
 0x17f   : > { %3671 = vmatpush.bf16.msra.mxu3 %v5839_v35  ;;  %v5903_v33 = vor.u32 %v6885_v23, %v5900_v24  ;;  %v6870_v23 = vld [vmem:[#allocation8 + $0x34] sm:$0xf]  ;;  %v5840_v24 = vld [vmem:[#allocation8 + $0x3c] sm:$0xf0] }
 0x180   : > { %2815 = vmatpush.bf16.msra.mxu0 %v5371_v44 }
 0x181   : > { %2828 = vmatpush.bf16.msra.mxu1 %v5531_v47  ;;  %v6922_v47 = vld [vmem:[#allocation8 + $0x1d0] sm:$0xf0] }
 0x182   : > { %2841 = vmatpush.bf16.msra.mxu2 %v5691_v48  ;;  %v6151_v48 = vor.u32 %v6949_v38, %v6150_v36  ;;  %v6043_v53 = vor.u32 %v6922_v47, %v6042_v45  ;;  %v6882_v38 = vld [vmem:[#allocation8 + $0x94] sm:$0xf] }
 0x183   : > { %3672 = vmatpush.bf16.msra.mxu3 %v5827_v51  ;;  %v6138_v51 = vld [vmem:[#allocation8 + $0x288] sm:$0xf] }
 0x184   : > { %2816 = vmatpush.bf16.msra.mxu0 %v5351_v21  ;;  %v7962_v35 = vpop.f32.mrf.mxu0  ;;  %v6139_v22 = vor.u32 %v6946_v52, %v6138_v51  ;;  %v6080_v51 = vld [vmem:[#allocation8 + $0x21c] sm:$0xf0]  ;;  %v5987_v52 = vor.u32 %v6906_v42, %v5984_v43  ;;  %v6915_v42 = vld [vmem:[#allocation8 + $0x19c] sm:$0xf] }
 0x185   : > { %2829 = vmatpush.bf16.msra.mxu1 %v5511_v61  ;;  %v7964_v44 = vpop.f32.mrf.mxu1  ;;  %v5935_v61 = vor.u32 %v6895_v55, %v5934_v54  ;;  %v6903_v54 = vld [vmem:[#allocation8 + $0x13c] sm:$0xf]  ;;  %v5972_v55 = vld [vmem:[#allocation8 + $0x144] sm:$0xf0] }
 0x186   : > { %2842 = vmatpush.bf16.msra.mxu2 %v5671_v62 }
 0x187   : > { %3673 = vmatpush.bf16.msra.mxu3 %v5815_v63  ;;  %2817 = vmatmul.bf16.vlgmr.msra.gmra.mxu0 %v7902_v40  ;;  %v5958_v40 = vld [vmem:[#allocation8 + $0x120] sm:$0xf]  ;;  %v6126_v63 = vld [vmem:[#allocation8 + $0x270] sm:$0xf] }
 0x188   : > { %3679 = vmatpush.bf16.msrb.mxu0 %v5995_v0  ;;  %2830 = vmatmul.bf16.vlgmr.msra.gmra.mxu1 %v7904_v41  ;;  %v6163_v41 = vor.u32 %v6952_v29, %v6162_v28  ;;  %v6943_v0 = vld [vmem:[#allocation8 + $0x278] sm:$0xf0]  ;;  %v5996_v28 = vld [vmem:[#allocation8 + $0x174] sm:$0xf0]  ;;  %v2611_v29 = vadd.f32 %v7962_v35, %v2598_v7  ;;  %v6873_v7 = vld [vmem:[#allocation8 + $0x4c] sm:$0xf] }
 0x189   : > { %3692 = vmatpush.bf16.msrb.mxu1 %v6091_v4  ;;  %2843 = vmatmul.bf16.vlgmr.msra.gmra.mxu2 %v7900_v37  ;;  %v5959_v37 = vor.u32 %v6901_v14, %v5958_v40  ;;  %v6018_v4 = vld [vmem:[#allocation8 + $0x198] sm:$0xf]  ;;  %v6127_v6 = vor.u32 %v6943_v0, %v6126_v63  ;;  %v6102_v40 = vld [vmem:[#allocation8 + $0x240] sm:$0xf]  ;;  %v5864_v63 = vld [vmem:[#allocation8 + $0x6c] sm:$0xf0] }
 0x18a   : > { %3674 = vmatmul.bf16.vlgmr.msra.gmra.mxu3 %v7956_v13  ;;  %3705 = vmatpush.bf16.msrb.mxu2 %v6187_v9  ;;  %v6940_v9 = vld [vmem:[#allocation8 + $0x260] sm:$0xf0]  ;;  %v6019_v11 = vor.u32 %v6916_v5, %v6018_v4  ;;  %v2624_v47 = vadd.f32 %v7964_v44, %v2611_v29  ;;  %v6056_v4 = vld [vmem:[#allocation8 + $0x1ec] sm:$0xf0] }
 0x18b   : > { %v6115_v25 = vor.u32 %v6940_v9, %v6114_v8  ;;  %v6900_v0 = vld [vmem:[#allocation8 + $0x124] sm:$0xf]  ;;  %v6897_v8 = vld [vmem:[#allocation8 + $0x10c] sm:$0xf]  ;;  %v5948_v9 = vld [vmem:[#allocation8 + $0x114] sm:$0xf0] }
 0x18c   : > { %3680 = vmatpush.bf16.msrb.mxu0 %v5983_v10  ;;  %v7971_v56 = vpop.f32.mrf.mxu2  ;;  %v2612_v62 = vpop.f32.mrf.mxu0  ;;  %v2572_v10 = vadd.f32 %v7949_v59, %v2559_v31  ;;  %v6937_v59 = vld [vmem:[#allocation8 + $0x248] sm:$0xf0]  ;;  %v5960_v31 = vld [vmem:[#allocation8 + $0x12c] sm:$0xf0] }
 0x18d   : > { %3693 = vmatpush.bf16.msrb.mxu1 %v6079_v34  ;;  %v7973_v21 = vpop.f32.mrf.mxu3  ;;  %v2625_v3 = vpop.f32.mrf.mxu1  ;;  %v6006_v34 = vld [vmem:[#allocation8 + $0x180] sm:$0xf]  ;;  %v6103_v45 = vor.u32 %v6937_v59, %v6102_v40  ;;  %v2637_v44 = vadd.f32 %v7971_v56, %v2624_v47  ;;  %v6876_v62 = vld [vmem:[#allocation8 + $0x64] sm:$0xf]  ;;  %v6918_v59 = vld [vmem:[#allocation8 + $0x1b4] sm:$0xf] }
 0x18e   : > { %3706 = vmatpush.bf16.msrb.mxu2 %v6175_v26  ;;  %v2849_v14 = vmax.f32 %v2572_v10, 0.0  ;;  %v6007_v32 = vor.u32 %v6913_v17, %v6006_v34  ;;  %v5867_v3 = vor.u32 %v6876_v62, %v5864_v63  ;;  %v6924_v56 = vld [vmem:[#allocation8 + $0x1e4] sm:$0xf]  ;;  %v6044_v34 = vld [vmem:[#allocation8 + $0x1d4] sm:$0xf0]  ;;  %v5951_v17 = vor.u32 %v6897_v8, %v5948_v9 }
 0x18f   : > { %v6282_v47 = vld [vmem:[#allocation8 + $0x3a8] sm:$0xf]  ;;  %v6008_v62 = vld [vmem:[#allocation8 + $0x18c] sm:$0xf0]  ;;  %v6246_v8 = vld [vmem:[#allocation8 + $0x360] sm:$0xf] }
 0x190   : > { %3681 = vmatpush.bf16.msrb.mxu0 %v5971_v27  ;;  %v6909_v27 = vld [vmem:[#allocation8 + $0x16c] sm:$0xf]  ;;  %v6270_v63 = vld [vmem:[#allocation8 + $0x390] sm:$0xf] }
 0x191   : > { %3694 = vmatpush.bf16.msrb.mxu1 %v6067_v30  ;;  %v5911_v30 = vor.u32 %v6889_v12, %v5910_v58  ;;  %v5999_v36 = vor.u32 %v6909_v27, %v5996_v28  ;;  %v6059_v58 = vor.u32 %v6924_v56, %v6056_v4  ;;  %v6921_v12 = vld [vmem:[#allocation8 + $0x1cc] sm:$0xf]  ;;  %v5936_v27 = vld [vmem:[#allocation8 + $0xfc] sm:$0xf0] }
 0x192   : > { %3707 = vmatpush.bf16.msrb.mxu2 %v6163_v41  ;;  %v6933_v41 = vld [vmem:[#allocation8 + $0x22c] sm:$0xf]  ;;  %v6047_v29 = vor.u32 %v6921_v12, %v6044_v34  ;;  %v6284_v12 = vld [vmem:[#allocation8 + $0x3b4] sm:$0xf0] }
 0x193   : > { %v6973_v9 = vld [vmem:[#allocation8 + $0x368] sm:$0xf0] }
 0x194   : > { %3682 = vmatpush.bf16.msrb.mxu0 %v5959_v37  ;;  %v2638_v16 = vpop.f32.mrf.mxu2  ;;  %v6092_v37 = vld [vmem:[#allocation8 + $0x234] sm:$0xf0] }
 0x195   : > { %3695 = vmatpush.bf16.msrb.mxu1 %v6055_v39  ;;  %v2651_v26 = vpop.f32.mrf.mxu3  ;;  %v5888_v39 = vld [vmem:[#allocation8 + $0x9c] sm:$0xf0]  ;;  %v6095_v35 = vor.u32 %v6933_v41, %v6092_v37  ;;  %v5828_v41 = vld [vmem:[#allocation8 + $0x24] sm:$0xf0]  ;;  %v6891_v37 = vld [vmem:[#allocation8 + $0xdc] sm:$0xf] }
 0x196   : > { %3708 = vmatpush.bf16.msrb.mxu2 %v6151_v48  ;;  %v7981_v48 = vpack.c.bf16 %v2849_v14, %v2849_v14  ;;  %v5891_v50 = vor.u32 %v6882_v38, %v5888_v39  ;;  %v6894_v26 = vld [vmem:[#allocation8 + $0xf4] sm:$0xf]  ;;  %v6032_v14 = vld [vmem:[#allocation8 + $0x1bc] sm:$0xf0] }
 0x197   : > { %v6035_v39 = vor.u32 %v6918_v59, %v6032_v14  ;;  %v6978_v59 = vld [vmem:[#allocation8 + $0x394] sm:$0xf]  ;;  %v6272_v14 = vld [vmem:[#allocation8 + $0x39c] sm:$0xf0] }
 0x198   : > { %3683 = vmatpush.bf16.msrb.mxu0 %v5947_v15  ;;  %v6930_v15 = vld [vmem:[#allocation8 + $0x214] sm:$0xf] }
 0x199   : > { %3696 = vmatpush.bf16.msrb.mxu1 %v6043_v53  ;;  %v5876_v53 = vld [vmem:[#allocation8 + $0x84] sm:$0xf0]  ;;  %v6083_v57 = vor.u32 %v6930_v15, %v6080_v51  ;;  %v6864_v15 = vld [vmem:[#allocation8 + $0x4] sm:$0xf]  ;;  %v5816_v51 = vld [vmem:[#allocation8 + $0xc] sm:$0xf0] }
 0x19a   : > { %3709 = vmatpush.bf16.msrb.mxu2 %v6139_v22  ;;  %v5879_v19 = vor.u32 %v6879_v18, %v5876_v53  ;;  %v6927_v22 = vld [vmem:[#allocation8 + $0x1fc] sm:$0xf]  ;;  %v905_v18 = vperm.slane %v7966_v49, 3  ;;  %v6888_v53 = vld [vmem:[#allocation8 + $0xc4] sm:$0xf] }
 0x19b   : > { %v6071_v1 = vor.u32 %v6927_v22, %v6068_v60  ;;  %v6912_v60 = vld [vmem:[#allocation8 + $0x184] sm:$0xf] }
 0x19c   : > { %3684 = vmatpush.bf16.msrb.mxu0 %v5935_v61  ;;  %v5975_v61 = vor.u32 %v6903_v54, %v5972_v55  ;;  %v5912_v54 = vld [vmem:[#allocation8 + $0xcc] sm:$0xf0]  ;;  %v6011_v56 = vor.u32 %v6912_v60, %v6008_v62  ;;  %v5834_v60 = vld [vmem:[#allocation8 + $0x20] sm:$0xf] }
 0x19d   : > { %3697 = vmatpush.bf16.msrb.mxu1 %v6031_v46  ;;  %v2650_v46 = vadd.f32 %v7973_v21, %v2637_v44  ;;  %v5906_v55 = vld [vmem:[#allocation8 + $0xb0] sm:$0xf]  ;;  %v6887_v44 = vld [vmem:[#allocation8 + $0xb8] sm:$0xf0] }
 0x19e   : > { %3710 = vmatpush.bf16.msrb.mxu2 %v6127_v6  ;;  %v5963_v6 = vor.u32 %v6900_v0, %v5960_v31  ;;  %v6979_v0 = vld [vmem:[#allocation8 + $0x398] sm:$0xf0]  ;;  %v5915_v31 = vor.u32 %v6888_v53, %v5912_v54  ;;  %v6872_v53 = vld [vmem:[#allocation8 + $0x40] sm:$0xf0]  ;;  %v6248_v54 = vld [vmem:[#allocation8 + $0x36c] sm:$0xf0] }
 0x1a0   : > { %3685 = vmatpush.bf16.msrb.mxu0 %v5923_v20  ;;  %v5852_v20 = vld [vmem:[#allocation8 + $0x54] sm:$0xf0] }
 0x1a1   : > { %3698 = vmatpush.bf16.msrb.mxu1 %v6019_v11  ;;  %v5855_v21 = vor.u32 %v6873_v7, %v5852_v20 }
 0x1a2   : > { %3711 = vmatpush.bf16.msrb.mxu2 %v6115_v25 }
 0x1a4   : > { %3686 = vmatpush.bf16.msrb.mxu0 %v5911_v30  ;;  %v2662_v2 = vpop.f32.mrf.mxu0  ;;  %v5843_v30 = vor.u32 %v6870_v23, %v5840_v24  ;;  %v6234_v24 = vld [vmem:[#allocation8 + $0x348] sm:$0xf] }
 0x1a5   : > { %3699 = vmatpush.bf16.msrb.mxu1 %v6007_v32  ;;  %v2663_v5 = vadd.f32 %v2662_v2, %v2650_v46  ;;  %v7986_v10 = vpop.f32.mrf.mxu1  ;;  %v5939_v32 = vor.u32 %v6894_v26, %v5936_v27  ;;  %v6271_v46 = vor.u32 %v6979_v0, %v6270_v63  ;;  %v5894_v2 = vld [vmem:[#allocation8 + $0x98] sm:$0xf]  ;;  %v6970_v26 = vld [vmem:[#allocation8 + $0x350] sm:$0xf0]  ;;  %v5870_v27 = vld [vmem:[#allocation8 + $0x68] sm:$0xf] }
 0x1a6   : > { %3712 = vmatpush.bf16.msrb.mxu2 %v6103_v45  ;;  %v6020_v45 = vld [vmem:[#allocation8 + $0x1a4] sm:$0xf0]  ;;  %v2676_v4 = vadd.f32 %v7986_v10, %v905_v18  ;;  %v6247_v10 = vor.u32 %v6973_v9, %v6246_v8  ;;  %v5846_v18 = vld [vmem:[#allocation8 + $0x38] sm:$0xf]  ;;  %v6002_v63 = vld [vmem:[#allocation8 + $0x170] sm:$0xf] }
 0x1a7   : > { %3687 = vmatmul.bf16.vlgmr.msrb.gmra.mxu0 %v7981_v48  ;;  %v2850_v11 = vmax.f32 %v2663_v5, 0.0  ;;  %v6023_v22 = vor.u32 %v6915_v42, %v6020_v45  ;;  %v6258_v5 = vld [vmem:[#allocation8 + $0x378] sm:$0xf]  ;;  %v6260_v42 = vld [vmem:[#allocation8 + $0x384] sm:$0xf0]  ;;  %v5847_v62 = vor.u32 %v6872_v53, %v5846_v18 }
 0x1a8   : > { %3731 = vmatpush.bf16.msra.mxu0 %v5903_v33  ;;  %v6867_v33 = vld [vmem:[#allocation8 + $0x1c] sm:$0xf]  ;;  %v5822_v8 = vld [vmem:[#allocation8 + $0x8] sm:$0xf]  ;;  %v6866_v9 = vld [vmem:[#allocation8 + $0x10] sm:$0xf0] }
 0x1a9   : > { %3744 = vmatpush.bf16.msra.mxu1 %v5999_v36  ;;  %v7988_v16 = vpack.c.bf16 %v2850_v11, %v2850_v11  ;;  %v5924_v36 = vld [vmem:[#allocation8 + $0xe4] sm:$0xf0]  ;;  %v5831_v43 = vor.u32 %v6867_v33, %v5828_v41  ;;  %v6981_v11 = vld [vmem:[#allocation8 + $0x3ac] sm:$0xf]  ;;  %v6275_v33 = vor.u32 %v6978_v59, %v6272_v14  ;;  %v6222_v41 = vld [vmem:[#allocation8 + $0x330] sm:$0xf] }
 0x1aa   : > { %3757 = vmatpush.bf16.msra.mxu2 %v6095_v35  ;;  %v6982_v35 = vld [vmem:[#allocation8 + $0x3b0] sm:$0xf0]  ;;  %v6911_v0 = vld [vmem:[#allocation8 + $0x178] sm:$0xf0]  ;;  %v6152_v18 = vld [vmem:[#allocation8 + $0x2ac] sm:$0xf0] }
 0x1ab   : > { %3700 = vmatmul.bf16.vlgmr.msrb.gmra.mxu1 %v7988_v16  ;;  %v6194_v53 = vld [vmem:[#allocation8 + $0x2f0] sm:$0xf] }
 0x1ac   : > { %3732 = vmatpush.bf16.msra.mxu0 %v5891_v50  ;;  %v7991_v28 = vpop.f32.mrf.mxu2  ;;  %v2664_v40 = vpop.f32.mrf.mxu0  ;;  %v5927_v50 = vor.u32 %v6891_v37, %v5924_v36  ;;  %v6967_v37 = vld [vmem:[#allocation8 + $0x338] sm:$0xf0] }
 0x1ad   : > { %3745 = vmatpush.bf16.msra.mxu1 %v5987_v52  ;;  %v7993_v25 = vpop.f32.mrf.mxu3  ;;  %v2677_v38 = vpop.f32.mrf.mxu1  ;;  %v6283_v52 = vor.u32 %v6982_v35, %v6282_v47  ;;  %v2689_v34 = vadd.f32 %v7991_v28, %v2676_v4  ;;  %v6235_v40 = vor.u32 %v6970_v26, %v6234_v24  ;;  %v6223_v47 = vor.u32 %v6967_v37, %v6222_v41  ;;  %v6176_v24 = vld [vmem:[#allocation8 + $0x2dc] sm:$0xf0]  ;;  %v6966_v26 = vld [vmem:[#allocation8 + $0x334] sm:$0xf]  ;;  %v6164_v37 = vld [vmem:[#allocation8 + $0x2c4] sm:$0xf0] }
 0x1ae   : > { %3758 = vmatpush.bf16.msra.mxu2 %v6083_v57  ;;  %v6875_v38 = vld [vmem:[#allocation8 + $0x58] sm:$0xf0] }
 0x1af   : > { %3718 = vmatpush.bf16.msrb.mxu3 %v6283_v52  ;;  %v6972_v52 = vld [vmem:[#allocation8 + $0x364] sm:$0xf] }
 0x1b0   : > { %3733 = vmatpush.bf16.msra.mxu0 %v5879_v19 }
 0x1b1   : > { %3746 = vmatpush.bf16.msra.mxu1 %v5975_v61  ;;  %v5819_v61 = vor.u32 %v6864_v15, %v5816_v51  ;;  %v6210_v15 = vld [vmem:[#allocation8 + $0x318] sm:$0xf]  ;;  %v6964_v51 = vld [vmem:[#allocation8 + $0x320] sm:$0xf0] }
 0x1b2   : > { %3759 = vmatpush.bf16.msra.mxu2 %v6071_v1  ;;  %v5907_v1 = vor.u32 %v6887_v44, %v5906_v55  ;;  %v6211_v44 = vor.u32 %v6964_v51, %v6210_v15  ;;  %v6960_v15 = vld [vmem:[#allocation8 + $0x304] sm:$0xf]  ;;  %v6200_v51 = vld [vmem:[#allocation8 + $0x30c] sm:$0xf0] }
 0x1b3   : > { %3719 = vmatpush.bf16.msrb.mxu3 %v6271_v46 }
 0x1b4   : > { %3734 = vmatpush.bf16.msra.mxu0 %v5867_v3  ;;  %v2690_v57 = vpop.f32.mrf.mxu2  ;;  %v6884_v3 = vld [vmem:[#allocation8 + $0xa0] sm:$0xf0] }
 0x1b5   : > { %3747 = vmatpush.bf16.msra.mxu1 %v5963_v6  ;;  %v2703_v19 = vpop.f32.mrf.mxu3  ;;  %v6976_v6 = vld [vmem:[#allocation8 + $0x380] sm:$0xf0]  ;;  %v5895_v20 = vor.u32 %v6884_v3, %v5894_v2  ;;  %v6251_v57 = vor.u32 %v6972_v52, %v6248_v54  ;;  %v6961_v2 = vld [vmem:[#allocation8 + $0x308] sm:$0xf0]  ;;  %v6959_v54 = vld [vmem:[#allocation8 + $0x2f8] sm:$0xf0] }
 0x1b6   : > { %3760 = vmatpush.bf16.msra.mxu2 %v6059_v58  ;;  %v6259_v7 = vor.u32 %v6976_v6, %v6258_v5  ;;  %v5882_v58 = vld [vmem:[#allocation8 + $0x80] sm:$0xf]  ;;  %v6957_v3 = vld [vmem:[#allocation8 + $0x2ec] sm:$0xf] }
 0x1b7   : > { %v6969_v6 = vld [vmem:[#allocation8 + $0x34c] sm:$0xf] }
 0x1b8   : > { %3735 = vmatpush.bf16.msra.mxu0 %v5855_v21  ;;  %v6881_v21 = vld [vmem:[#allocation8 + $0x88] sm:$0xf0]  ;;  %3720 = vmatpush.bf16.msrb.mxu3 %v6259_v7  ;;  %v6236_v7 = vld [vmem:[#allocation8 + $0x354] sm:$0xf0] }
 0x1b9   : > { %3748 = vmatpush.bf16.msra.mxu1 %v5951_v17  ;;  %v6287_v17 = vor.u32 %v6981_v11, %v6284_v12  ;;  %v5883_v23 = vor.u32 %v6881_v21, %v5882_v58  ;;  %v6239_v58 = vor.u32 %v6969_v6, %v6236_v7  ;;  %v6003_v12 = vor.u32 %v6911_v0, %v6002_v63  ;;  %v5954_v0 = vld [vmem:[#allocation8 + $0x110] sm:$0xf]  ;;  %v6956_v6 = vld [vmem:[#allocation8 + $0x2e0] sm:$0xf0]  ;;  %v5942_v7 = vld [vmem:[#allocation8 + $0xf8] sm:$0xf] }
 0x1ba   : > { %3761 = vmatpush.bf16.msra.mxu2 %v6047_v29  ;;  %v6878_v29 = vld [vmem:[#allocation8 + $0x70] sm:$0xf0] }
 0x1bb   : > { %v5871_v28 = vor.u32 %v6878_v29, %v5870_v27  ;;  %v6224_v27 = vld [vmem:[#allocation8 + $0x33c] sm:$0xf0] }
 0x1bc   : > { %3736 = vmatpush.bf16.msra.mxu0 %v5843_v30  ;;  %v2702_v30 = vadd.f32 %v7993_v25, %v2689_v34  ;;  %3721 = vmatpush.bf16.msrb.mxu3 %v6247_v10  ;;  %v5990_v34 = vld [vmem:[#allocation8 + $0x158] sm:$0xf]  ;;  %v6908_v10 = vld [vmem:[#allocation8 + $0x160] sm:$0xf0]  ;;  %v6227_v59 = vor.u32 %v6966_v26, %v6224_v27  ;;  %v6170_v26 = vld [vmem:[#allocation8 + $0x2c0] sm:$0xf] }
 0x1bd   : > { %3749 = vmatpush.bf16.msra.mxu1 %v5939_v32  ;;  %v5858_v32 = vld [vmem:[#allocation8 + $0x50] sm:$0xf]  ;;  %v5991_v41 = vor.u32 %v6908_v10, %v5990_v34  ;;  %v6953_v27 = vld [vmem:[#allocation8 + $0x2c8] sm:$0xf0] }
 0x1be   : > { %3762 = vmatpush.bf16.msra.mxu2 %v6035_v39  ;;  %v6975_v39 = vld [vmem:[#allocation8 + $0x37c] sm:$0xf] }
 0x1bf   : > { %v6263_v25 = vor.u32 %v6975_v39, %v6260_v42  ;;  %v5978_v39 = vld [vmem:[#allocation8 + $0x140] sm:$0xf]  ;;  %v6905_v42 = vld [vmem:[#allocation8 + $0x148] sm:$0xf0] }
 0x1c0   : > { %3737 = vmatpush.bf16.msra.mxu0 %v5831_v43  ;;  %3722 = vmatpush.bf16.msrb.mxu3 %v6235_v40  ;;  %v6983_v40 = vld [vmem:[#allocation8 + $0x3b8] sm:$0xf0]  ;;  %v5979_v52 = vor.u32 %v6905_v42, %v5978_v39  ;;  %v6950_v39 = vld [vmem:[#allocation8 + $0x2b0] sm:$0xf0]  ;;  %v5918_v42 = vld [vmem:[#allocation8 + $0xc8] sm:$0xf] }
 0x1c1   : > { %3750 = vmatpush.bf16.msra.mxu1 %v5927_v50  ;;  %v5859_v50 = vor.u32 %v6875_v38, %v5858_v32  ;;  %v6951_v32 = vld [vmem:[#allocation8 + $0x2bc] sm:$0xf]  ;;  %v6212_v38 = vld [vmem:[#allocation8 + $0x324] sm:$0xf0] }
 0x1c2   : > { %3763 = vmatpush.bf16.msra.mxu2 %v6023_v22 }
 0x1c4   : > { %3738 = vmatpush.bf16.msra.mxu0 %v5819_v61  ;;  %v2714_v36 = vpop.f32.mrf.mxu0  ;;  %3723 = vmatpush.bf16.msrb.mxu3 %v6223_v47  ;;  %v6869_v61 = vld [vmem:[#allocation8 + $0x28] sm:$0xf0]  ;;  %v6980_v47 = vld [vmem:[#allocation8 + $0x3a0] sm:$0xf0] }
 0x1c5   : > { %3751 = vmatpush.bf16.msra.mxu1 %v5915_v31  ;;  %v2715_v43 = vadd.f32 %v2714_v36, %v2702_v30  ;;  %v2727_v45 = vpop.f32.mrf.mxu1  ;;  %v6198_v31 = vld [vmem:[#allocation8 + $0x300] sm:$0xf]  ;;  %v5835_v21 = vor.u32 %v6869_v61, %v5834_v60  ;;  %v6290_v30 = vld [vmem:[#allocation8 + $0x3b0] sm:$0xf]  ;;  %v6963_v36 = vld [vmem:[#allocation8 + $0x31c] sm:$0xf]  ;;  %v6203_v60 = vor.u32 %v6960_v15, %v6200_v51 }
 0x1c6   : > { %3764 = vmatpush.bf16.msra.mxu2 %v6011_v56  ;;  %v6188_v56 = vld [vmem:[#allocation8 + $0x2f4] sm:$0xf0]  ;;  %v6199_v5 = vor.u32 %v6961_v2, %v6198_v31  ;;  %v6899_v31 = vld [vmem:[#allocation8 + $0x118] sm:$0xf0]  ;;  %v6974_v2 = vld [vmem:[#allocation8 + $0x370] sm:$0xf0] }
 0x1c7   : > { %3739 = vmatmul.bf16.vlgmr.msra.gmra.mxu0 %v7956_v13  ;;  %v2728_v35 = vadd.f32 %v2727_v45, %v2715_v43  ;;  %v6191_v11 = vor.u32 %v6957_v3, %v6188_v56  ;;  %v6291_v43 = vor.u32 %v6983_v40, %v6290_v30  ;;  %v6278_v45 = vld [vmem:[#allocation8 + $0x398] sm:$0xf]  ;;  %v6945_v3 = vld [vmem:[#allocation8 + $0x28c] sm:$0xf] }
 0x1c8   : > { %3752 = vmatmul.bf16.vlgmr.msra.gmra.mxu1 %v7981_v48  ;;  %3783 = vmatpush.bf16.msrb.mxu0 %v6287_v17  ;;  %v6954_v17 = vld [vmem:[#allocation8 + $0x2d4] sm:$0xf]  ;;  %v6140_v56 = vld [vmem:[#allocation8 + $0x294] sm:$0xf0]  ;;  %v6893_v30 = vld [vmem:[#allocation8 + $0xe8] sm:$0xf0] }
 0x1c9   : > { %3796 = vmatpush.bf16.msrb.mxu1 %v5907_v1  ;;  %3724 = vmatpush.bf16.msrb.mxu3 %v6211_v44  ;;  %v6902_v44 = vld [vmem:[#allocation8 + $0x130] sm:$0xf0] }
 0x1cc   : > { %3784 = vmatpush.bf16.msrb.mxu0 %v6275_v33  ;;  %v2740_v55 = vpop.f32.mrf.mxu2  ;;  %v2716_v1 = vpop.f32.mrf.mxu0  ;;  %v5823_v33 = vor.u32 %v6866_v9, %v5822_v8  ;;  %v6242_v9 = vld [vmem:[#allocation8 + $0x350] sm:$0xf] }
 0x1cd   : > { %3797 = vmatpush.bf16.msrb.mxu1 %v5895_v20  ;;  %v2741_v19 = vadd.f32 %v2740_v55, %v2728_v35  ;;  %v2753_v22 = vpop.f32.mrf.mxu3  ;;  %v2729_v4 = vpop.f32.mrf.mxu1  ;;  %3725 = vmatpush.bf16.msrb.mxu3 %v6199_v5  ;;  %v6167_v35 = vor.u32 %v6951_v32, %v6164_v37  ;;  %v5966_v55 = vld [vmem:[#allocation8 + $0x128] sm:$0xf]  ;;  %v6143_v5 = vor.u32 %v6945_v3, %v6140_v56  ;;  %v6939_v32 = vld [vmem:[#allocation8 + $0x25c] sm:$0xf]  ;;  %v6122_v3 = vld [vmem:[#allocation8 + $0x260] sm:$0xf] }
 0x1ce   : > { %v5967_v63 = vor.u32 %v6902_v44, %v5966_v55  ;;  %v6254_v1 = vld [vmem:[#allocation8 + $0x368] sm:$0xf]  ;;  %v5955_v4 = vor.u32 %v6899_v31, %v5954_v0  ;;  %v6146_v55 = vld [vmem:[#allocation8 + $0x290] sm:$0xf]  ;;  %v6944_v0 = vld [vmem:[#allocation8 + $0x280] sm:$0xf0] }
 0x1cf   : > { %v2754_v46 = vadd.f32 %v2753_v22, %v2741_v19  ;;  %v6266_v19 = vld [vmem:[#allocation8 + $0x380] sm:$0xf]  ;;  %v6977_v22 = vld [vmem:[#allocation8 + $0x388] sm:$0xf0]  ;;  %v6255_v8 = vor.u32 %v6974_v2, %v6254_v1 }
 0x1d0   : > { %3785 = vmatpush.bf16.msrb.mxu0 %v6263_v25  ;;  %v6215_v25 = vor.u32 %v6963_v36, %v6212_v38  ;;  %v6158_v38 = vld [vmem:[#allocation8 + $0x2a8] sm:$0xf]  ;;  %v6941_v56 = vld [vmem:[#allocation8 + $0x268] sm:$0xf0] }
 0x1d1   : > { %3798 = vmatpush.bf16.msrb.mxu1 %v5883_v23  ;;  %v2851_v20 = vmax.f32 %v2754_v46, 0.0  ;;  %3770 = vmatpush.bf16.msra.mxu3 %v6191_v11  ;;  %v6267_v46 = vor.u32 %v6977_v22, %v6266_v19  ;;  %v6206_v19 = vld [vmem:[#allocation8 + $0x308] sm:$0xf]  ;;  %v6962_v22 = vld [vmem:[#allocation8 + $0x310] sm:$0xf0] }
 0x1d2   : > { %v6207_v31 = vor.u32 %v6962_v22, %v6206_v19 }
 0x1d3   : > { %v8001_v23 = vpack.c.bf16 %v2851_v20, %v2851_v20  ;;  %v6896_v20 = vld [vmem:[#allocation8 + $0x100] sm:$0xf0] }
 0x1d4   : > { %3786 = vmatpush.bf16.msrb.mxu0 %v6251_v57  ;;  %v2742_v29 = vpop.f32.mrf.mxu2  ;;  %v6279_v57 = vor.u32 %v6980_v47, %v6278_v45  ;;  %v6159_v47 = vor.u32 %v6950_v39, %v6158_v38  ;;  %v8011_v38 = vld [vmem:[#allocation10] sm:$0x7] }
 0x1d5   : > { %3799 = vmatpush.bf16.msrb.mxu1 %v5871_v28  ;;  %3713 = vmatmul.bf16.vlgmr.msrb.gmra.mxu2 %v8001_v23  ;;  %v2755_v14 = vpop.f32.mrf.mxu3  ;;  %v6179_v28 = vor.u32 %v6954_v17, %v6176_v24  ;;  %v5943_v24 = vor.u32 %v6896_v20, %v5942_v7  ;;  %v5930_v29 = vld [vmem:[#allocation8 + $0xe0] sm:$0xf] }
 0x1d6   : > { %3809 = vmatpush.bf16.msrb.mxu2 %v6003_v12  ;;  %v6128_v12 = vld [vmem:[#allocation8 + $0x27c] sm:$0xf0]  ;;  %v6230_v14 = vld [vmem:[#allocation8 + $0x338] sm:$0xf]  ;;  %v5931_v37 = vor.u32 %v6893_v30, %v5930_v29 }
 0x1d7   : > { %3771 = vmatpush.bf16.msra.mxu3 %v6179_v28  ;;  %v6968_v28 = vld [vmem:[#allocation8 + $0x340] sm:$0xf0]  ;;  %v6086_v30 = vld [vmem:[#allocation8 + $0x218] sm:$0xf] }
 0x1d8   : > { %3787 = vmatpush.bf16.msrb.mxu0 %v6239_v58  ;;  %v6971_v58 = vld [vmem:[#allocation8 + $0x358] sm:$0xf0]  ;;  %v6231_v45 = vor.u32 %v6968_v28, %v6230_v14 }
 0x1d9   : > { %3800 = vmatpush.bf16.msrb.mxu1 %v5859_v50  ;;  %v6948_v50 = vld [vmem:[#allocation8 + $0x2a4] sm:$0xf]  ;;  %v6243_v40 = vor.u32 %v6971_v58, %v6242_v9 }
 0x1da   : > { %3810 = vmatpush.bf16.msrb.mxu2 %v5991_v41  ;;  %v6155_v61 = vor.u32 %v6948_v50, %v6152_v18  ;;  %v6965_v50 = vld [vmem:[#allocation8 + $0x328] sm:$0xf0]  ;;  %v6104_v18 = vld [vmem:[#allocation8 + $0x24c] sm:$0xf0] }
 0x1db   : > { %3772 = vmatpush.bf16.msra.mxu3 %v6167_v35  ;;  %v6218_v35 = vld [vmem:[#allocation8 + $0x320] sm:$0xf] }
 0x1dc   : > { %3788 = vmatpush.bf16.msrb.mxu0 %v6227_v59  ;;  %v6171_v59 = vor.u32 %v6953_v27, %v6170_v26  ;;  %v6219_v44 = vor.u32 %v6965_v50, %v6218_v35  ;;  %v6920_v35 = vld [vmem:[#allocation8 + $0x1c0] sm:$0xf0] }
 0x1dd   : > { %3801 = vmatpush.bf16.msrb.mxu1 %v5847_v62  ;;  %v6195_v62 = vor.u32 %v6959_v54, %v6194_v53 }
 0x1de   : > { %3811 = vmatpush.bf16.msrb.mxu2 %v5979_v52  ;;  %v6936_v52 = vld [vmem:[#allocation8 + $0x244] sm:$0xf] }
 0x1df   : > { %3773 = vmatpush.bf16.msra.mxu3 %v6155_v61  ;;  %v6107_v54 = vor.u32 %v6936_v52, %v6104_v18  ;;  %v906_v61 = vperm.slane %v7966_v49, 4  ;;  %v6026_v18 = vld [vmem:[#allocation8 + $0x1a0] sm:$0xf] }
 0x1e0   : > { %3789 = vmatpush.bf16.msrb.mxu0 %v6215_v25 }
 0x1e1   : > { %3802 = vmatpush.bf16.msrb.mxu1 %v5835_v21  ;;  %v6942_v21 = vld [vmem:[#allocation8 + $0x274] sm:$0xf] }
 0x1e2   : > { %3812 = vmatpush.bf16.msrb.mxu2 %v5967_v63  ;;  %v6131_v17 = vor.u32 %v6942_v21, %v6128_v12  ;;  %v6134_v63 = vld [vmem:[#allocation8 + $0x278] sm:$0xf] }
 0x1e3   : > { %3774 = vmatpush.bf16.msra.mxu3 %v6143_v5  ;;  %v6110_v5 = vld [vmem:[#allocation8 + $0x248] sm:$0xf] }
 0x1e4   : > { %3790 = vmatpush.bf16.msrb.mxu0 %v6203_v60  ;;  %v2766_v34 = vpop.f32.mrf.mxu0 }
 0x1e5   : > { %3803 = vmatpush.bf16.msrb.mxu1 %v5823_v33  ;;  %3765 = vmatmul.bf16.vlgmr.msra.gmra.mxu2 %v7988_v16  ;;  %v8006_v10 = vpop.f32.mrf.mxu1  ;;  %v6116_v33 = vld [vmem:[#allocation8 + $0x264] sm:$0xf0]  ;;  %v2767_v2 = vadd.f32 %v2766_v34, %v906_v61 }
 0x1e6   : > { %3813 = vmatpush.bf16.msrb.mxu2 %v5955_v4  ;;  %v6119_v36 = vor.u32 %v6939_v32, %v6116_v33  ;;  %v6123_v4 = vor.u32 %v6941_v56, %v6122_v3  ;;  %v6074_v32 = vld [vmem:[#allocation8 + $0x200] sm:$0xf]  ;;  %v6929_v33 = vld [vmem:[#allocation8 + $0x208] sm:$0xf0]  ;;  %v6999_v3 = vld [vmem:[#allocation11 + $0x74] sm:$0xf0] }
 0x1e7   : > { %3775 = vmatpush.bf16.msra.mxu3 %v6131_v17  ;;  %v2780_v49 = vadd.f32 %v8006_v10, %v2767_v2  ;;  %v6098_v17 = vld [vmem:[#allocation8 + $0x230] sm:$0xf]  ;;  %v6350_v2 = vld [vmem:[#allocation11 + $0x70] sm:$0xf] }
 0x1e8   : > { %3804 = vmatmul.bf16.vlgmr.msrb.gmra.mxu1 %v7956_v13  ;;  %3835 = vmatpush.bf16.msra.mxu0 %v6195_v62  ;;  %v6182_v13 = vld [vmem:[#allocation8 + $0x2d8] sm:$0xf]  ;;  %v6351_v56 = vor.u32 %v6999_v3, %v6350_v2  ;;  %v7012_v3 = vld [vmem:[#allocation11 + $0xe4] sm:$0xf] }
 0x1e9   : > { %3848 = vmatpush.bf16.msra.mxu1 %v6291_v43  ;;  %v6183_v11 = vor.u32 %v6956_v6, %v6182_v13  ;;  %v6890_v43 = vld [vmem:[#allocation8 + $0xd0] sm:$0xf0] }
 0x1ea   : > { %3814 = vmatpush.bf16.msrb.mxu2 %v5943_v24  ;;  %v5919_v53 = vor.u32 %v6890_v43, %v5918_v42  ;;  %v6938_v13 = vld [vmem:[#allocation8 + $0x250] sm:$0xf0]  ;;  %v6935_v24 = vld [vmem:[#allocation8 + $0x238] sm:$0xf0]  ;;  %v6050_v42 = vld [vmem:[#allocation8 + $0x1d0] sm:$0xf] }
 0x1eb   : > { %3776 = vmatpush.bf16.msra.mxu3 %v6119_v36  ;;  %v6111_v6 = vor.u32 %v6938_v13, %v6110_v5  ;;  %v6099_v10 = vor.u32 %v6935_v24, %v6098_v17  ;;  %v6926_v36 = vld [vmem:[#allocation8 + $0x1f0] sm:$0xf0]  ;;  %v6923_v43 = vld [vmem:[#allocation8 + $0x1d8] sm:$0xf0] }
 0x1ec   : > { %3836 = vmatpush.bf16.msra.mxu0 %v6183_v11  ;;  %v2792_v41 = vpop.f32.mrf.mxu2  ;;  %v2768_v15 = vpop.f32.mrf.mxu0  ;;  %v6334_v5 = vld [vmem:[#allocation11 + $0x50] sm:$0xf]  ;;  %v6991_v24 = vld [vmem:[#allocation11 + $0x34] sm:$0xf0] }
 0x1ed   : > { %3849 = vmatpush.bf16.msra.mxu1 %v6279_v57  ;;  %v2805_v25 = vpop.f32.mrf.mxu3  ;;  %v2781_v51 = vpop.f32.mrf.mxu1  ;;  %v6947_v57 = vld [vmem:[#allocation8 + $0x298] sm:$0xf0]  ;;  %v2793_v7 = vadd.f32 %v2792_v41, %v2780_v49  ;;  %v6075_v41 = vor.u32 %v6929_v33, %v6074_v32  ;;  %v6997_v49 = vld [vmem:[#allocation11 + $0x64] sm:$0xf0]  ;;  %v6318_v17 = vld [vmem:[#allocation11 + $0x30] sm:$0xf] }
 0x1ee   : > { %3815 = vmatpush.bf16.msrb.mxu2 %v5931_v37  ;;  %v6147_v60 = vor.u32 %v6947_v57, %v6146_v55  ;;  %v6062_v37 = vld [vmem:[#allocation8 + $0x1e8] sm:$0xf]  ;;  %v6989_v33 = vld [vmem:[#allocation11 + $0x24] sm:$0xf0] }
 0x1ef   : > { %3777 = vmatpush.bf16.msra.mxu3 %v6107_v54  ;;  %v2806_v20 = vadd.f32 %v2805_v25, %v2793_v7  ;;  %v6063_v39 = vor.u32 %v6926_v36, %v6062_v37  ;;  %v6038_v25 = vld [vmem:[#allocation8 + $0x1b8] sm:$0xf]  ;;  %v6014_v55 = vld [vmem:[#allocation8 + $0x188] sm:$0xf]  ;;  %v7013_v37 = vld [vmem:[#allocation11 + $0xe4] sm:$0xf0] }
 0x1f0   : > { %3837 = vmatpush.bf16.msra.mxu0 %v6171_v59  ;;  %v6039_v52 = vor.u32 %v6920_v35, %v6038_v25  ;;  %v6987_v35 = vld [vmem:[#allocation11 + $0x14] sm:$0xf0] }
 0x1f1   : > { %3850 = vmatpush.bf16.msra.mxu1 %v6267_v46  ;;  %v6135_v46 = vor.u32 %v6944_v0, %v6134_v63 }
 0x1f2   : > { %3816 = vmatpush.bf16.msrb.mxu2 %v5919_v53  ;;  %v6917_v53 = vld [vmem:[#allocation8 + $0x1a8] sm:$0xf0] }
 0x1f3   : > { %v6027_v54 = vor.u32 %v6917_v53, %v6026_v18  ;;  %v6990_v18 = vld [vmem:[#allocation11 + $0x34] sm:$0xf]  ;;  %v6320_v53 = vld [vmem:[#allocation11 + $0x38] sm:$0xf0] }
 0x1f4   : > { %3838 = vmatpush.bf16.msra.mxu0 %v6159_v47  ;;  %v2794_v62 = vpop.f32.mrf.mxu2  ;;  %v6051_v47 = vor.u32 %v6923_v43, %v6050_v42  ;;  %v6992_v43 = vld [vmem:[#allocation11 + $0x44] sm:$0xf] }
 0x1f5   : > { %3851 = vmatpush.bf16.msra.mxu1 %v6255_v8  ;;  %v2807_v1 = vpop.f32.mrf.mxu3  ;;  %3817 = vmatmul.bf16.vlgmr.msrb.gmra.mxu2 %v7981_v48 }
 0x1f6   : > { %4161 = vmatpush.bf16.msra.mxu2 %v6351_v56  ;;  %v6408_v56 = vld [vmem:[#allocation11 + $0xe8] sm:$0xf0] }
 0x1f8   : > { %3839 = vmatpush.bf16.msra.mxu0 %v6147_v60 }
 0x1f9   : > { %3852 = vmatpush.bf16.msra.mxu1 %v6243_v40  ;;  %v6932_v40 = vld [vmem:[#allocation8 + $0x220] sm:$0xf0] }
 0x1fa   : > { %v6087_v14 = vor.u32 %v6932_v40, %v6086_v30 }
 0x1fc   : > { %3840 = vmatpush.bf16.msra.mxu0 %v6135_v46 }
 0x1fd   : > { %3853 = vmatpush.bf16.msra.mxu1 %v6231_v45  ;;  %v3020_v45 = vperm.slane %v8011_v38, 0 }
 0x200   : > { %3841 = vmatpush.bf16.msra.mxu0 %v6123_v4  ;;  %v6342_v4 = vld [vmem:[#allocation11 + $0x60] sm:$0xf] }
 0x201   : > { %3854 = vmatpush.bf16.msra.mxu1 %v6219_v44  ;;  %v6914_v44 = vld [vmem:[#allocation8 + $0x190] sm:$0xf0]  ;;  %v6343_v13 = vor.u32 %v6997_v49, %v6342_v4  ;;  %v6411_v49 = vor.u32 %v7012_v3, %v6408_v56  ;;  %v6360_v3 = vld [vmem:[#allocation11 + $0x88] sm:$0xf0] }
 0x202   : > { %v6015_v19 = vor.u32 %v6914_v44, %v6014_v55  ;;  %v6985_v55 = vld [vmem:[#allocation11 + $0x4] sm:$0xf0]  ;;  %v6323_v44 = vor.u32 %v6990_v18, %v6320_v53  ;;  %v6382_v4 = vld [vmem:[#allocation11 + $0xb0] sm:$0xf]  ;;  %v7028_v53 = vld [vmem:[#allocation11 + $0x164] sm:$0xf] }
 0x203   : > { %4162 = vmatpush.bf16.msra.mxu2 %v6343_v13  ;;  %v7029_v18 = vld [vmem:[#allocation11 + $0x164] sm:$0xf0] }
 0x204   : > { %3842 = vmatpush.bf16.msra.mxu0 %v6111_v6  ;;  %v2818_v8 = vpop.f32.mrf.mxu0  ;;  %v6995_v6 = vld [vmem:[#allocation11 + $0x54] sm:$0xf0] }
 0x205   : > { %3855 = vmatpush.bf16.msra.mxu1 %v6207_v31  ;;  %v2831_v9 = vpop.f32.mrf.mxu1  ;;  %v2819_v11 = vadd.f32 %v2818_v8, %v2806_v20  ;;  %v6998_v20 = vld [vmem:[#allocation11 + $0x74] sm:$0xf]  ;;  %v6352_v8 = vld [vmem:[#allocation11 + $0x78] sm:$0xf0] }
 0x207   : > { %v2832_v58 = vadd.f32 %v2831_v9, %v2819_v11  ;;  %v6355_v9 = vor.u32 %v6998_v20, %v6352_v8  ;;  %v6326_v11 = vld [vmem:[#allocation11 + $0x40] sm:$0xf]  ;;  %v6304_v20 = vld [vmem:[#allocation11 + $0x18] sm:$0xf0] }
 0x209   : > { %4200 = vmatpush.bf16.msrb.mxu1 %v6355_v9  ;;  %v7010_v9 = vld [vmem:[#allocation11 + $0xd4] sm:$0xf] }
 0x20c   : > { %v2844_v21 = vpop.f32.mrf.mxu2  ;;  %v2820_v34 = vpop.f32.mrf.mxu0 }
 0x20d   : > { %v2845_v48 = vadd.f32 %v2844_v21, %v2832_v58  ;;  %v3675_v12 = vpop.f32.mrf.mxu3  ;;  %v2833_v26 = vpop.f32.mrf.mxu1  ;;  %v6993_v58 = vld [vmem:[#allocation11 + $0x44] sm:$0xf0]  ;;  %v6996_v21 = vld [vmem:[#allocation11 + $0x64] sm:$0xf]  ;;  %v6344_v34 = vld [vmem:[#allocation11 + $0x68] sm:$0xf0] }
 0x20e   : > { %v3676_v50 = vadd.f32 %v3675_v12, %v3020_v45  ;;  %v6327_v12 = vor.u32 %v6993_v58, %v6326_v11  ;;  %v6347_v26 = vor.u32 %v6996_v21, %v6344_v34  ;;  %v6328_v45 = vld [vmem:[#allocation11 + $0x48] sm:$0xf0]  ;;  %v6400_v11 = vld [vmem:[#allocation11 + $0xd8] sm:$0xf0]  ;;  %v6374_v21 = vld [vmem:[#allocation11 + $0xa0] sm:$0xf] }
 0x20f   : > { %v2852_v27 = vmax.f32 %v2845_v48, 0.0  ;;  %v6331_v25 = vor.u32 %v6992_v43, %v6328_v45  ;;  %v6403_v58 = vor.u32 %v7010_v9, %v6400_v11  ;;  %v7030_v43 = vld [vmem:[#allocation11 + $0x174] sm:$0xf] }
 0x210   : > { %4201 = vmatpush.bf16.msrb.mxu1 %v6347_v26  ;;  %v7022_v9 = vld [vmem:[#allocation11 + $0x134] sm:$0xf] }
 0x211   : > { %v2857_v29 = vpack.c.bf16 %v2852_v27, %v2852_v27  ;;  %v6414_v27 = vld [vmem:[#allocation11 + $0xf0] sm:$0xf] }
 0x213   : > { %3726 = vmatmul.bf16.vlgmr.msrb.gmra.mxu3 %v2857_v29  ;;  %3791 = vmatmul.bf16.vlgmr.msrb.gmra.mxu0 %v2857_v29 }
 0x214   : > { %3856 = vmatmul.bf16.vlgmr.msra.gmra.mxu1 %v2857_v29  ;;  %v2846_v59 = vpop.f32.mrf.mxu2  ;;  %3822 = vmatpush.bf16.msrb.mxu3 %v6099_v10  ;;  %v7015_v10 = vld [vmem:[#allocation11 + $0xf4] sm:$0xf0]  ;;  %v6319_v29 = vor.u32 %v6991_v24, %v6318_v17  ;;  %v6984_v17 = vld [vmem:[#allocation11 + $0x4] sm:$0xf]  ;;  %v6296_v24 = vld [vmem:[#allocation11 + $0x8] sm:$0xf0] }
 0x215   : > { %v3677_v28 = vpop.f32.mrf.mxu3  ;;  %v6415_v30 = vor.u32 %v7015_v10, %v6414_v27  ;;  %v6994_v59 = vld [vmem:[#allocation11 + $0x54] sm:$0xf]  ;;  %v6299_v26 = vor.u32 %v6984_v17, %v6296_v24  ;;  %v7008_v27 = vld [vmem:[#allocation11 + $0xc4] sm:$0xf]  ;;  %v6392_v10 = vld [vmem:[#allocation11 + $0xc8] sm:$0xf0] }
 0x216   : > { %v6310_v28 = vld [vmem:[#allocation11 + $0x20] sm:$0xf]  ;;  %v7021_v24 = vld [vmem:[#allocation11 + $0x124] sm:$0xf0] }
 0x217   : > { %v6438_v17 = vld [vmem:[#allocation11 + $0x120] sm:$0xf] }
 0x218   : > { %3823 = vmatpush.bf16.msrb.mxu3 %v6087_v14  ;;  %v6336_v14 = vld [vmem:[#allocation11 + $0x58] sm:$0xf0] }
 0x219   : > { %v6339_v32 = vor.u32 %v6994_v59, %v6336_v14 }
 0x21b   : > { %4202 = vmatpush.bf16.msrb.mxu1 %v6339_v32  ;;  %v6384_v32 = vld [vmem:[#allocation11 + $0xb8] sm:$0xf0] }
 0x21c   : > { %3824 = vmatpush.bf16.msrb.mxu3 %v6075_v41  ;;  %v6406_v41 = vld [vmem:[#allocation11 + $0xe0] sm:$0xf] }
 0x21d   : > { %v6407_v42 = vor.u32 %v7013_v37, %v6406_v41  ;;  %v6358_v41 = vld [vmem:[#allocation11 + $0x80] sm:$0xf]  ;;  %v7001_v37 = vld [vmem:[#allocation11 + $0x84] sm:$0xf0] }
 0x21f   : > { %4203 = vmatpush.bf16.msrb.mxu1 %v6331_v25  ;;  %v7004_v25 = vld [vmem:[#allocation11 + $0xa4] sm:$0xf] }
 0x220   : > { %3825 = vmatpush.bf16.msrb.mxu3 %v6063_v39  ;;  %v6311_v39 = vor.u32 %v6989_v33, %v6310_v28  ;;  %v7006_v28 = vld [vmem:[#allocation11 + $0xb4] sm:$0xf] }
 0x221   : > { %v6387_v33 = vor.u32 %v7006_v28, %v6384_v32  ;;  %v6430_v32 = vld [vmem:[#allocation11 + $0x110] sm:$0xf] }
 0x223   : > { %3778 = vmatmul.bf16.vlgmr.msra.gmra.mxu3 %v8001_v23  ;;  %3843 = vmatmul.bf16.vlgmr.msra.gmra.mxu0 %v8001_v23  ;;  %v3021_v23 = vperm.slane %v8011_v38, 1 }
 0x224   : > { %v3688_v15 = vpop.f32.mrf.mxu0  ;;  %3826 = vmatpush.bf16.msrb.mxu3 %v6051_v47  ;;  %v6302_v47 = vld [vmem:[#allocation11 + $0x10] sm:$0xf]  ;;  %4204 = vmatpush.bf16.msrb.mxu1 %v6323_v44 }
 0x225   : > { %v3689_v51 = vadd.f32 %v3688_v15, %v3676_v50  ;;  %v6398_v50 = vld [vmem:[#allocation11 + $0xd0] sm:$0xf]  ;;  %v7011_v15 = vld [vmem:[#allocation11 + $0xd4] sm:$0xf0] }
 0x228   : > { %3827 = vmatpush.bf16.msrb.mxu3 %v6039_v52  ;;  %v3701_v22 = vpop.f32.mrf.mxu1  ;;  %v6399_v52 = vor.u32 %v7011_v15, %v6398_v50 }
 0x229   : > { %v8016_v60 = vadd.f32 %v3701_v22, %v3689_v51  ;;  %v6303_v51 = vor.u32 %v6987_v35, %v6302_v47  ;;  %v7014_v22 = vld [vmem:[#allocation11 + $0xf4] sm:$0xf]  ;;  %v6480_v47 = vld [vmem:[#allocation11 + $0x178] sm:$0xf0]  ;;  %v6376_v35 = vld [vmem:[#allocation11 + $0xa8] sm:$0xf0] }
 0x22a   : > { %v6483_v50 = vor.u32 %v7030_v43, %v6480_v47  ;;  %v6379_v15 = vor.u32 %v7004_v25, %v6376_v35  ;;  %v7016_v47 = vld [vmem:[#allocation11 + $0x104] sm:$0xf]  ;;  %v6424_v35 = vld [vmem:[#allocation11 + $0x108] sm:$0xf0] }
 0x22c   : > { %v3690_v57 = vpop.f32.mrf.mxu0  ;;  %3828 = vmatpush.bf16.msrb.mxu3 %v6027_v54  ;;  %v6294_v54 = vld [vmem:[#allocation11] sm:$0xf] }
 0x230   : > { %3829 = vmatpush.bf16.msrb.mxu3 %v6015_v19  ;;  %v3703_v61 = vpop.f32.mrf.mxu1  ;;  %v6295_v19 = vor.u32 %v6985_v55, %v6294_v54  ;;  %v6472_v55 = vld [vmem:[#allocation11 + $0x168] sm:$0xf0] }
 0x231   : > { %v6416_v61 = vld [vmem:[#allocation11 + $0xf8] sm:$0xf0]  ;;  %v6475_v44 = vor.u32 %v7028_v53, %v6472_v55 }
 0x233   : > { %3830 = vmatmul.bf16.vlgmr.msrb.gmra.mxu3 %v7988_v16  ;;  %v6335_v16 = vor.u32 %v6995_v6, %v6334_v5  ;;  %v7007_v5 = vld [vmem:[#allocation11 + $0xb4] sm:$0xf0] }
 0x234   : > { %4174 = vmatpush.bf16.msra.mxu3 %v6415_v30  ;;  %v6383_v13 = vor.u32 %v7007_v5, %v6382_v4  ;;  %v6366_v30 = vld [vmem:[#allocation11 + $0x90] sm:$0xf]  ;;  %v6454_v4 = vld [vmem:[#allocation11 + $0x140] sm:$0xf]  ;;  %v7024_v5 = vld [vmem:[#allocation11 + $0x144] sm:$0xf] }
 0x235   : > { %4163 = vmatpush.bf16.msra.mxu2 %v6335_v16  ;;  %v6986_v16 = vld [vmem:[#allocation11 + $0x14] sm:$0xf] }
 0x236   : > { %v6307_v8 = vor.u32 %v6986_v16, %v6304_v20  ;;  %v6446_v20 = vld [vmem:[#allocation11 + $0x130] sm:$0xf] }
 0x238   : > { %4175 = vmatpush.bf16.msra.mxu3 %v6407_v42  ;;  %v7031_v42 = vld [vmem:[#allocation11 + $0x174] sm:$0xf0] }
 0x239   : > { %4164 = vmatpush.bf16.msra.mxu2 %v6327_v12  ;;  %v7005_v12 = vld [vmem:[#allocation11 + $0xa4] sm:$0xf0] }
 0x23a   : > { %v6375_v34 = vor.u32 %v7005_v12, %v6374_v21  ;;  %v6448_v21 = vld [vmem:[#allocation11 + $0x138] sm:$0xf0] }
 0x23c   : > { %4176 = vmatpush.bf16.msra.mxu3 %v6399_v52  ;;  %v6470_v52 = vld [vmem:[#allocation11 + $0x160] sm:$0xf] }
 0x23d   : > { %4165 = vmatpush.bf16.msra.mxu2 %v6319_v29  ;;  %v6395_v29 = vor.u32 %v7008_v27, %v6392_v10  ;;  %v6471_v54 = vor.u32 %v7029_v18, %v6470_v52  ;;  %v6439_v10 = vor.u32 %v7021_v24, %v6438_v17  ;;  %v7055_v24 = vld [vmem:[#allocation17 + $0x38] sm:$0xff] }
 0x241   : > { %4166 = vmatpush.bf16.msra.mxu2 %v6311_v39  ;;  %v6478_v39 = vld [vmem:[#allocation11 + $0x170] sm:$0xf] }
 0x242   : > { %v6479_v45 = vor.u32 %v7031_v42, %v6478_v39  ;;  %v6432_v42 = vld [vmem:[#allocation11 + $0x118] sm:$0xf0] }
 0x244   : > { %v3740_v62 = vpop.f32.mrf.mxu0  ;;  %4187 = vmatpush.bf16.msrb.mxu0 %v6479_v45 }
 0x245   : > { %v3741_v63 = vadd.f32 %v3740_v62, %v3021_v23  ;;  %v3753_v0 = vpop.f32.mrf.mxu1  ;;  %4167 = vmatpush.bf16.msra.mxu2 %v6303_v51  ;;  %v6419_v23 = vor.u32 %v7014_v22, %v6416_v61  ;;  %v6390_v62 = vld [vmem:[#allocation11 + $0xc0] sm:$0xf]  ;;  %v6368_v22 = vld [vmem:[#allocation11 + $0x98] sm:$0xf0] }
 0x247   : > { %v8020_v31 = vadd.f32 %v3753_v0, %v3741_v63  ;;  %v7009_v63 = vld [vmem:[#allocation11 + $0xc4] sm:$0xf0] }
 0x248   : > { %v6391_v0 = vor.u32 %v7009_v63, %v6390_v62  ;;  %4188 = vmatpush.bf16.msrb.mxu0 %v6471_v54  ;;  %v7027_v62 = vld [vmem:[#allocation11 + $0x154] sm:$0xf0]  ;;  %v7026_v63 = vld [vmem:[#allocation11 + $0x154] sm:$0xf] }
 0x249   : > { %4168 = vmatpush.bf16.msra.mxu2 %v6295_v19  ;;  %v7002_v19 = vld [vmem:[#allocation11 + $0x94] sm:$0xf] }
 0x24a   : > { %4177 = vmatpush.bf16.msra.mxu3 %v6391_v0  ;;  %v6371_v61 = vor.u32 %v7002_v19, %v6368_v22 }
 0x24c   : > { %v3742_v46 = vpop.f32.mrf.mxu0 }
 0x24d   : > { %v3755_v1 = vpop.f32.mrf.mxu1  ;;  %v6988_v46 = vld [vmem:[#allocation11 + $0x24] sm:$0xf]  ;;  %4213 = vmatpush.bf16.msrb.mxu2 %v6419_v23  ;;  %v6462_v23 = vld [vmem:[#allocation11 + $0x150] sm:$0xf] }
 0x24e   : > { %v6312_v1 = vld [vmem:[#allocation11 + $0x28] sm:$0xf0]  ;;  %4178 = vmatpush.bf16.msra.mxu3 %v6383_v13  ;;  %v6463_v0 = vor.u32 %v7027_v62, %v6462_v23 }
 0x24f   : > { %v6315_v2 = vor.u32 %v6988_v46, %v6312_v1  ;;  %v6464_v46 = vld [vmem:[#allocation11 + $0x158] sm:$0xf0] }
 0x250   : > { %v6467_v1 = vor.u32 %v7026_v63, %v6464_v46  ;;  %4189 = vmatpush.bf16.msrb.mxu0 %v6463_v0 }
 0x251   : > { %4205 = vmatpush.bf16.msrb.mxu1 %v6315_v2  ;;  %4214 = vmatpush.bf16.msrb.mxu2 %v6411_v49  ;;  %v7000_v2 = vld [vmem:[#allocation11 + $0x84] sm:$0xf]  ;;  %v7025_v49 = vld [vmem:[#allocation11 + $0x144] sm:$0xf0] }
 0x252   : > { %4179 = vmatpush.bf16.msra.mxu3 %v6375_v34  ;;  %v6363_v56 = vor.u32 %v7000_v2, %v6360_v3  ;;  %v6455_v13 = vor.u32 %v7025_v49, %v6454_v4  ;;  %v6451_v34 = vor.u32 %v7022_v9, %v6448_v21  ;;  %v7039_v3 = vld [vmem:[#allocation14 + $0x38] sm:$0xff]  ;;  %v7046_v49 = vld [vmem:[#allocation14 + $0x70] sm:$0xff] }
 0x253   : > { %v7047_v4 = vld [vmem:[#allocation14 + $0x78] sm:$0xff]  ;;  %v7042_v9 = vld [vmem:[#allocation14 + $0x50] sm:$0xff] }
 0x254   : > { %4190 = vmatpush.bf16.msrb.mxu0 %v6455_v13  ;;  %v7044_v13 = vld [vmem:[#allocation14 + $0x60] sm:$0xff] }
 0x255   : > { %4206 = vmatpush.bf16.msrb.mxu1 %v6307_v8  ;;  %4215 = vmatpush.bf16.msrb.mxu2 %v6403_v58  ;;  %v7023_v8 = vld [vmem:[#allocation11 + $0x134] sm:$0xf0] }
 0x256   : > { %v6447_v58 = vor.u32 %v7023_v8, %v6446_v20  ;;  %v7043_v20 = vld [vmem:[#allocation14 + $0x58] sm:$0xff]  ;;  %v7033_v8 = vld [vmem:[#allocation14 + $0x8] sm:$0xff] }
 0x258   : > { %v8022_v7 = vpop.f32.mrf.mxu2  ;;  %4191 = vmatpush.bf16.msrb.mxu0 %v6447_v58  ;;  %v7032_v58 = vld [vmem:[#allocation14] sm:$0xff] }
 0x259   : > { %4207 = vmatpush.bf16.msrb.mxu1 %v6299_v26  ;;  %4216 = vmatpush.bf16.msrb.mxu2 %v6395_v29  ;;  %v7020_v26 = vld [vmem:[#allocation11 + $0x124] sm:$0xf]  ;;  %v3715_v27 = vadd.f32 %v8022_v7, %v8016_v60  ;;  %v6440_v29 = vld [vmem:[#allocation11 + $0x128] sm:$0xf0]  ;;  %v6422_v60 = vld [vmem:[#allocation11 + $0x100] sm:$0xf] }
 0x25a   : > { %v7017_v7 = vld [vmem:[#allocation11 + $0x104] sm:$0xf0] }
 0x25b   : > { %v6423_v25 = vor.u32 %v7017_v7, %v6422_v60 }
 0x25c   : > { %4192 = vmatpush.bf16.msrb.mxu0 %v6439_v10 }
 0x25d   : > { %4217 = vmatpush.bf16.msrb.mxu2 %v6387_v33  ;;  %v7019_v33 = vld [vmem:[#allocation11 + $0x114] sm:$0xf0]  ;;  %4388 = vmatpush.bf16.msra.mxu1 %v7047_v4 }
 0x25e   : > { %v6431_v39 = vor.u32 %v7019_v33, %v6430_v32  ;;  %v7051_v33 = vld [vmem:[#allocation17 + $0x18] sm:$0xff] }
 0x260   : > { %v3716_v40 = vpop.f32.mrf.mxu2  ;;  %4193 = vmatpush.bf16.msrb.mxu0 %v6431_v39 }
 0x261   : > { %v7003_v40 = vld [vmem:[#allocation11 + $0x94] sm:$0xf0]  ;;  %4218 = vmatpush.bf16.msrb.mxu2 %v6379_v15  ;;  %v6427_v15 = vor.u32 %v7016_v47, %v6424_v35  ;;  %4389 = vmatpush.bf16.msra.mxu1 %v7046_v49 }
 0x262   : > { %v6367_v14 = vor.u32 %v7003_v40, %v6366_v30  ;;  %v6443_v40 = vor.u32 %v7020_v26, %v6440_v29  ;;  %v7054_v26 = vld [vmem:[#allocation17 + $0x30] sm:$0xff]  ;;  %v7053_v29 = vld [vmem:[#allocation17 + $0x28] sm:$0xff] }
 0x264   : > { %4180 = vmatpush.bf16.msra.mxu3 %v6367_v14  ;;  %4194 = vmatpush.bf16.msrb.mxu0 %v6423_v25 }
 0x265   : > { %v8024_v48 = vpop.f32.mrf.mxu1  ;;  %4219 = vmatpush.bf16.msrb.mxu2 %v6371_v61  ;;  %v3022_v61 = vperm.slane %v8011_v38, 2  ;;  %v7037_v38 = vld [vmem:[#allocation14 + $0x28] sm:$0xff] }
 0x267   : > { %v3806_v23 = vadd.f32 %v8024_v48, %v3022_v61  ;;  %v7036_v48 = vld [vmem:[#allocation14 + $0x20] sm:$0xff] }
 0x268   : > { %v8026_v57 = vpop.f32.mrf.mxu2  ;;  %4375 = vmatpush.bf16.msra.mxu0 %v7039_v3 }
 0x269   : > { %4220 = vmatpush.bf16.msrb.mxu2 %v6363_v56  ;;  %v3767_v52 = vadd.f32 %v8026_v57, %v8020_v31  ;;  %v7038_v56 = vld [vmem:[#allocation14 + $0x30] sm:$0xff] }
 0x26c   : > { %4376 = vmatpush.bf16.msra.mxu0 %v7038_v56 }
 0x26d   : > { %v3807_v36 = vpop.f32.mrf.mxu1 }
 0x26e   : > { %v6359_v36 = vor.u32 %v7001_v37, %v6358_v41  ;;  %v7018_v41 = vld [vmem:[#allocation11 + $0x114] sm:$0xf] }
 0x26f   : > { %v6435_v43 = vor.u32 %v7018_v41, %v6432_v42 }
 0x270   : > { %v3768_v6 = vpop.f32.mrf.mxu2  ;;  %4181 = vmatpush.bf16.msra.mxu3 %v6359_v36  ;;  %4377 = vmatpush.bf16.msra.mxu0 %v7037_v38 }
 0x271   : > { %v6456_v6 = vld [vmem:[#allocation11 + $0x148] sm:$0xf0] }
 0x272   : > { %v6459_v16 = vor.u32 %v7024_v5, %v6456_v6  ;;  %v7035_v5 = vld [vmem:[#allocation14 + $0x18] sm:$0xff]  ;;  %v7034_v6 = vld [vmem:[#allocation14 + $0x10] sm:$0xff] }
 0x274   : > { %4226 = vmatpush.bf16.msrb.mxu3 %v6483_v50  ;;  %4378 = vmatpush.bf16.msra.mxu0 %v7036_v48 }
 0x278   : > { %v8028_v59 = vpop.f32.mrf.mxu2  ;;  %4227 = vmatpush.bf16.msrb.mxu3 %v6475_v44  ;;  %4379 = vmatpush.bf16.msra.mxu0 %v7035_v5 }
 0x279   : > { %v3819_v62 = vadd.f32 %v8028_v59, %v3806_v23  ;;  %v7045_v59 = vld [vmem:[#allocation14 + $0x68] sm:$0xff] }
 0x27a   : > { %4390 = vmatpush.bf16.msra.mxu1 %v7045_v59 }
 0x27c   : > { %4228 = vmatpush.bf16.msrb.mxu3 %v6467_v1  ;;  %4380 = vmatpush.bf16.msra.mxu0 %v7034_v6 }
 0x27e   : > { %4391 = vmatpush.bf16.msra.mxu1 %v7044_v13 }
 0x280   : > { %v3820_v51 = vpop.f32.mrf.mxu2  ;;  %4229 = vmatpush.bf16.msrb.mxu3 %v6459_v16  ;;  %4381 = vmatpush.bf16.msra.mxu0 %v7033_v8 }
 0x282   : > { %4392 = vmatpush.bf16.msra.mxu1 %v7043_v20 }
 0x284   : > { %4230 = vmatpush.bf16.msrb.mxu3 %v6451_v34  ;;  %4382 = vmatpush.bf16.msra.mxu0 %v7032_v58  ;;  %v7040_v34 = vld [vmem:[#allocation14 + $0x40] sm:$0xff] }
 0x286   : > { %4393 = vmatpush.bf16.msra.mxu1 %v7042_v9 }
 0x288   : > { %4231 = vmatpush.bf16.msrb.mxu3 %v6443_v40  ;;  %v7052_v40 = vld [vmem:[#allocation17 + $0x20] sm:$0xff] }
 0x28c   : > { %4232 = vmatpush.bf16.msrb.mxu3 %v6435_v43 }
 0x290   : > { %v3792_v11 = vpop.f32.mrf.mxu0  ;;  %4233 = vmatpush.bf16.msrb.mxu3 %v6427_v15 }
 0x291   : > { %v3857_v12 = vpop.f32.mrf.mxu1 }
 0x296   : > { %v3727_v30 = vpop.f32.mrf.mxu3 }
 0x297   : > { %v3728_v14 = vadd.f32 %v3727_v30, %v3715_v27  ;;  %v3915_v30 = vld [vmem:[#allocation13] sm:$0x3] }
 0x298   : > { %v3794_v28 = vpop.f32.mrf.mxu0 }
 0x299   : > { %v3861_v37 = vmax.f32 %v3728_v14, 0.0  ;;  %v3859_v36 = vpop.f32.mrf.mxu1  ;;  %v3917_v14 = vperm.slane %v3915_v30, 0 }
 0x29b   : > { %v3864_v45 = vpack.c.bf16 %v3861_v37, %v3861_v37  ;;  %v3918_v37 = vperm.slane %v3915_v30, 1 }
 0x29d   : > { %4169 = vmatmul.bf16.vlgmr.msra.gmra.mxu2 %v3864_v45  ;;  %4208 = vmatmul.bf16.vlgmr.msrb.gmra.mxu1 %v3864_v45 }
 0x29e   : > { %v3729_v50 = vpop.f32.mrf.mxu3  ;;  %4471 = vmatpush.bf16.msra.mxu2 %v7055_v24 }
 0x2a0   : > { %v3844_v51 = vpop.f32.mrf.mxu0 }
 0x2a2   : > { %4472 = vmatpush.bf16.msra.mxu2 %v7054_v26 }
 0x2a6   : > { %v3779_v18 = vpop.f32.mrf.mxu3  ;;  %4473 = vmatpush.bf16.msra.mxu2 %v7053_v29 }
 0x2a7   : > { %v3780_v53 = vadd.f32 %v3779_v18, %v3767_v52  ;;  %v7050_v52 = vld [vmem:[#allocation17 + $0x10] sm:$0xff]  ;;  %v7049_v18 = vld [vmem:[#allocation17 + $0x8] sm:$0xff] }
 0x2a8   : > { %v3846_v54 = vpop.f32.mrf.mxu0 }
 0x2a9   : > { %v3793_v55 = vadd.f32 %v3792_v11, %v3780_v53  ;;  %v7048_v53 = vld [vmem:[#allocation17] sm:$0xff] }
 0x2aa   : > { %4474 = vmatpush.bf16.msra.mxu2 %v7052_v40 }
 0x2ab   : > { %v3862_v44 = vmax.f32 %v3793_v55, 0.0  ;;  %v7214_v55 = vld [vmem:[#allocation16] ss:$0 sm:$0xff] }
 0x2ad   : > { %v3865_v19 = vpack.c.bf16 %v3862_v44, %v3862_v44 }
 0x2ae   : > { %v3781_v22 = vpop.f32.mrf.mxu3  ;;  %4475 = vmatpush.bf16.msra.mxu2 %v7051_v33 }
 0x2af   : > { %4182 = vmatmul.bf16.vlgmr.msra.gmra.mxu3 %v3865_v19  ;;  %4221 = vmatmul.bf16.vlgmr.msrb.gmra.mxu2 %v3865_v19 }
 0x2b2   : > { %4476 = vmatpush.bf16.msra.mxu2 %v7050_v52 }
 0x2b6   : > { %v3831_v63 = vpop.f32.mrf.mxu3  ;;  %4477 = vmatpush.bf16.msra.mxu2 %v7049_v18 }
 0x2b7   : > { %v3832_v0 = vadd.f32 %v3831_v63, %v3819_v62 }
 0x2b9   : > { %v3845_v46 = vadd.f32 %v3844_v51, %v3832_v0  ;;  %v7215_v0 = vld [vmem:[#allocation19] ss:$0 sm:$0xff] }
 0x2ba   : > { %4478 = vmatpush.bf16.msra.mxu2 %v7048_v53 }
 0x2bb   : > { %v3858_v1 = vadd.f32 %v3857_v12, %v3845_v46  ;;  %v7041_v12 = vld [vmem:[#allocation14 + $0x48] sm:$0xff] }
 0x2bc   : > { %4394 = vmatpush.bf16.msra.mxu1 %v7041_v12 }
 0x2bd   : > { %v3863_v31 = vmax.f32 %v3858_v1, 0.0 }
 0x2be   : > { %v3833_v57 = vpop.f32.mrf.mxu3 }
 0x2bf   : > { %v3866_v2 = vpack.c.bf16 %v3863_v31, %v3863_v31 }
 0x2c0   : > { %4395 = vmatpush.bf16.msra.mxu1 %v7040_v34 }
 0x2c1   : > { %4195 = vmatmul.bf16.vlgmr.msrb.gmra.mxu0 %v3866_v2  ;;  %4234 = vmatmul.bf16.vlgmr.msrb.gmra.mxu3 %v3866_v2 }
 0x31a   : > { %v4209_v16 = vpop.f32.mrf.mxu1 }
 0x31b   : > { %v4210_v43 = vadd.f32 %v4209_v16, %v3918_v37 }
 0x320   : > { %v4170_v11 = vpop.f32.mrf.mxu2 }
 0x321   : > { %v4171_v41 = vadd.f32 %v4170_v11, %v3917_v14 }
 0x322   : > { %v4211_v21 = vpop.f32.mrf.mxu1 }
 0x328   : > { %v4172_v17 = vpop.f32.mrf.mxu2 }
 0x332   : > { %v4183_v27 = vpop.f32.mrf.mxu3  ;;  %v4222_v10 = vpop.f32.mrf.mxu2 }
 0x333   : > { %v4184_v36 = vadd.f32 %v4183_v27, %v4171_v41  ;;  %v4223_v60 = vadd.f32 %v4222_v10, %v4210_v43 }
 0x33a   : > { %v4185_v28 = vpop.f32.mrf.mxu3  ;;  %v4224_v32 = vpop.f32.mrf.mxu2 }
 0x33e   : > { %v4196_v39 = vpop.f32.mrf.mxu0 }
 0x33f   : > { %v4197_v42 = vadd.f32 %v4196_v39, %v4184_v36 }
 0x341   : > { %v4239_v45 = vmax.f32 %v4197_v42, 0.0 }
 0x343   : > { %v4241_v7 = vpack.c.bf16 %v4239_v45, %v4239_v45 }
 0x344   : > { %v4235_v47 = vpop.f32.mrf.mxu3 }
 0x345   : > { %v4236_v25 = vadd.f32 %v4235_v47, %v4223_v60  ;;  %4383 = vmatmul.bf16.vlgmr.msra.gmra.mxu0 %v4241_v7 }
 0x346   : > { %v4198_v35 = vpop.f32.mrf.mxu0 }
 0x347   : > { %v4240_v50 = vmax.f32 %v4236_v25, 0.0 }
 0x349   : > { %v4242_v15 = vpack.c.bf16 %v4240_v50, %v4240_v50 }
 0x34b   : > { %4396 = vmatmul.bf16.vlgmr.msra.gmra.mxu1 %v4242_v15 }
 0x34c   : > { %v4237_v51 = vpop.f32.mrf.mxu3 }
 0x3c2   : > { %v4384_v54 = vpop.f32.mrf.mxu0 }
 0x3c3   : > { %v4385_v44 = vadd.f32 %v7214_v55, %v4384_v54 }
 0x3c8   : > { %v4397_v19 = vpop.f32.mrf.mxu1 }
 0x3c9   : > { %v4398_v22 = vadd.f32 %v4397_v19, %v4385_v44 }
 0x3ca   : > { %v4386_v61 = vpop.f32.mrf.mxu0 }
 0x3cb   : > { %v4401_v23 = vmax.f32 %v4398_v22, 0.0 }
 0x3cd   : > { %v4402_v62 = vpack.c.bf16 %v4401_v23, %v4401_v23 }
 0x3cf   : > { %4479 = vmatmul.bf16.vlgmr.msra.gmra.mxu2 %v4402_v62 }
 0x3d0   : > { %v4399_v63 = vpop.f32.mrf.mxu1 }
 0x452   : > { %v4480_v46 = vpop.f32.mrf.mxu2 }
 0x453   : > { %v4481_v1 = vadd.f32 %v7215_v0, %v4480_v46 }
 0x455   : > { %4484 = vst [vmem:[%s559_s1] sm:$0xff] %v4481_v1 }
 0x456   : > { %7574 = shalt.err (!%p7571_p8)
}
 0x457   : > { %7101 = dma.vmem_to_hbm [thread:$0]  (%p7825_p2), %s4499_s16, 128, %s4501_s3, %s4486_s28  }
 0x45a   : > { %v4482_v31 = vpop.f32.mrf.mxu2 }
 0x45b PF: > { %p7163_p9 = scmp.ge.s32.totalorder %s7633_s20, 2  ;;  %s4512_s22 = sand.u32 1, %s7621_s17  }
 0x45c   : > { %s4513_s14 = scalar_lea.sflag [#allocation4], %s4512_s22 }
 0x45d   : > { %p7139_p10 = pnand %p7163_p9, %p7829_p4 }
 0x45f   : > { %p7140_p12 = pneg %p7139_p10 }
 0x461   : > { %7616 = dma.done.wait (%p7140_p12), %s4513_s14, 128  }
 0x462   : > { %7618 = vsyncadd (%p7140_p12), %s4513_s14, 4294967168  ;;  %p29_p13 = scmp.ge.s32.totalorder %s7803_s30, 5   ;;  %s8107_s17 = smov %s7625_s18 }
 0x463   : > { %s8108_s18 = smov %s7629_s19  ;;  %s8109_s19 = smov %s7814_s11 }
 0x464   : > { %s8110_s20 = smov %s7803_s30  ;;  %31 = sbr.rel (!%p29_p13) target bundleno = 18 (0x12), region = 149 }
 0x469   :  { %4519 = vsyncpa [#allocation3], 1 }
 0x46a   :  { %4521 = vsyncpa [#allocation3 + $0x1], 1 }
 0x46b   :  { %4522 = vsyncpa [#allocation6], 1 }
 0x46c   :  { %4523 = vsyncpa [#allocation9], 1 }
 0x46d   :  { %4524 = vsyncpa [#allocation12], 1 }
 0x46e   :  { %4525 = vsyncpa [#allocation15], 1 }
 0x46f   :  { %4526 = vsyncpa [#allocation18], 1 }
 0x470   :  { %4527 = vsyncpa [#allocation4], 1 }
 0x471   :  { %4529 = vsyncpa [#allocation4 + $0x1], 1 }

</bundles_post_ra>
